<compile_context>
chip_gen: v6e
topology: v6e:2x2x1
jax: 0.10.0
libtpu: 0.0.40
codegen_flags: <defaults>
</compile_context>

<pallas_src>
import jax
import jax.numpy as jnp
from jax.experimental import pallas as pl
from jax.experimental.pallas import tpu as pltpu


def _round_up(x, m):
    return ((x + m - 1) // m) * m


# ---------------------------------------------------------------------------
# Plain-JAX glue: weight reshape, BN folding
# ---------------------------------------------------------------------------

def w_to_mat(w):
    """PyTorch Conv1d weight (Cout, Cin, K) -> (K*Cin, Cout), Cin fastest."""
    Cout, Cin, K = w.shape
    return jnp.transpose(w, (2, 1, 0)).reshape(K * Cin, Cout)


def bn_scale_shift(bn, eps=1e-5):
    gamma, beta, mean, var = bn
    scale = gamma / jnp.sqrt(var + eps)
    shift = beta - mean * scale
    return scale, shift


# ---------------------------------------------------------------------------
# Kernel 1: conv1 + BN1 + ReLU + maxpool1(k=8, s=8), fused
# ---------------------------------------------------------------------------

def _conv1_bn_relu_pool_kernel(x_ref, w_ref, s_ref, o_ref):
    """x_ref: (1, TLp*8, K*Cin) bf16 im2col patches, row = pooled_row*8 + window
       w_ref: (K*Cin, 128) bf16 conv1 weight with BN scale folded in
       s_ref: (1, 128) f32 BN shift
       o_ref: (1, TLp, 128) bf16 pooled output."""
    tlp = o_ref.shape[1]
    # One large-M MXU matmul for all 8 pool-window offsets of this tile.
    acc = jnp.dot(x_ref[0], w_ref[...], preferred_element_type=jnp.float32)
    # maxpool1(k=8,s=8): 8 consecutive f32 rows = exactly one (8,128) tile, so the
    # reshape is layout-free and the max is a cross-sublane reduce.
    pooled = jnp.max(acc.reshape(tlp, 8, 128), axis=1)
    # BN shift + ReLU hoisted out of the max (both commute with it).
    o_ref[0] = jnp.maximum(pooled + s_ref[...], 0.0).astype(o_ref.dtype)


def conv1_bn_relu_pool(x_ncl, w1, bn1, fs):
    """(B, Cin, L) -> ((B, Lp_pad, 128) bf16, Lp) with Lp = ((L-K)//S + 1) // 8."""
    B, Cin, L = x_ncl.shape
    K, S = fs // 2, fs // 4
    L1 = (L - K) // S + 1
    Lp = L1 // 8
    assert Lp >= 1, "input too short for conv1 + maxpool1"
    KC = K * Cin                                             # 192 (no lane pad)

    TLp = min(256, _round_up(Lp, 16))
    Lp_pad = _round_up(Lp, TLp)

    # Channels-last + bf16 once, then im2col over the first Lp*8 conv positions.
    # Conv position p = 8*r + w (r = pooled row, w = pool-window offset), so the
    # pool window is already folded into the row index: no patch transpose needed.
    x_blc = jnp.transpose(x_ncl, (0, 2, 1)).astype(jnp.bfloat16)        # (B, L, Cin)
    idx = (jnp.arange(Lp * 8, dtype=jnp.int32)[:, None] * S
           + jnp.arange(K, dtype=jnp.int32)[None, :])                   # (Lp*8, K)
    patches = x_blc[:, idx, :].reshape(B, Lp * 8, KC)
    patches = jnp.pad(patches, ((0, 0), (0, (Lp_pad - Lp) * 8), (0, 0)))

    scale, shift = bn_scale_shift(bn1)
    w_mat = (w_to_mat(w1) * scale[None, :]).astype(jnp.bfloat16)        # (KC, 128)
    shift = shift.reshape(1, 128).astype(jnp.float32)

    cost = pl.CostEstimate(
        flops=2 * B * Lp_pad * 8 * KC * 128,
        transcendentals=0,
        bytes_accessed=(B * Lp_pad * 8 * KC * 2 + KC * 128 * 2
                        + B * Lp_pad * 128 * 2),
    )
    out = pl.pallas_call(
        _conv1_bn_relu_pool_kernel,
        out_shape=jax.ShapeDtypeStruct((B, Lp_pad, 128), jnp.bfloat16),
        grid=(B, Lp_pad // TLp),
        in_specs=[
            pl.BlockSpec((1, TLp * 8, KC), lambda b, i: (b, i, 0)),
            pl.BlockSpec((KC, 128), lambda b, i: (0, 0)),
            pl.BlockSpec((1, 128), lambda b, i: (0, 0)),
        ],
        out_specs=pl.BlockSpec((1, TLp, 128), lambda b, i: (b, i, 0)),
        compiler_params=pltpu.CompilerParams(
            dimension_semantics=("parallel", "parallel"),
            vmem_limit_bytes=32 * 1024 * 1024,
        ),
        cost_estimate=cost,
    )(patches, w_mat, shift)
    # Rows >= Lp of the output are padding garbage; callers must ignore them.
    return out, Lp


# ---------------------------------------------------------------------------
# Kernel 2: fused tail  conv2 -> conv3 -> conv4 (k=8,s=1) -> maxpool2(k=4,s=4)
# ---------------------------------------------------------------------------

def _make_tail_kernel(lp_valid, lout):
    l2, l3, l4 = lp_valid - 7, lp_valid - 14, lp_valid - 21

    def conv8(src_ref, lin, w_ref, s_ref):
        """Shifted-matmul conv(k=8,s=1) + BN shift + ReLU, batched across TB.
           src_ref: (>=lin, TB, C) bf16 ref -> returns (lo*TB, C) f32."""
        lo = lin - 7
        tb, c = src_ref.shape[1], src_ref.shape[2]
        # Leading-dim slices are free; (lo, TB, C) -> (lo*TB, C) merges into the
        # sublane axis and TB is a multiple of 16, so the reshape is tile-aligned.
        acc = jnp.dot(src_ref[pl.ds(0, lo), :, :].reshape(lo * tb, c), w_ref[0],
                      preferred_element_type=jnp.float32)
        for k in range(1, 8):
            acc = acc + jnp.dot(
                src_ref[pl.ds(k, lo), :, :].reshape(lo * tb, c), w_ref[k],
                preferred_element_type=jnp.float32)
        return jnp.maximum(acc + s_ref[...], 0.0)

    def kernel(x_ref, w2_ref, s2_ref, w3_ref, s3_ref, w4_ref, s4_ref, o_ref,
               y2_ref, y3_ref):
        tb, c = x_ref.shape[1], x_ref.shape[2]
        y2_ref[...] = conv8(x_ref, lp_valid, w2_ref, s2_ref) \
            .reshape(l2, tb, c).astype(jnp.bfloat16)
        y3_ref[...] = conv8(y2_ref, l2, w3_ref, s3_ref) \
            .reshape(l3, tb, c).astype(jnp.bfloat16)
        y4 = conv8(y3_ref, l3, w4_ref, s4_ref).reshape(l4, tb, c)        # f32
        # maxpool2(k=4,s=4): max of 4 leading-dim slabs, dense (TB x 128) store.
        for j in range(lout):
            o_ref[j] = jnp.maximum(
                jnp.maximum(y4[4 * j], y4[4 * j + 1]),
                jnp.maximum(y4[4 * j + 2], y4[4 * j + 3]))

    return kernel


def tail_conv_pool(y1_full, lp_valid, params):
    """(B, Lp_pad, 128) bf16 (rows >= lp_valid are padding) -> (B, 128, Lout) f32."""
    B, Lp_pad, C = y1_full.shape
    L4 = lp_valid - 21
    assert L4 >= 4, "input too short for conv2/3/4 + maxpool2"
    Lout = L4 // 4
    l2, l3 = lp_valid - 7, lp_valid - 14

    # Batch tile: multiple of 16 so all (lo, TB, C) <-> (lo*TB, C) merges stay
    # sublane-tile aligned; >= 2 grid steps (v7x megacore) once batch is large.
    if B <= 16:
        TB = 16
    else:
        TB = min(64, _round_up((B + 1) // 2, 16))
    B_pad = _round_up(B, TB)

    # Put batch on the sublane axis: each k-shift becomes a free leading-dim
    # slice and one matmul covers the whole batch tile.  (Tiny array; cheap.)
    x = jnp.transpose(y1_full, (1, 0, 2))                        # (Lp_pad, B, C)
    x = jnp.pad(x, ((0, 0), (0, B_pad - B), (0, 0)))

    def prep(wname, bnname):
        s, sh = bn_scale_shift(params[bnname])
        w = jnp.transpose(params[wname], (2, 1, 0))              # (K=8, Cin, Cout)
        return ((w * s[None, None, :]).astype(jnp.bfloat16),
                sh.reshape(1, C).astype(jnp.float32))

    w2, s2 = prep("conv2", "bn2")
    w3, s3 = prep("conv3", "bn3")
    w4, s4 = prep("conv4", "bn4")

    cost = pl.CostEstimate(
        flops=2 * B_pad * 8 * C * C * (l2 + l3 + L4),
        transcendentals=0,
        bytes_accessed=(Lp_pad * B_pad * C * 2 + 3 * 8 * C * C * 2
                        + Lout * B_pad * C * 4),
    )
    out = pl.pallas_call(
        _make_tail_kernel(lp_valid, Lout),
        out_shape=jax.ShapeDtypeStruct((Lout, B_pad, C), jnp.float32),
        grid=(B_pad // TB,),
        in_specs=[
            pl.BlockSpec((Lp_pad, TB, C), lambda i: (0, i, 0)),
            pl.BlockSpec((8, C, C), lambda i: (0, 0, 0)),
            pl.BlockSpec((1, C), lambda i: (0, 0)),
            pl.BlockSpec((8, C, C), lambda i: (0, 0, 0)),
            pl.BlockSpec((1, C), lambda i: (0, 0)),
            pl.BlockSpec((8, C, C), lambda i: (0, 0, 0)),
            pl.BlockSpec((1, C), lambda i: (0, 0)),
        ],
        out_specs=pl.BlockSpec((Lout, TB, C), lambda i: (0, i, 0)),
        scratch_shapes=[
            pltpu.VMEM((l2, TB, C), jnp.bfloat16),
            pltpu.VMEM((l3, TB, C), jnp.bfloat16),
        ],
        compiler_params=pltpu.CompilerParams(
            dimension_semantics=("parallel",),
            vmem_limit_bytes=32 * 1024 * 1024,
        ),
        cost_estimate=cost,
    )(x, w2, s2, w3, s3, w4, s4)
    return jnp.transpose(out[:, :B, :], (1, 2, 0))               # (B, 128, Lout)


# ---------------------------------------------------------------------------
# Forward pass (mirrors tiny_CNN.forward, eval mode), parameter init, reference
# ---------------------------------------------------------------------------

def tiny_cnn_forward(x_ncl, params, fs=128):
    # padconv*/padmaxpool* are (0,0) pads -> no-ops; dropout1/2 identity (eval).
    y1_full, lp = conv1_bn_relu_pool(x_ncl, params["conv1"], params["bn1"], fs)
    return tail_conv_pool(y1_full, lp, params)


def init_params(key, n_inchan=3, fs=128):
    ks = jax.random.split(key, 8)

    def conv_w(k, cout, cin, ksz):
        fan_in = cin * ksz
        return jax.random.normal(k, (cout, cin, ksz), jnp.float32) / jnp.sqrt(fan_in)

    def bn(k, c):
        k1, k2, k3, k4 = jax.random.split(k, 4)
        gamma = 1.0 + 0.1 * jax.random.normal(k1, (c,), jnp.float32)
        beta = 0.1 * jax.random.normal(k2, (c,), jnp.float32)
        mean = 0.1 * jax.random.normal(k3, (c,), jnp.float32)
        var = 0.5 + jnp.abs(jax.random.normal(k4, (c,), jnp.float32))
        return gamma, beta, mean, var

    return {
        "conv1": conv_w(ks[0], 128, n_inchan, fs // 2), "bn1": bn(ks[1], 128),
        "conv2": conv_w(ks[2], 128, 128, 8),            "bn2": bn(ks[3], 128),
        "conv3": conv_w(ks[4], 128, 128, 8),            "bn3": bn(ks[5], 128),
        "conv4": conv_w(ks[6], 128, 128, 8),            "bn4": bn(ks[7], 128),
    }


def tiny_cnn_reference(x_ncl, params, fs=128, eps=1e-5):
    """Pure-JAX f32 reference (inference-mode BN, no dropout)."""
    def conv1d(x, w, stride):
        return jax.lax.conv_general_dilated(
            x, w, window_strides=(stride,), padding="VALID",
            dimension_numbers=("NCH", "OIH", "NCH"))

    def bn_relu(x, p):
        gamma, beta, mean, var = p
        s = gamma / jnp.sqrt(var + eps)
        return jnp.maximum(x * s[None, :, None] + (beta - mean * s)[None, :, None], 0.0)

    def maxpool(x, k):
        b, c, l = x.shape
        lo = l // k
        return jnp.max(x[:, :, :lo * k].reshape(b, c, lo, k), axis=-1)

    x = maxpool(bn_relu(conv1d(x_ncl, params["conv1"], fs // 4), params["bn1"]), 8)
    x = bn_relu(conv1d(x, params["conv2"], 1), params["bn2"])
    x = bn_relu(conv1d(x, params["conv3"], 1), params["bn3"])
    x = bn_relu(conv1d(x, params["conv4"], 1), params["bn4"])
    return maxpool(x, 4)


# ---------------------------------------------------------------------------

if __name__ == "__main__":
    key = jax.random.PRNGKey(0)
    kx, kp = jax.random.split(key)

    # Smallest L surviving conv1(k=64,s=32) -> pool/8 -> 3x conv(k=8) -> pool/4.
    B, C, L = 2, 3, 6432
    x = jax.random.normal(kx, (B, C, L), jnp.float32)
    params = init_params(kp, n_inchan=C, fs=128)

    fwd = jax.jit(lambda inp: tiny_cnn_forward(inp, params, fs=128))
    out = fwd(x)
    jax.block_until_ready(out)

    # L1=200 -> pool 25 -> 18 -> 11 -> 4 -> pool 1
    assert out.shape == (B, 128, 1), out.shape
    assert bool(jnp.all(jnp.isfinite(out)))

    # bf16 MXU path vs pure-f32 reference: loose tolerance.
    ref = tiny_cnn_reference(x, params, fs=128)
    rel = float(jnp.max(jnp.abs(out - ref)) / (jnp.max(jnp.abs(ref)) + 1e-6))
    assert rel < 5e-2, f"mismatch vs f32 reference: rel={rel}"

    print("KERNEL_OK")
</pallas_src>

<mosaic_0001>
module attributes {stable_mosaic.version = 11 : i64} {
  func.func @_conv1_bn_relu_pool_kernel(%arg0: i32, %arg1: i32, %arg2: memref<1x256x192xbf16, #tpu.memory_space<vmem>>, %arg3: memref<192x128xbf16, #tpu.memory_space<vmem>>, %arg4: memref<1x128xf32, #tpu.memory_space<vmem>>, %arg5: memref<1x32x128xbf16, #tpu.memory_space<vmem>>) attributes {dimension_semantics = [#tpu.dimension_semantics<parallel>, #tpu.dimension_semantics<parallel>], iteration_bounds = array<i64: 2, 1>, scalar_prefetch = 0 : i64, scratch_operands = 0 : i64, tpu.core_type = #tpu.core_type<tc>, window_params = [{transform_indices = @transform_0, window_bounds = array<i64: 1, 256, 192>}, {pipeline_mode = #tpu.pipeline_mode<synchronous>, transform_indices = @transform_1, window_bounds = array<i64: 192, 128>}, {pipeline_mode = #tpu.pipeline_mode<synchronous>, transform_indices = @transform_2, window_bounds = array<i64: 1, 128>}, {transform_indices = @transform_3, window_bounds = array<i64: 1, 32, 128>}]} {
    %c0 = arith.constant 0 : index
    %c0_0 = arith.constant 0 : index
    %c0_1 = arith.constant 0 : index
    %0 = vector.load %arg2[%c0, %c0_0, %c0_1] : memref<1x256x192xbf16, #tpu.memory_space<vmem>>, vector<1x256x192xbf16>
    %1 = vector.shape_cast %0 : vector<1x256x192xbf16> to vector<256x192xbf16>
    %c0_2 = arith.constant 0 : index
    %c0_3 = arith.constant 0 : index
    %2 = vector.load %arg3[%c0_2, %c0_3] : memref<192x128xbf16, #tpu.memory_space<vmem>>, vector<192x128xbf16>
    %cst = arith.constant dense<0.000000e+00> : vector<256x128xf32>
    %3 = tpu.matmul %1, %2, %cst {dimension_numbers = #tpu.dot_dimension_numbers<[1], [0], [0], [1], [0, 0, 1, 1], [], []>} : vector<256x192xbf16>, vector<192x128xbf16>, vector<256x128xf32> -> vector<256x128xf32>
    %4 = vector.shape_cast %3 : vector<256x128xf32> to vector<32x8x128xf32>
    %cst_4 = arith.constant dense<0xFF800000> : vector<32x128xf32>
    %5 = vector.multi_reduction <maximumf>, %4, %cst_4 [1] : vector<32x8x128xf32> to vector<32x128xf32>
    %c0_5 = arith.constant 0 : index
    %c0_6 = arith.constant 0 : index
    %6 = vector.load %arg4[%c0_5, %c0_6] : memref<1x128xf32, #tpu.memory_space<vmem>>, vector<1x128xf32>
    %7 = vector.broadcast %6 : vector<1x128xf32> to vector<32x128xf32>
    %8 = arith.addf %5, %7 : vector<32x128xf32>
    %cst_7 = arith.constant 0.000000e+00 : f32
    %9 = vector.broadcast %cst_7 : f32 to vector<32x128xf32>
    %10 = arith.maximumf %8, %9 : vector<32x128xf32>
    %11 = arith.truncf %10 : vector<32x128xf32> to vector<32x128xbf16>
    %c0_8 = arith.constant 0 : index
    %c0_9 = arith.constant 0 : index
    %c0_10 = arith.constant 0 : index
    %12 = vector.load %arg5[%c0_8, %c0_9, %c0_10] : memref<1x32x128xbf16, #tpu.memory_space<vmem>>, vector<1x32x128xbf16>
    %13 = vector.shape_cast %12 : vector<1x32x128xbf16> to vector<32x128xbf16>
    %14 = vector.shape_cast %11 : vector<32x128xbf16> to vector<1x32x128xbf16>
    tpu.vector_store %arg5[%c0_8, %c0_9, %c0_10], %14 {strides = array<i32>} : memref<1x32x128xbf16, #tpu.memory_space<vmem>>, vector<1x32x128xbf16>,
    return
  }
  func.func @transform_0(%arg0: i32, %arg1: i32) -> (i32, i32, i32) {
    %c0_i32 = arith.constant 0 : i32
    %c0_i32_0 = arith.constant 0 : i32
    return %arg0, %arg1, %c0_i32 : i32, i32, i32
  }
  func.func @transform_1(%arg0: i32, %arg1: i32) -> (i32, i32) {
    %c0_i32 = arith.constant 0 : i32
    %c0_i32_0 = arith.constant 0 : i32
    %c0_i32_1 = arith.constant 0 : i32
    return %c0_i32, %c0_i32_0 : i32, i32
  }
  func.func @transform_2(%arg0: i32, %arg1: i32) -> (i32, i32) {
    %c0_i32 = arith.constant 0 : i32
    %c0_i32_0 = arith.constant 0 : i32
    %c0_i32_1 = arith.constant 0 : i32
    return %c0_i32, %c0_i32_0 : i32, i32
  }
  func.func @transform_3(%arg0: i32, %arg1: i32) -> (i32, i32, i32) {
    %c0_i32 = arith.constant 0 : i32
    %c0_i32_0 = arith.constant 0 : i32
    return %arg0, %arg1, %c0_i32 : i32, i32, i32
  }
}

module attributes {stable_mosaic.version = 11 : i64} {
  func.func @kernel(%arg0: i32, %arg1: memref<32x16x128xbf16, #tpu.memory_space<vmem>>, %arg2: memref<8x128x128xbf16, #tpu.memory_space<vmem>>, %arg3: memref<1x128xf32, #tpu.memory_space<vmem>>, %arg4: memref<8x128x128xbf16, #tpu.memory_space<vmem>>, %arg5: memref<1x128xf32, #tpu.memory_space<vmem>>, %arg6: memref<8x128x128xbf16, #tpu.memory_space<vmem>>, %arg7: memref<1x128xf32, #tpu.memory_space<vmem>>, %arg8: memref<1x16x128xf32, #tpu.memory_space<vmem>>, %arg9: memref<18x16x128xbf16, #tpu.memory_space<vmem>>, %arg10: memref<11x16x128xbf16, #tpu.memory_space<vmem>>) attributes {dimension_semantics = [#tpu.dimension_semantics<parallel>], iteration_bounds = array<i64: 1>, scalar_prefetch = 0 : i64, scratch_operands = 2 : i64, tpu.core_type = #tpu.core_type<tc>, window_params = [{transform_indices = @transform_0, window_bounds = array<i64: 32, 16, 128>}, {pipeline_mode = #tpu.pipeline_mode<synchronous>, transform_indices = @transform_1, window_bounds = array<i64: 8, 128, 128>}, {pipeline_mode = #tpu.pipeline_mode<synchronous>, transform_indices = @transform_2, window_bounds = array<i64: 1, 128>}, {pipeline_mode = #tpu.pipeline_mode<synchronous>, transform_indices = @transform_3, window_bounds = array<i64: 8, 128, 128>}, {pipeline_mode = #tpu.pipeline_mode<synchronous>, transform_indices = @transform_4, window_bounds = array<i64: 1, 128>}, {pipeline_mode = #tpu.pipeline_mode<synchronous>, transform_indices = @transform_5, window_bounds = array<i64: 8, 128, 128>}, {pipeline_mode = #tpu.pipeline_mode<synchronous>, transform_indices = @transform_6, window_bounds = array<i64: 1, 128>}, {transform_indices = @transform_7, window_bounds = array<i64: 1, 16, 128>}]} {
    %c0 = arith.constant 0 : index
    %c0_0 = arith.constant 0 : index
    %c0_1 = arith.constant 0 : index
    %0 = vector.load %arg1[%c0, %c0_0, %c0_1] : memref<32x16x128xbf16, #tpu.memory_space<vmem>>, vector<18x16x128xbf16>
    %1 = vector.shape_cast %0 : vector<18x16x128xbf16> to vector<288x128xbf16>
    %c0_2 = arith.constant 0 : index
    %c0_3 = arith.constant 0 : index
    %c0_4 = arith.constant 0 : index
    %2 = vector.load %arg2[%c0_2, %c0_3, %c0_4] : memref<8x128x128xbf16, #tpu.memory_space<vmem>>, vector<1x128x128xbf16>
    %3 = vector.shape_cast %2 : vector<1x128x128xbf16> to vector<128x128xbf16>
    %cst = arith.constant dense<0.000000e+00> : vector<288x128xf32>
    %4 = tpu.matmul %1, %3, %cst {dimension_numbers = #tpu.dot_dimension_numbers<[1], [0], [0], [1], [0, 0, 1, 1], [], []>} : vector<288x128xbf16>, vector<128x128xbf16>, vector<288x128xf32> -> vector<288x128xf32>
    %c1 = arith.constant 1 : index
    %c0_5 = arith.constant 0 : index
    %c0_6 = arith.constant 0 : index
    %5 = vector.load %arg1[%c1, %c0_5, %c0_6] : memref<32x16x128xbf16, #tpu.memory_space<vmem>>, vector<18x16x128xbf16>
    %6 = vector.shape_cast %5 : vector<18x16x128xbf16> to vector<288x128xbf16>
    %c1_7 = arith.constant 1 : index
    %c0_8 = arith.constant 0 : index
    %c0_9 = arith.constant 0 : index
    %7 = vector.load %arg2[%c1_7, %c0_8, %c0_9] : memref<8x128x128xbf16, #tpu.memory_space<vmem>>, vector<1x128x128xbf16>
    %8 = vector.shape_cast %7 : vector<1x128x128xbf16> to vector<128x128xbf16>
    %cst_10 = arith.constant dense<0.000000e+00> : vector<288x128xf32>
    %9 = tpu.matmul %6, %8, %cst_10 {dimension_numbers = #tpu.dot_dimension_numbers<[1], [0], [0], [1], [0, 0, 1, 1], [], []>} : vector<288x128xbf16>, vector<128x128xbf16>, vector<288x128xf32> -> vector<288x128xf32>
    %10 = arith.addf %4, %9 : vector<288x128xf32>
    %c2 = arith.constant 2 : index
    %c0_11 = arith.constant 0 : index
    %c0_12 = arith.constant 0 : index
    %11 = vector.load %arg1[%c2, %c0_11, %c0_12] : memref<32x16x128xbf16, #tpu.memory_space<vmem>>, vector<18x16x128xbf16>
    %12 = vector.shape_cast %11 : vector<18x16x128xbf16> to vector<288x128xbf16>
    %c2_13 = arith.constant 2 : index
    %c0_14 = arith.constant 0 : index
    %c0_15 = arith.constant 0 : index
    %13 = vector.load %arg2[%c2_13, %c0_14, %c0_15] : memref<8x128x128xbf16, #tpu.memory_space<vmem>>, vector<1x128x128xbf16>
    %14 = vector.shape_cast %13 : vector<1x128x128xbf16> to vector<128x128xbf16>
    %cst_16 = arith.constant dense<0.000000e+00> : vector<288x128xf32>
    %15 = tpu.matmul %12, %14, %cst_16 {dimension_numbers = #tpu.dot_dimension_numbers<[1], [0], [0], [1], [0, 0, 1, 1], [], []>} : vector<288x128xbf16>, vector<128x128xbf16>, vector<288x128xf32> -> vector<288x128xf32>
    %16 = arith.addf %10, %15 : vector<288x128xf32>
    %c3 = arith.constant 3 : index
    %c0_17 = arith.constant 0 : index
    %c0_18 = arith.constant 0 : index
    %17 = vector.load %arg1[%c3, %c0_17, %c0_18] : memref<32x16x128xbf16, #tpu.memory_space<vmem>>, vector<18x16x128xbf16>
    %18 = vector.shape_cast %17 : vector<18x16x128xbf16> to vector<288x128xbf16>
    %c3_19 = arith.constant 3 : index
    %c0_20 = arith.constant 0 : index
    %c0_21 = arith.constant 0 : index
    %19 = vector.load %arg2[%c3_19, %c0_20, %c0_21] : memref<8x128x128xbf16, #tpu.memory_space<vmem>>, vector<1x128x128xbf16>
    %20 = vector.shape_cast %19 : vector<1x128x128xbf16> to vector<128x128xbf16>
    %cst_22 = arith.constant dense<0.000000e+00> : vector<288x128xf32>
    %21 = tpu.matmul %18, %20, %cst_22 {dimension_numbers = #tpu.dot_dimension_numbers<[1], [0], [0], [1], [0, 0, 1, 1], [], []>} : vector<288x128xbf16>, vector<128x128xbf16>, vector<288x128xf32> -> vector<288x128xf32>
    %22 = arith.addf %16, %21 : vector<288x128xf32>
    %c4 = arith.constant 4 : index
    %c0_23 = arith.constant 0 : index
    %c0_24 = arith.constant 0 : index
    %23 = vector.load %arg1[%c4, %c0_23, %c0_24] : memref<32x16x128xbf16, #tpu.memory_space<vmem>>, vector<18x16x128xbf16>
    %24 = vector.shape_cast %23 : vector<18x16x128xbf16> to vector<288x128xbf16>
    %c4_25 = arith.constant 4 : index
    %c0_26 = arith.constant 0 : index
    %c0_27 = arith.constant 0 : index
    %25 = vector.load %arg2[%c4_25, %c0_26, %c0_27] : memref<8x128x128xbf16, #tpu.memory_space<vmem>>, vector<1x128x128xbf16>
    %26 = vector.shape_cast %25 : vector<1x128x128xbf16> to vector<128x128xbf16>
    %cst_28 = arith.constant dense<0.000000e+00> : vector<288x128xf32>
    %27 = tpu.matmul %24, %26, %cst_28 {dimension_numbers = #tpu.dot_dimension_numbers<[1], [0], [0], [1], [0, 0, 1, 1], [], []>} : vector<288x128xbf16>, vector<128x128xbf16>, vector<288x128xf32> -> vector<288x128xf32>
    %28 = arith.addf %22, %27 : vector<288x128xf32>
    %c5 = arith.constant 5 : index
    %c0_29 = arith.constant 0 : index
    %c0_30 = arith.constant 0 : index
    %29 = vector.load %arg1[%c5, %c0_29, %c0_30] : memref<32x16x128xbf16, #tpu.memory_space<vmem>>, vector<18x16x128xbf16>
    %30 = vector.shape_cast %29 : vector<18x16x128xbf16> to vector<288x128xbf16>
    %c5_31 = arith.constant 5 : index
    %c0_32 = arith.constant 0 : index
    %c0_33 = arith.constant 0 : index
    %31 = vector.load %arg2[%c5_31, %c0_32, %c0_33] : memref<8x128x128xbf16, #tpu.memory_space<vmem>>, vector<1x128x128xbf16>
    %32 = vector.shape_cast %31 : vector<1x128x128xbf16> to vector<128x128xbf16>
    %cst_34 = arith.constant dense<0.000000e+00> : vector<288x128xf32>
    %33 = tpu.matmul %30, %32, %cst_34 {dimension_numbers = #tpu.dot_dimension_numbers<[1], [0], [0], [1], [0, 0, 1, 1], [], []>} : vector<288x128xbf16>, vector<128x128xbf16>, vector<288x128xf32> -> vector<288x128xf32>
    %34 = arith.addf %28, %33 : vector<288x128xf32>
    %c6 = arith.constant 6 : index
    %c0_35 = arith.constant 0 : index
    %c0_36 = arith.constant 0 : index
    %35 = vector.load %arg1[%c6, %c0_35, %c0_36] : memref<32x16x128xbf16, #tpu.memory_space<vmem>>, vector<18x16x128xbf16>
    %36 = vector.shape_cast %35 : vector<18x16x128xbf16> to vector<288x128xbf16>
    %c6_37 = arith.constant 6 : index
    %c0_38 = arith.constant 0 : index
    %c0_39 = arith.constant 0 : index
    %37 = vector.load %arg2[%c6_37, %c0_38, %c0_39] : memref<8x128x128xbf16, #tpu.memory_space<vmem>>, vector<1x128x128xbf16>
    %38 = vector.shape_cast %37 : vector<1x128x128xbf16> to vector<128x128xbf16>
    %cst_40 = arith.constant dense<0.000000e+00> : vector<288x128xf32>
    %39 = tpu.matmul %36, %38, %cst_40 {dimension_numbers = #tpu.dot_dimension_numbers<[1], [0], [0], [1], [0, 0, 1, 1], [], []>} : vector<288x128xbf16>, vector<128x128xbf16>, vector<288x128xf32> -> vector<288x128xf32>
    %40 = arith.addf %34, %39 : vector<288x128xf32>
    %c7 = arith.constant 7 : index
    %c0_41 = arith.constant 0 : index
    %c0_42 = arith.constant 0 : index
    %41 = vector.load %arg1[%c7, %c0_41, %c0_42] : memref<32x16x128xbf16, #tpu.memory_space<vmem>>, vector<18x16x128xbf16>
    %42 = vector.shape_cast %41 : vector<18x16x128xbf16> to vector<288x128xbf16>
    %c7_43 = arith.constant 7 : index
    %c0_44 = arith.constant 0 : index
    %c0_45 = arith.constant 0 : index
    %43 = vector.load %arg2[%c7_43, %c0_44, %c0_45] : memref<8x128x128xbf16, #tpu.memory_space<vmem>>, vector<1x128x128xbf16>
    %44 = vector.shape_cast %43 : vector<1x128x128xbf16> to vector<128x128xbf16>
    %cst_46 = arith.constant dense<0.000000e+00> : vector<288x128xf32>
    %45 = tpu.matmul %42, %44, %cst_46 {dimension_numbers = #tpu.dot_dimension_numbers<[1], [0], [0], [1], [0, 0, 1, 1], [], []>} : vector<288x128xbf16>, vector<128x128xbf16>, vector<288x128xf32> -> vector<288x128xf32>
    %46 = arith.addf %40, %45 : vector<288x128xf32>
    %c0_47 = arith.constant 0 : index
    %c0_48 = arith.constant 0 : index
    %47 = vector.load %arg3[%c0_47, %c0_48] : memref<1x128xf32, #tpu.memory_space<vmem>>, vector<1x128xf32>
    %48 = vector.broadcast %47 : vector<1x128xf32> to vector<288x128xf32>
    %49 = arith.addf %46, %48 : vector<288x128xf32>
    %cst_49 = arith.constant 0.000000e+00 : f32
    %50 = vector.broadcast %cst_49 : f32 to vector<288x128xf32>
    %51 = arith.maximumf %49, %50 : vector<288x128xf32>
    %52 = vector.shape_cast %51 : vector<288x128xf32> to vector<18x16x128xf32>
    %53 = arith.truncf %52 : vector<18x16x128xf32> to vector<18x16x128xbf16>
    %c0_50 = arith.constant 0 : index
    %c0_51 = arith.constant 0 : index
    %c0_52 = arith.constant 0 : index
    %54 = vector.load %arg9[%c0_50, %c0_51, %c0_52] : memref<18x16x128xbf16, #tpu.memory_space<vmem>>, vector<18x16x128xbf16>
    tpu.vector_store %arg9[%c0_50, %c0_51, %c0_52], %53 {strides = array<i32>} : memref<18x16x128xbf16, #tpu.memory_space<vmem>>, vector<18x16x128xbf16>,
    %c0_53 = arith.constant 0 : index
    %c0_54 = arith.constant 0 : index
    %c0_55 = arith.constant 0 : index
    %55 = vector.load %arg9[%c0_53, %c0_54, %c0_55] : memref<18x16x128xbf16, #tpu.memory_space<vmem>>, vector<11x16x128xbf16>
    %56 = vector.shape_cast %55 : vector<11x16x128xbf16> to vector<176x128xbf16>
    %c0_56 = arith.constant 0 : index
    %c0_57 = arith.constant 0 : index
    %c0_58 = arith.constant 0 : index
    %57 = vector.load %arg4[%c0_56, %c0_57, %c0_58] : memref<8x128x128xbf16, #tpu.memory_space<vmem>>, vector<1x128x128xbf16>
    %58 = vector.shape_cast %57 : vector<1x128x128xbf16> to vector<128x128xbf16>
    %cst_59 = arith.constant dense<0.000000e+00> : vector<176x128xf32>
    %59 = tpu.matmul %56, %58, %cst_59 {dimension_numbers = #tpu.dot_dimension_numbers<[1], [0], [0], [1], [0, 0, 1, 1], [], []>} : vector<176x128xbf16>, vector<128x128xbf16>, vector<176x128xf32> -> vector<176x128xf32>
    %c1_60 = arith.constant 1 : index
    %c0_61 = arith.constant 0 : index
    %c0_62 = arith.constant 0 : index
    %60 = vector.load %arg9[%c1_60, %c0_61, %c0_62] : memref<18x16x128xbf16, #tpu.memory_space<vmem>>, vector<11x16x128xbf16>
    %61 = vector.shape_cast %60 : vector<11x16x128xbf16> to vector<176x128xbf16>
    %c1_63 = arith.constant 1 : index
    %c0_64 = arith.constant 0 : index
    %c0_65 = arith.constant 0 : index
    %62 = vector.load %arg4[%c1_63, %c0_64, %c0_65] : memref<8x128x128xbf16, #tpu.memory_space<vmem>>, vector<1x128x128xbf16>
    %63 = vector.shape_cast %62 : vector<1x128x128xbf16> to vector<128x128xbf16>
    %cst_66 = arith.constant dense<0.000000e+00> : vector<176x128xf32>
    %64 = tpu.matmul %61, %63, %cst_66 {dimension_numbers = #tpu.dot_dimension_numbers<[1], [0], [0], [1], [0, 0, 1, 1], [], []>} : vector<176x128xbf16>, vector<128x128xbf16>, vector<176x128xf32> -> vector<176x128xf32>
    %65 = arith.addf %59, %64 : vector<176x128xf32>
    %c2_67 = arith.constant 2 : index
    %c0_68 = arith.constant 0 : index
    %c0_69 = arith.constant 0 : index
    %66 = vector.load %arg9[%c2_67, %c0_68, %c0_69] : memref<18x16x128xbf16, #tpu.memory_space<vmem>>, vector<11x16x128xbf16>
    %67 = vector.shape_cast %66 : vector<11x16x128xbf16> to vector<176x128xbf16>
    %c2_70 = arith.constant 2 : index
    %c0_71 = arith.constant 0 : index
    %c0_72 = arith.constant 0 : index
    %68 = vector.load %arg4[%c2_70, %c0_71, %c0_72] : memref<8x128x128xbf16, #tpu.memory_space<vmem>>, vector<1x128x128xbf16>
    %69 = vector.shape_cast %68 : vector<1x128x128xbf16> to vector<128x128xbf16>
    %cst_73 = arith.constant dense<0.000000e+00> : vector<176x128xf32>
    %70 = tpu.matmul %67, %69, %cst_73 {dimension_numbers = #tpu.dot_dimension_numbers<[1], [0], [0], [1], [0, 0, 1, 1], [], []>} : vector<176x128xbf16>, vector<128x128xbf16>, vector<176x128xf32> -> vector<176x128xf32>
    %71 = arith.addf %65, %70 : vector<176x128xf32>
    %c3_74 = arith.constant 3 : index
    %c0_75 = arith.constant 0 : index
    %c0_76 = arith.constant 0 : index
    %72 = vector.load %arg9[%c3_74, %c0_75, %c0_76] : memref<18x16x128xbf16, #tpu.memory_space<vmem>>, vector<11x16x128xbf16>
    %73 = vector.shape_cast %72 : vector<11x16x128xbf16> to vector<176x128xbf16>
    %c3_77 = arith.constant 3 : index
    %c0_78 = arith.constant 0 : index
    %c0_79 = arith.constant 0 : index
    %74 = vector.load %arg4[%c3_77, %c0_78, %c0_79] : memref<8x128x128xbf16, #tpu.memory_space<vmem>>, vector<1x128x128xbf16>
    %75 = vector.shape_cast %74 : vector<1x128x128xbf16> to vector<128x128xbf16>
    %cst_80 = arith.constant dense<0.000000e+00> : vector<176x128xf32>
    %76 = tpu.matmul %73, %75, %cst_80 {dimension_numbers = #tpu.dot_dimension_numbers<[1], [0], [0], [1], [0, 0, 1, 1], [], []>} : vector<176x128xbf16>, vector<128x128xbf16>, vector<176x128xf32> -> vector<176x128xf32>
    %77 = arith.addf %71, %76 : vector<176x128xf32>
    %c4_81 = arith.constant 4 : index
    %c0_82 = arith.constant 0 : index
    %c0_83 = arith.constant 0 : index
    %78 = vector.load %arg9[%c4_81, %c0_82, %c0_83] : memref<18x16x128xbf16, #tpu.memory_space<vmem>>, vector<11x16x128xbf16>
    %79 = vector.shape_cast %78 : vector<11x16x128xbf16> to vector<176x128xbf16>
    %c4_84 = arith.constant 4 : index
    %c0_85 = arith.constant 0 : index
    %c0_86 = arith.constant 0 : index
    %80 = vector.load %arg4[%c4_84, %c0_85, %c0_86] : memref<8x128x128xbf16, #tpu.memory_space<vmem>>, vector<1x128x128xbf16>
    %81 = vector.shape_cast %80 : vector<1x128x128xbf16> to vector<128x128xbf16>
    %cst_87 = arith.constant dense<0.000000e+00> : vector<176x128xf32>
    %82 = tpu.matmul %79, %81, %cst_87 {dimension_numbers = #tpu.dot_dimension_numbers<[1], [0], [0], [1], [0, 0, 1, 1], [], []>} : vector<176x128xbf16>, vector<128x128xbf16>, vector<176x128xf32> -> vector<176x128xf32>
    %83 = arith.addf %77, %82 : vector<176x128xf32>
    %c5_88 = arith.constant 5 : index
    %c0_89 = arith.constant 0 : index
    %c0_90 = arith.constant 0 : index
    %84 = vector.load %arg9[%c5_88, %c0_89, %c0_90] : memref<18x16x128xbf16, #tpu.memory_space<vmem>>, vector<11x16x128xbf16>
    %85 = vector.shape_cast %84 : vector<11x16x128xbf16> to vector<176x128xbf16>
    %c5_91 = arith.constant 5 : index
    %c0_92 = arith.constant 0 : index
    %c0_93 = arith.constant 0 : index
    %86 = vector.load %arg4[%c5_91, %c0_92, %c0_93] : memref<8x128x128xbf16, #tpu.memory_space<vmem>>, vector<1x128x128xbf16>
    %87 = vector.shape_cast %86 : vector<1x128x128xbf16> to vector<128x128xbf16>
    %cst_94 = arith.constant dense<0.000000e+00> : vector<176x128xf32>
    %88 = tpu.matmul %85, %87, %cst_94 {dimension_numbers = #tpu.dot_dimension_numbers<[1], [0], [0], [1], [0, 0, 1, 1], [], []>} : vector<176x128xbf16>, vector<128x128xbf16>, vector<176x128xf32> -> vector<176x128xf32>
    %89 = arith.addf %83, %88 : vector<176x128xf32>
    %c6_95 = arith.constant 6 : index
    %c0_96 = arith.constant 0 : index
    %c0_97 = arith.constant 0 : index
    %90 = vector.load %arg9[%c6_95, %c0_96, %c0_97] : memref<18x16x128xbf16, #tpu.memory_space<vmem>>, vector<11x16x128xbf16>
    %91 = vector.shape_cast %90 : vector<11x16x128xbf16> to vector<176x128xbf16>
    %c6_98 = arith.constant 6 : index
    %c0_99 = arith.constant 0 : index
    %c0_100 = arith.constant 0 : index
    %92 = vector.load %arg4[%c6_98, %c0_99, %c0_100] : memref<8x128x128xbf16, #tpu.memory_space<vmem>>, vector<1x128x128xbf16>
    %93 = vector.shape_cast %92 : vector<1x128x128xbf16> to vector<128x128xbf16>
    %cst_101 = arith.constant dense<0.000000e+00> : vector<176x128xf32>
    %94 = tpu.matmul %91, %93, %cst_101 {dimension_numbers = #tpu.dot_dimension_numbers<[1], [0], [0], [1], [0, 0, 1, 1], [], []>} : vector<176x128xbf16>, vector<128x128xbf16>, vector<176x128xf32> -> vector<176x128xf32>
    %95 = arith.addf %89, %94 : vector<176x128xf32>
    %c7_102 = arith.constant 7 : index
    %c0_103 = arith.constant 0 : index
    %c0_104 = arith.constant 0 : index
    %96 = vector.load %arg9[%c7_102, %c0_103, %c0_104] : memref<18x16x128xbf16, #tpu.memory_space<vmem>>, vector<11x16x128xbf16>
    %97 = vector.shape_cast %96 : vector<11x16x128xbf16> to vector<176x128xbf16>
    %c7_105 = arith.constant 7 : index
    %c0_106 = arith.constant 0 : index
    %c0_107 = arith.constant 0 : index
    %98 = vector.load %arg4[%c7_105, %c0_106, %c0_107] : memref<8x128x128xbf16, #tpu.memory_space<vmem>>, vector<1x128x128xbf16>
    %99 = vector.shape_cast %98 : vector<1x128x128xbf16> to vector<128x128xbf16>
    %cst_108 = arith.constant dense<0.000000e+00> : vector<176x128xf32>
    %100 = tpu.matmul %97, %99, %cst_108 {dimension_numbers = #tpu.dot_dimension_numbers<[1], [0], [0], [1], [0, 0, 1, 1], [], []>} : vector<176x128xbf16>, vector<128x128xbf16>, vector<176x128xf32> -> vector<176x128xf32>
    %101 = arith.addf %95, %100 : vector<176x128xf32>
    %c0_109 = arith.constant 0 : index
    %c0_110 = arith.constant 0 : index
    %102 = vector.load %arg5[%c0_109, %c0_110] : memref<1x128xf32, #tpu.memory_space<vmem>>, vector<1x128xf32>
    %103 = vector.broadcast %102 : vector<1x128xf32> to vector<176x128xf32>
    %104 = arith.addf %101, %103 : vector<176x128xf32>
    %cst_111 = arith.constant 0.000000e+00 : f32
    %105 = vector.broadcast %cst_111 : f32 to vector<176x128xf32>
    %106 = arith.maximumf %104, %105 : vector<176x128xf32>
    %107 = vector.shape_cast %106 : vector<176x128xf32> to vector<11x16x128xf32>
    %108 = arith.truncf %107 : vector<11x16x128xf32> to vector<11x16x128xbf16>
    %c0_112 = arith.constant 0 : index
    %c0_113 = arith.constant 0 : index
    %c0_114 = arith.constant 0 : index
    %109 = vector.load %arg10[%c0_112, %c0_113, %c0_114] : memref<11x16x128xbf16, #tpu.memory_space<vmem>>, vector<11x16x128xbf16>
    tpu.vector_store %arg10[%c0_112, %c0_113, %c0_114], %108 {strides = array<i32>} : memref<11x16x128xbf16, #tpu.memory_space<vmem>>, vector<11x16x128xbf16>,
    %c0_115 = arith.constant 0 : index
    %c0_116 = arith.constant 0 : index
    %c0_117 = arith.constant 0 : index
    %110 = vector.load %arg10[%c0_115, %c0_116, %c0_117] : memref<11x16x128xbf16, #tpu.memory_space<vmem>>, vector<4x16x128xbf16>
    %111 = vector.shape_cast %110 : vector<4x16x128xbf16> to vector<64x128xbf16>
    %c0_118 = arith.constant 0 : index
    %c0_119 = arith.constant 0 : index
    %c0_120 = arith.constant 0 : index
    %112 = vector.load %arg6[%c0_118, %c0_119, %c0_120] : memref<8x128x128xbf16, #tpu.memory_space<vmem>>, vector<1x128x128xbf16>
    %113 = vector.shape_cast %112 : vector<1x128x128xbf16> to vector<128x128xbf16>
    %cst_121 = arith.constant dense<0.000000e+00> : vector<64x128xf32>
    %114 = tpu.matmul %111, %113, %cst_121 {dimension_numbers = #tpu.dot_dimension_numbers<[1], [0], [0], [1], [0, 0, 1, 1], [], []>} : vector<64x128xbf16>, vector<128x128xbf16>, vector<64x128xf32> -> vector<64x128xf32>
    %c1_122 = arith.constant 1 : index
    %c0_123 = arith.constant 0 : index
    %c0_124 = arith.constant 0 : index
    %115 = vector.load %arg10[%c1_122, %c0_123, %c0_124] : memref<11x16x128xbf16, #tpu.memory_space<vmem>>, vector<4x16x128xbf16>
    %116 = vector.shape_cast %115 : vector<4x16x128xbf16> to vector<64x128xbf16>
    %c1_125 = arith.constant 1 : index
    %c0_126 = arith.constant 0 : index
    %c0_127 = arith.constant 0 : index
    %117 = vector.load %arg6[%c1_125, %c0_126, %c0_127] : memref<8x128x128xbf16, #tpu.memory_space<vmem>>, vector<1x128x128xbf16>
    %118 = vector.shape_cast %117 : vector<1x128x128xbf16> to vector<128x128xbf16>
    %cst_128 = arith.constant dense<0.000000e+00> : vector<64x128xf32>
    %119 = tpu.matmul %116, %118, %cst_128 {dimension_numbers = #tpu.dot_dimension_numbers<[1], [0], [0], [1], [0, 0, 1, 1], [], []>} : vector<64x128xbf16>, vector<128x128xbf16>, vector<64x128xf32> -> vector<64x128xf32>
    %120 = arith.addf %114, %119 : vector<64x128xf32>
    %c2_129 = arith.constant 2 : index
    %c0_130 = arith.constant 0 : index
    %c0_131 = arith.constant 0 : index
    %121 = vector.load %arg10[%c2_129, %c0_130, %c0_131] : memref<11x16x128xbf16, #tpu.memory_space<vmem>>, vector<4x16x128xbf16>
    %122 = vector.shape_cast %121 : vector<4x16x128xbf16> to vector<64x128xbf16>
    %c2_132 = arith.constant 2 : index
    %c0_133 = arith.constant 0 : index
    %c0_134 = arith.constant 0 : index
    %123 = vector.load %arg6[%c2_132, %c0_133, %c0_134] : memref<8x128x128xbf16, #tpu.memory_space<vmem>>, vector<1x128x128xbf16>
    %124 = vector.shape_cast %123 : vector<1x128x128xbf16> to vector<128x128xbf16>
    %cst_135 = arith.constant dense<0.000000e+00> : vector<64x128xf32>
    %125 = tpu.matmul %122, %124, %cst_135 {dimension_numbers = #tpu.dot_dimension_numbers<[1], [0], [0], [1], [0, 0, 1, 1], [], []>} : vector<64x128xbf16>, vector<128x128xbf16>, vector<64x128xf32> -> vector<64x128xf32>
    %126 = arith.addf %120, %125 : vector<64x128xf32>
    %c3_136 = arith.constant 3 : index
    %c0_137 = arith.constant 0 : index
    %c0_138 = arith.constant 0 : index
    %127 = vector.load %arg10[%c3_136, %c0_137, %c0_138] : memref<11x16x128xbf16, #tpu.memory_space<vmem>>, vector<4x16x128xbf16>
    %128 = vector.shape_cast %127 : vector<4x16x128xbf16> to vector<64x128xbf16>
    %c3_139 = arith.constant 3 : index
    %c0_140 = arith.constant 0 : index
    %c0_141 = arith.constant 0 : index
    %129 = vector.load %arg6[%c3_139, %c0_140, %c0_141] : memref<8x128x128xbf16, #tpu.memory_space<vmem>>, vector<1x128x128xbf16>
    %130 = vector.shape_cast %129 : vector<1x128x128xbf16> to vector<128x128xbf16>
    %cst_142 = arith.constant dense<0.000000e+00> : vector<64x128xf32>
    %131 = tpu.matmul %128, %130, %cst_142 {dimension_numbers = #tpu.dot_dimension_numbers<[1], [0], [0], [1], [0, 0, 1, 1], [], []>} : vector<64x128xbf16>, vector<128x128xbf16>, vector<64x128xf32> -> vector<64x128xf32>
    %132 = arith.addf %126, %131 : vector<64x128xf32>
    %c4_143 = arith.constant 4 : index
    %c0_144 = arith.constant 0 : index
    %c0_145 = arith.constant 0 : index
    %133 = vector.load %arg10[%c4_143, %c0_144, %c0_145] : memref<11x16x128xbf16, #tpu.memory_space<vmem>>, vector<4x16x128xbf16>
    %134 = vector.shape_cast %133 : vector<4x16x128xbf16> to vector<64x128xbf16>
    %c4_146 = arith.constant 4 : index
    %c0_147 = arith.constant 0 : index
    %c0_148 = arith.constant 0 : index
    %135 = vector.load %arg6[%c4_146, %c0_147, %c0_148] : memref<8x128x128xbf16, #tpu.memory_space<vmem>>, vector<1x128x128xbf16>
    %136 = vector.shape_cast %135 : vector<1x128x128xbf16> to vector<128x128xbf16>
    %cst_149 = arith.constant dense<0.000000e+00> : vector<64x128xf32>
    %137 = tpu.matmul %134, %136, %cst_149 {dimension_numbers = #tpu.dot_dimension_numbers<[1], [0], [0], [1], [0, 0, 1, 1], [], []>} : vector<64x128xbf16>, vector<128x128xbf16>, vector<64x128xf32> -> vector<64x128xf32>
    %138 = arith.addf %132, %137 : vector<64x128xf32>
    %c5_150 = arith.constant 5 : index
    %c0_151 = arith.constant 0 : index
    %c0_152 = arith.constant 0 : index
    %139 = vector.load %arg10[%c5_150, %c0_151, %c0_152] : memref<11x16x128xbf16, #tpu.memory_space<vmem>>, vector<4x16x128xbf16>
    %140 = vector.shape_cast %139 : vector<4x16x128xbf16> to vector<64x128xbf16>
    %c5_153 = arith.constant 5 : index
    %c0_154 = arith.constant 0 : index
    %c0_155 = arith.constant 0 : index
    %141 = vector.load %arg6[%c5_153, %c0_154, %c0_155] : memref<8x128x128xbf16, #tpu.memory_space<vmem>>, vector<1x128x128xbf16>
    %142 = vector.shape_cast %141 : vector<1x128x128xbf16> to vector<128x128xbf16>
    %cst_156 = arith.constant dense<0.000000e+00> : vector<64x128xf32>
    %143 = tpu.matmul %140, %142, %cst_156 {dimension_numbers = #tpu.dot_dimension_numbers<[1], [0], [0], [1], [0, 0, 1, 1], [], []>} : vector<64x128xbf16>, vector<128x128xbf16>, vector<64x128xf32> -> vector<64x128xf32>
    %144 = arith.addf %138, %143 : vector<64x128xf32>
    %c6_157 = arith.constant 6 : index
    %c0_158 = arith.constant 0 : index
    %c0_159 = arith.constant 0 : index
    %145 = vector.load %arg10[%c6_157, %c0_158, %c0_159] : memref<11x16x128xbf16, #tpu.memory_space<vmem>>, vector<4x16x128xbf16>
    %146 = vector.shape_cast %145 : vector<4x16x128xbf16> to vector<64x128xbf16>
    %c6_160 = arith.constant 6 : index
    %c0_161 = arith.constant 0 : index
    %c0_162 = arith.constant 0 : index
    %147 = vector.load %arg6[%c6_160, %c0_161, %c0_162] : memref<8x128x128xbf16, #tpu.memory_space<vmem>>, vector<1x128x128xbf16>
    %148 = vector.shape_cast %147 : vector<1x128x128xbf16> to vector<128x128xbf16>
    %cst_163 = arith.constant dense<0.000000e+00> : vector<64x128xf32>
    %149 = tpu.matmul %146, %148, %cst_163 {dimension_numbers = #tpu.dot_dimension_numbers<[1], [0], [0], [1], [0, 0, 1, 1], [], []>} : vector<64x128xbf16>, vector<128x128xbf16>, vector<64x128xf32> -> vector<64x128xf32>
    %150 = arith.addf %144, %149 : vector<64x128xf32>
    %c7_164 = arith.constant 7 : index
    %c0_165 = arith.constant 0 : index
    %c0_166 = arith.constant 0 : index
    %151 = vector.load %arg10[%c7_164, %c0_165, %c0_166] : memref<11x16x128xbf16, #tpu.memory_space<vmem>>, vector<4x16x128xbf16>
    %152 = vector.shape_cast %151 : vector<4x16x128xbf16> to vector<64x128xbf16>
    %c7_167 = arith.constant 7 : index
    %c0_168 = arith.constant 0 : index
    %c0_169 = arith.constant 0 : index
    %153 = vector.load %arg6[%c7_167, %c0_168, %c0_169] : memref<8x128x128xbf16, #tpu.memory_space<vmem>>, vector<1x128x128xbf16>
    %154 = vector.shape_cast %153 : vector<1x128x128xbf16> to vector<128x128xbf16>
    %cst_170 = arith.constant dense<0.000000e+00> : vector<64x128xf32>
    %155 = tpu.matmul %152, %154, %cst_170 {dimension_numbers = #tpu.dot_dimension_numbers<[1], [0], [0], [1], [0, 0, 1, 1], [], []>} : vector<64x128xbf16>, vector<128x128xbf16>, vector<64x128xf32> -> vector<64x128xf32>
    %156 = arith.addf %150, %155 : vector<64x128xf32>
    %c0_171 = arith.constant 0 : index
    %c0_172 = arith.constant 0 : index
    %157 = vector.load %arg7[%c0_171, %c0_172] : memref<1x128xf32, #tpu.memory_space<vmem>>, vector<1x128xf32>
    %158 = vector.broadcast %157 : vector<1x128xf32> to vector<64x128xf32>
    %159 = arith.addf %156, %158 : vector<64x128xf32>
    %cst_173 = arith.constant 0.000000e+00 : f32
    %160 = vector.broadcast %cst_173 : f32 to vector<64x128xf32>
    %161 = arith.maximumf %159, %160 : vector<64x128xf32>
    %162 = vector.shape_cast %161 : vector<64x128xf32> to vector<4x16x128xf32>
    %163 = vector.extract_strided_slice %162 {offsets = [0, 0, 0], sizes = [1, 16, 128], strides = [1, 1, 1]} : vector<4x16x128xf32> to vector<1x16x128xf32>
    %164 = vector.shape_cast %163 : vector<1x16x128xf32> to vector<16x128xf32>
    %165 = vector.extract_strided_slice %162 {offsets = [1, 0, 0], sizes = [1, 16, 128], strides = [1, 1, 1]} : vector<4x16x128xf32> to vector<1x16x128xf32>
    %166 = vector.shape_cast %165 : vector<1x16x128xf32> to vector<16x128xf32>
    %167 = arith.maximumf %164, %166 : vector<16x128xf32>
    %168 = vector.extract_strided_slice %162 {offsets = [2, 0, 0], sizes = [1, 16, 128], strides = [1, 1, 1]} : vector<4x16x128xf32> to vector<1x16x128xf32>
    %169 = vector.shape_cast %168 : vector<1x16x128xf32> to vector<16x128xf32>
    %170 = vector.extract_strided_slice %162 {offsets = [3, 0, 0], sizes = [1, 16, 128], strides = [1, 1, 1]} : vector<4x16x128xf32> to vector<1x16x128xf32>
    %171 = vector.shape_cast %170 : vector<1x16x128xf32> to vector<16x128xf32>
    %172 = arith.maximumf %169, %171 : vector<16x128xf32>
    %173 = arith.maximumf %167, %172 : vector<16x128xf32>
    %c0_174 = arith.constant 0 : index
    %c0_175 = arith.constant 0 : index
    %c0_176 = arith.constant 0 : index
    %174 = vector.load %arg8[%c0_174, %c0_175, %c0_176] : memref<1x16x128xf32, #tpu.memory_space<vmem>>, vector<1x16x128xf32>
    %175 = vector.shape_cast %174 : vector<1x16x128xf32> to vector<16x128xf32>
    %176 = vector.shape_cast %173 : vector<16x128xf32> to vector<1x16x128xf32>
    tpu.vector_store %arg8[%c0_174, %c0_175, %c0_176], %176 {strides = array<i32>} : memref<1x16x128xf32, #tpu.memory_space<vmem>>, vector<1x16x128xf32>,
    return
  }
  func.func @transform_0(%arg0: i32) -> (i32, i32, i32) {
    %c0_i32 = arith.constant 0 : i32
    %c0_i32_0 = arith.constant 0 : i32
    %c0_i32_1 = arith.constant 0 : i32
    return %c0_i32, %arg0, %c0_i32_0 : i32, i32, i32
  }
  func.func @transform_1(%arg0: i32) -> (i32, i32, i32) {
    %c0_i32 = arith.constant 0 : i32
    %c0_i32_0 = arith.constant 0 : i32
    %c0_i32_1 = arith.constant 0 : i32
    %c0_i32_2 = arith.constant 0 : i32
    return %c0_i32, %c0_i32_0, %c0_i32_1 : i32, i32, i32
  }
  func.func @transform_2(%arg0: i32) -> (i32, i32) {
    %c0_i32 = arith.constant 0 : i32
    %c0_i32_0 = arith.constant 0 : i32
    %c0_i32_1 = arith.constant 0 : i32
    return %c0_i32, %c0_i32_0 : i32, i32
  }
  func.func @transform_3(%arg0: i32) -> (i32, i32, i32) {
    %c0_i32 = arith.constant 0 : i32
    %c0_i32_0 = arith.constant 0 : i32
    %c0_i32_1 = arith.constant 0 : i32
    %c0_i32_2 = arith.constant 0 : i32
    return %c0_i32, %c0_i32_0, %c0_i32_1 : i32, i32, i32
  }
  func.func @transform_4(%arg0: i32) -> (i32, i32) {
    %c0_i32 = arith.constant 0 : i32
    %c0_i32_0 = arith.constant 0 : i32
    %c0_i32_1 = arith.constant 0 : i32
    return %c0_i32, %c0_i32_0 : i32, i32
  }
  func.func @transform_5(%arg0: i32) -> (i32, i32, i32) {
    %c0_i32 = arith.constant 0 : i32
    %c0_i32_0 = arith.constant 0 : i32
    %c0_i32_1 = arith.constant 0 : i32
    %c0_i32_2 = arith.constant 0 : i32
    return %c0_i32, %c0_i32_0, %c0_i32_1 : i32, i32, i32
  }
  func.func @transform_6(%arg0: i32) -> (i32, i32) {
    %c0_i32 = arith.constant 0 : i32
    %c0_i32_0 = arith.constant 0 : i32
    %c0_i32_1 = arith.constant 0 : i32
    return %c0_i32, %c0_i32_0 : i32, i32
  }
  func.func @transform_7(%arg0: i32) -> (i32, i32, i32) {
    %c0_i32 = arith.constant 0 : i32
    %c0_i32_0 = arith.constant 0 : i32
    %c0_i32_1 = arith.constant 0 : i32
    return %c0_i32, %arg0, %c0_i32_0 : i32, i32, i32
  }
}

</mosaic_0001>

<bundles_post_ra>
// kernel: _lambda_.2
= control target key start
LH: loop header
LB: loop body
LE: loop exit
PB: predicated region body
PF: predicated region fallthrough
CT: control target
= control target key end

     0   :  { %s1576_s12 = smov 0   ;;  %s1578_s13 = smov 0   ;;  %s1880_s0 = inlined_call_operand.vmem [shape: bf16[2,256,192], index: 0, kind: input, shape index: {}]   ;;  %s1881_s1 = inlined_call_operand.vmem [shape: bf16[192,128], index: 1, kind: input, shape index: {}]   ;;  %s1882_s2 = inlined_call_operand.vmem [shape: f32[1,128], index: 2, kind: input, shape index: {}]   ;;  %s1883_s3 = inlined_call_operand.vmem [shape: bf16[2,32,128], index: 3, kind: output, shape index: {}]  }
   0x1   :  { %s1580_s14 = smov 0  }
   0x2 LB: > { %s25_s15 = sadd.s32 1, %s1549_s13  ;;  %p1288_p0 = scmp.ge.s32.totalorder %s1553_s14, 1  ;;  %s1553_s14 = sphi %s1580_s14, %s13_s14   ;;  %s1549_s13 = sphi %s1578_s13, %s1885_s13   ;;  %s1545_s12 = sphi %s1576_s12, %s1884_s12  }
   0x3   : > { %p27_p1 = scmp.ge.s32.totalorder %s25_s15, 2  ;;  %p159_p2 = scmp.lt.s32.totalorder %s1553_s14, 3 }
   0x5   : > { %s1887_s15 = smov (%p27_p1, %s25_s15), 0  ;;  %p160_p3 = pnand %p1288_p0, %p159_p2 }
   0x6   : > { %p193_p4 = scmp.lt.s32.totalorder (!%p160_p3), %s1545_s12, 1 }
   0x7   : > { %163 = sbr.rel (%p160_p3) target bundleno = 359 (0x167), region = 32 }
   0xc   : > { %v1471_v0 = vld [vmem:[%s1881_s1 + $0x38] sm:$0xff]   ;;  %v1555_v1 = vmov 0   ;;  %v1472_v2 = vld [vmem:[%s1881_s1 + $0x30] sm:$0xff]   ;;  %s1889_s12 = smov (!%p193_p4, %s1545_s12), 1  ;;  %v1473_v3 = vld [vmem:[%s1881_s1 + $0x28] sm:$0xff]   ;;  %vm486_vm0 = vcmask 523264  }
   0xd   : > { %535 = vmatprep.subr.bf16.mxu0 %v1555_v1  ;;  %1422 = vmatprep.subr.bf16.mxu1 %v1555_v1  ;;  %s1388_s22 = sshll.u32 %s1889_s12, 8  ;;  %v1474_v4 = vld [vmem:[%s1881_s1 + $0x20] sm:$0xff]   ;;  %v1475_v6 = vld [vmem:[%s1881_s1 + $0x18] sm:$0xff]   ;;  %v1476_v8 = vld [vmem:[%s1881_s1 + $0x10] sm:$0xff]   ;;  %vm1120_vm1 = vcmask 1041409   ;;  %vm1123_vm2 = vcmask 1042434  }
   0xe   : > { %536 = vmatpush1.bf16.msra.mxu0 %v1471_v0  ;;  %1434 = vmatpush1.bf16.msra.mxu1 %v1471_v0  ;;  %s1618_s27 = scalar_lea.vmem %s1880_s0, %s1388_s22  ;;  %v1477_v9 = vld [vmem:[%s1881_s1 + $0x8] sm:$0xff]   ;;  %v1478_v10 = vld [vmem:[%s1881_s1] sm:$0xff]   ;;  %v1479_v11 = vld [vmem:[%s1881_s1 + $0x58] sm:$0xff]   ;;  %vm1126_vm3 = vcmask 1043459   ;;  %vm1129_vm4 = vcmask 1044484   ;;  %vm1132_vm5 = vcmask 1045509  }
   0xf   : > { %537 = vmatprep.subr.bf16.mxu0 %v1555_v1  ;;  %1423 = vmatprep.subr.bf16.mxu1 %v1555_v1  ;;  %v1485_v5 = vld [vmem:[%s1618_s27 + $0x4] ss:$8 sps:$4 sm:$0xff]   ;;  %v1480_v12 = vld [vmem:[%s1881_s1 + $0x50] sm:$0xff]   ;;  %v1483_v15 = vld [vmem:[%s1618_s27] ss:$8 sps:$4 sm:$0xff]   ;;  %vm1135_vm6 = vcmask 1046534  }
  0x10   : > { %v1488_v7 = vld [vmem:[%s1618_s27 + $0x84] ss:$8 sps:$4 sm:$0xff]   ;;  %1337 = vmatprep.mubr.msk.bf16.mxu0 %vm486_vm0, %v1485_v5  ;;  %v1486_v16 = vld [vmem:[%s1618_s27 + $0x80] ss:$8 sps:$4 sm:$0xff]   ;;  %v1489_v17 = vld [vmem:[%s1618_s27 + $0x14] ss:$8 sps:$4 sm:$0xff]  }
  0x11   : > { %1345 = vmatprep.mubr.msk.bf16.mxu1 %vm486_vm0, %v1488_v7  ;;  %v1481_v13 = vld [vmem:[%s1881_s1 + $0x48] sm:$0xff]   ;;  %v1482_v14 = vld [vmem:[%s1881_s1 + $0x40] sm:$0xff]   ;;  %v1491_v18 = vld [vmem:[%s1618_s27 + $0x94] ss:$8 sps:$4 sm:$0xff]   ;;  %vm1138_vm7 = vcmask 1047559   ;;  %s1389_s23 = sshll.u32 %s1889_s12, 4 }
  0x12   : > { %538 = vmatpush1.bf16.msra.mxu0 %v1472_v2  ;;  %1435 = vmatpush1.bf16.msra.mxu1 %v1472_v2  ;;  %v1493_v19 = vld [vmem:[%s1618_s27 + $0x10] ss:$8 sps:$4 sm:$0xff]   ;;  %v1495_v21 = vld [vmem:[%s1618_s27 + $0x24] ss:$8 sps:$4 sm:$0xff]   ;;  %v1499_v23 = vld [vmem:[%s1618_s27 + $0x20] ss:$8 sps:$4 sm:$0xff]   ;;  %s1791_s25 = scalar_lea.vmem %s1883_s3, %s1389_s23 }
  0x13   : > { %539 = vmatprep.subr.bf16.mxu0 %v1555_v1  ;;  %1424 = vmatprep.subr.bf16.mxu1 %v1555_v1  ;;  %v1494_v20 = vld [vmem:[%s1618_s27 + $0x90] ss:$8 sps:$4 sm:$0xff]   ;;  %v1497_v22 = vld [vmem:[%s1618_s27 + $0xa4] ss:$8 sps:$4 sm:$0xff]   ;;  %v1500_v24 = vld [vmem:[%s1618_s27 + $0xa0] ss:$8 sps:$4 sm:$0xff]  }
  0x14   : > { %v1501_v25 = vld [vmem:[%s1618_s27 + $0x34] ss:$8 sps:$4 sm:$0xff]   ;;  %v1505_v27 = vld [vmem:[%s1618_s27 + $0x30] ss:$8 sps:$4 sm:$0xff]   ;;  %v1507_v29 = vld [vmem:[%s1618_s27 + $0x44] ss:$8 sps:$4 sm:$0xff]  }
  0x15   : > { %v1503_v26 = vld [vmem:[%s1618_s27 + $0xb4] ss:$8 sps:$4 sm:$0xff]   ;;  %v1506_v28 = vld [vmem:[%s1618_s27 + $0xb0] ss:$8 sps:$4 sm:$0xff]   ;;  %v1509_v30 = vld [vmem:[%s1618_s27 + $0xc4] ss:$8 sps:$4 sm:$0xff]  }
  0x16   : > { %540 = vmatpush1.bf16.msra.mxu0 %v1473_v3  ;;  %1436 = vmatpush1.bf16.msra.mxu1 %v1473_v3  ;;  %v1511_v31 = vld [vmem:[%s1618_s27 + $0x40] ss:$8 sps:$4 sm:$0xff]   ;;  %v1513_v33 = vld [vmem:[%s1618_s27 + $0x54] ss:$8 sps:$4 sm:$0xff]   ;;  %v1517_v35 = vld [vmem:[%s1618_s27 + $0x50] ss:$8 sps:$4 sm:$0xff]  }
  0x17   : > { %541 = vmatprep.subr.bf16.mxu0 %v1555_v1  ;;  %1425 = vmatprep.subr.bf16.mxu1 %v1555_v1  ;;  %v1512_v32 = vld [vmem:[%s1618_s27 + $0xc0] ss:$8 sps:$4 sm:$0xff]   ;;  %v1515_v34 = vld [vmem:[%s1618_s27 + $0xd4] ss:$8 sps:$4 sm:$0xff]   ;;  %v1518_v36 = vld [vmem:[%s1618_s27 + $0xd0] ss:$8 sps:$4 sm:$0xff]  }
  0x18   : > { %v1519_v37 = vld [vmem:[%s1618_s27 + $0x64] ss:$8 sps:$4 sm:$0xff]   ;;  %v1523_v39 = vld [vmem:[%s1618_s27 + $0x60] ss:$8 sps:$4 sm:$0xff]   ;;  %v1525_v41 = vld [vmem:[%s1618_s27 + $0x74] ss:$8 sps:$4 sm:$0xff]  }
  0x19   : > { %v1521_v38 = vld [vmem:[%s1618_s27 + $0xe4] ss:$8 sps:$4 sm:$0xff]   ;;  %v1524_v40 = vld [vmem:[%s1618_s27 + $0xe0] ss:$8 sps:$4 sm:$0xff]   ;;  %v1527_v42 = vld [vmem:[%s1618_s27 + $0xf4] ss:$8 sps:$4 sm:$0xff]  }
  0x1a   : > { %542 = vmatpush1.bf16.msra.mxu0 %v1474_v4  ;;  %1437 = vmatpush1.bf16.msra.mxu1 %v1474_v4  ;;  %v1529_v43 = vld [vmem:[%s1618_s27 + $0x70] ss:$8 sps:$4 sm:$0xff]  }
  0x1b   : > { %543 = vmatprep.subr.bf16.mxu0 %v1555_v1  ;;  %1426 = vmatprep.subr.bf16.mxu1 %v1555_v1  ;;  %v1530_v44 = vld [vmem:[%s1618_s27 + $0xf0] ss:$8 sps:$4 sm:$0xff]  }
  0x1e   : > { %544 = vmatpush1.bf16.msra.mxu0 %v1475_v6  ;;  %1438 = vmatpush1.bf16.msra.mxu1 %v1475_v6 }
  0x1f   : > { %545 = vmatprep.subr.bf16.mxu0 %v1555_v1  ;;  %1427 = vmatprep.subr.bf16.mxu1 %v1555_v1 }
  0x22   : > { %546 = vmatpush1.bf16.msra.mxu0 %v1476_v8  ;;  %1439 = vmatpush1.bf16.msra.mxu1 %v1476_v8 }
  0x23   : > { %547 = vmatprep.subr.bf16.mxu0 %v1555_v1  ;;  %1428 = vmatprep.subr.bf16.mxu1 %v1555_v1 }
  0x26   : > { %548 = vmatpush1.bf16.msra.mxu0 %v1477_v9  ;;  %1440 = vmatpush1.bf16.msra.mxu1 %v1477_v9 }
  0x27   : > { %549 = vmatprep.subr.bf16.mxu0 %v1555_v1  ;;  %1429 = vmatprep.subr.bf16.mxu1 %v1555_v1 }
  0x2a   : > { %550 = vmatpush1.bf16.msra.mxu0 %v1478_v10  ;;  %1441 = vmatpush1.bf16.msra.mxu1 %v1478_v10 }
  0x2b   : > { %559 = vmatprep.subr.bf16.mxu0 %v1555_v1  ;;  %1430 = vmatprep.subr.bf16.mxu1 %v1555_v1 }
  0x2e   : > { %560 = vmatpush2.bf16.msra.mxu0 %v1479_v11  ;;  %1442 = vmatpush2.bf16.msra.mxu1 %v1479_v11 }
  0x2f   : > { %561 = vmatprep.subr.bf16.mxu0 %v1555_v1  ;;  %1431 = vmatprep.subr.bf16.mxu1 %v1555_v1 }
  0x32   : > { %562 = vmatpush2.bf16.msra.mxu0 %v1480_v12  ;;  %1443 = vmatpush2.bf16.msra.mxu1 %v1480_v12 }
  0x33   : > { %563 = vmatprep.subr.bf16.mxu0 %v1555_v1  ;;  %1432 = vmatprep.subr.bf16.mxu1 %v1555_v1 }
  0x36   : > { %564 = vmatpush2.bf16.msra.mxu0 %v1481_v13  ;;  %1444 = vmatpush2.bf16.msra.mxu1 %v1481_v13 }
  0x37   : > { %565 = vmatprep.subr.bf16.mxu0 %v1555_v1  ;;  %1433 = vmatprep.subr.bf16.mxu1 %v1555_v1 }
  0x3a   : > { %566 = vmatpush2.bf16.msra.mxu0 %v1482_v14  ;;  %1445 = vmatpush2.bf16.msra.mxu1 %v1482_v14 }
  0x3d   : > { %568 = vmatmul.mubr.bf16.vlgmr.msra.gmra.mxu0 %v1483_v15  ;;  %632 = vmatmul.mubr.bf16.vlgmr.msra.gmra.mxu1 %v1486_v16  ;;  %v1713_v15 = vld [vmem:[%s1882_s2] ss:$0 sm:$0xff] }
  0x3e   : > { %1338 = vmatprep.mubr.msk.bf16.mxu0 %vm486_vm0, %v1489_v17  ;;  %1346 = vmatprep.mubr.msk.bf16.mxu1 %vm486_vm0, %v1491_v18 }
  0x45   : > { %576 = vmatmul.mubr.bf16.gmra.mxu0 %v1493_v19  ;;  %640 = vmatmul.mubr.bf16.gmra.mxu1 %v1494_v20 }
  0x46   : > { %1339 = vmatprep.mubr.msk.bf16.mxu0 %vm486_vm0, %v1495_v21  ;;  %1347 = vmatprep.mubr.msk.bf16.mxu1 %vm486_vm0, %v1497_v22 }
  0x4d   : > { %584 = vmatmul.mubr.bf16.gmra.mxu0 %v1499_v23  ;;  %648 = vmatmul.mubr.bf16.gmra.mxu1 %v1500_v24 }
  0x4e   : > { %1340 = vmatprep.mubr.msk.bf16.mxu0 %vm486_vm0, %v1501_v25  ;;  %1348 = vmatprep.mubr.msk.bf16.mxu1 %vm486_vm0, %v1503_v26 }
  0x55   : > { %592 = vmatmul.mubr.bf16.gmra.mxu0 %v1505_v27  ;;  %656 = vmatmul.mubr.bf16.gmra.mxu1 %v1506_v28 }
  0x56   : > { %1341 = vmatprep.mubr.msk.bf16.mxu0 %vm486_vm0, %v1507_v29  ;;  %1349 = vmatprep.mubr.msk.bf16.mxu1 %vm486_vm0, %v1509_v30 }
  0x5d   : > { %600 = vmatmul.mubr.bf16.gmra.mxu0 %v1511_v31  ;;  %664 = vmatmul.mubr.bf16.gmra.mxu1 %v1512_v32 }
  0x5e   : > { %1342 = vmatprep.mubr.msk.bf16.mxu0 %vm486_vm0, %v1513_v33  ;;  %1350 = vmatprep.mubr.msk.bf16.mxu1 %vm486_vm0, %v1515_v34 }
  0x65   : > { %608 = vmatmul.mubr.bf16.gmra.mxu0 %v1517_v35  ;;  %672 = vmatmul.mubr.bf16.gmra.mxu1 %v1518_v36 }
  0x66   : > { %1343 = vmatprep.mubr.msk.bf16.mxu0 %vm486_vm0, %v1519_v37  ;;  %1351 = vmatprep.mubr.msk.bf16.mxu1 %vm486_vm0, %v1521_v38 }
  0x6d   : > { %616 = vmatmul.mubr.bf16.gmra.mxu0 %v1523_v39  ;;  %680 = vmatmul.mubr.bf16.gmra.mxu1 %v1524_v40 }
  0x6e   : > { %1344 = vmatprep.mubr.msk.bf16.mxu0 %vm486_vm0, %v1525_v41  ;;  %1352 = vmatprep.mubr.msk.bf16.mxu1 %vm486_vm0, %v1527_v42 }
  0x75   : > { %624 = vmatmul.mubr.bf16.gmra.mxu0 %v1529_v43  ;;  %688 = vmatmul.mubr.bf16.gmra.mxu1 %v1530_v44 }
  0xfd   : > { %v569_v45 = vpop.f32.mrf.mxu0  ;;  %v633_v46 = vpop.f32.mrf.mxu1 }
  0xfe   : > { %v696_v47 = vrot.slane %v569_v45, 4  ;;  %v792_v48 = vrot.slane %v633_v46, 4 }
  0xff   : > { %v571_v49 = vpop.f32.mrf.mxu0  ;;  %v635_v50 = vpop.f32.mrf.mxu1 }
 0x100   : > { %v697_v51 = vmax.f32 %v569_v45, %v696_v47  ;;  %v793_v52 = vmax.f32 %v633_v46, %v792_v48 }
 0x101   : > { %v572_v53 = vpop.f32.mrf.mxu0  ;;  %v636_v54 = vpop.f32.mrf.mxu1 }
 0x102   : > { %v698_v55 = vrot.slane %v697_v51, 2  ;;  %v794_v56 = vrot.slane %v793_v52, 2  ;;  %v702_v57 = vrot.slane %v572_v53, 4  ;;  %v798_v58 = vrot.slane %v636_v54, 4 }
 0x103   : > { %v574_v59 = vpop.f32.mrf.mxu0  ;;  %v638_v60 = vpop.f32.mrf.mxu1 }
 0x104   : > { %v699_v61 = vmax.f32 %v697_v51, %v698_v55  ;;  %v795_v62 = vmax.f32 %v793_v52, %v794_v56  ;;  %v703_v63 = vmax.f32 %v572_v53, %v702_v57  ;;  %v799_v0 = vmax.f32 %v636_v54, %v798_v58 }
 0x105   : > { %v577_v1 = vpop.f32.mrf.mxu0  ;;  %v641_v2 = vpop.f32.mrf.mxu1 }
 0x106   : > { %v700_v3 = vrot.slane %v699_v61, 1  ;;  %v796_v4 = vrot.slane %v795_v62, 1  ;;  %v704_v5 = vrot.slane %v703_v63, 2  ;;  %v800_v6 = vrot.slane %v799_v0, 2 }
 0x107   : > { %v708_v7 = vrot.slane %v577_v1, 4  ;;  %v804_v8 = vrot.slane %v641_v2, 4  ;;  %v579_v9 = vpop.f32.mrf.mxu0  ;;  %v643_v10 = vpop.f32.mrf.mxu1 }
 0x108   : > { %v701_v11 = vmax.f32 %v699_v61, %v700_v3  ;;  %v797_v12 = vmax.f32 %v795_v62, %v796_v4  ;;  %v705_v13 = vmax.f32 %v703_v63, %v704_v5  ;;  %v801_v14 = vmax.f32 %v799_v0, %v800_v6 }
 0x109   : > { %v709_v16 = vmax.f32 %v577_v1, %v708_v7  ;;  %v805_v17 = vmax.f32 %v641_v2, %v804_v8  ;;  %v580_v18 = vpop.f32.mrf.mxu0  ;;  %v644_v19 = vpop.f32.mrf.mxu1 }
 0x10a   : > { %v706_v20 = vrot.slane %v705_v13, 1  ;;  %v802_v21 = vrot.slane %v801_v14, 1  ;;  %v714_v24 = vrot.slane %v580_v18, 4  ;;  %v810_v25 = vrot.slane %v644_v19, 4 }
 0x10b   : > { %v710_v22 = vrot.slane %v709_v16, 2  ;;  %v806_v23 = vrot.slane %v805_v17, 2  ;;  %v582_v26 = vpop.f32.mrf.mxu0  ;;  %v646_v27 = vpop.f32.mrf.mxu1  ;;  %v895_v28 = vadd.f32 %v1713_v15, %v701_v11  ;;  %v911_v29 = vadd.f32 %v1713_v15, %v797_v12 }
 0x10c   : > { %v707_v30 = vmax.f32 %v705_v13, %v706_v20  ;;  %v803_v31 = vmax.f32 %v801_v14, %v802_v21  ;;  %v715_v34 = vmax.f32 %v580_v18, %v714_v24  ;;  %v811_v35 = vmax.f32 %v644_v19, %v810_v25 }
 0x10d   : > { %v711_v32 = vmax.f32 %v709_v16, %v710_v22  ;;  %v807_v33 = vmax.f32 %v805_v17, %v806_v23  ;;  %v585_v36 = vpop.f32.mrf.mxu0  ;;  %v649_v37 = vpop.f32.mrf.mxu1  ;;  %v927_v46 = vmax.f32 %v895_v28, 0.0  ;;  %v943_v47 = vmax.f32 %v911_v29, 0.0 }
 0x10e   : > { %v896_v38 = vadd.f32 %v1713_v15, %v707_v30  ;;  %v912_v39 = vadd.f32 %v1713_v15, %v803_v31  ;;  %v716_v42 = vrot.slane %v715_v34, 2  ;;  %v812_v43 = vrot.slane %v811_v35, 2 }
 0x10f   : > { %v712_v40 = vrot.slane %v711_v32, 1  ;;  %v808_v41 = vrot.slane %v807_v33, 1  ;;  %v587_v44 = vpop.f32.mrf.mxu0  ;;  %v651_v45 = vpop.f32.mrf.mxu1  ;;  %v720_v58 = vrot.slane %v585_v36, 4  ;;  %v816_v59 = vrot.slane %v649_v37, 4 }
 0x110   : > { %v928_v48 = vmax.f32 %v896_v38, 0.0  ;;  %v944_v49 = vmax.f32 %v912_v39, 0.0  ;;  %v717_v52 = vmax.f32 %v715_v34, %v716_v42  ;;  %v813_v53 = vmax.f32 %v811_v35, %v812_v43 }
 0x111   : > { %v713_v50 = vmax.f32 %v711_v32, %v712_v40  ;;  %v809_v51 = vmax.f32 %v807_v33, %v808_v41  ;;  %v588_v54 = vpop.f32.mrf.mxu0  ;;  %v652_v55 = vpop.f32.mrf.mxu1  ;;  %v1390_v2 = vpack.c.bf16 %v927_v46, %v927_v46  ;;  %v1406_v3 = vpack.c.bf16 %v943_v47, %v943_v47 }
 0x112   : > { %v1391_v56 = vpack.c.bf16 %v928_v48, %v928_v48  ;;  %v1407_v57 = vpack.c.bf16 %v944_v49, %v944_v49  ;;  %v718_v62 = vrot.slane %v717_v52, 1  ;;  %v814_v63 = vrot.slane %v813_v53, 1 }
 0x113   : > { %v897_v60 = vadd.f32 %v1713_v15, %v713_v50  ;;  %v913_v61 = vadd.f32 %v1713_v15, %v809_v51  ;;  %v590_v0 = vpop.f32.mrf.mxu0  ;;  %v654_v1 = vpop.f32.mrf.mxu1  ;;  %v721_v4 = vmax.f32 %v585_v36, %v720_v58  ;;  %v817_v5 = vmax.f32 %v649_v37, %v816_v59 }
 0x114   : > { %v719_v8 = vmax.f32 %v717_v52, %v718_v62  ;;  %v815_v9 = vmax.f32 %v813_v53, %v814_v63  ;;  %v1088_v12 = vunpack.c.l.b16 %v1391_v56  ;;  %v1104_v13 = vunpack.c.l.b16 %v1407_v57 }
 0x115   : > { %v929_v6 = vmax.f32 %v897_v60, 0.0  ;;  %v945_v7 = vmax.f32 %v913_v61, 0.0  ;;  %v593_v10 = vpop.f32.mrf.mxu0  ;;  %v657_v11 = vpop.f32.mrf.mxu1  ;;  %v722_v14 = vrot.slane %v721_v4, 2  ;;  %v818_v16 = vrot.slane %v817_v5, 2 }
 0x116   : > { %v898_v19 = vadd.f32 %v1713_v15, %v719_v8  ;;  %v914_v20 = vadd.f32 %v1713_v15, %v815_v9  ;;  %v726_v33 = vrot.slane %v588_v54, 4  ;;  %v822_v34 = vrot.slane %v652_v55, 4 }
 0x117   : > { %v1392_v17 = vpack.c.bf16 %v929_v6, %v929_v6  ;;  %v1408_v18 = vpack.c.bf16 %v945_v7, %v945_v7  ;;  %v595_v21 = vpop.f32.mrf.mxu0  ;;  %v659_v22 = vpop.f32.mrf.mxu1  ;;  %v723_v23 = vmax.f32 %v721_v4, %v722_v14  ;;  %v819_v24 = vmax.f32 %v817_v5, %v818_v16 }
 0x118   : > { %v930_v27 = vmax.f32 %v898_v19, 0.0  ;;  %v946_v28 = vmax.f32 %v914_v20, 0.0  ;;  %v1087_v35 = vunpack.c.l.b16 %v1390_v2  ;;  %v1103_v36 = vunpack.c.l.b16 %v1406_v3 }
 0x119   : > { %v1089_v25 = vunpack.c.l.b16 %v1392_v17  ;;  %v1105_v26 = vunpack.c.l.b16 %v1408_v18  ;;  %v596_v29 = vpop.f32.mrf.mxu0  ;;  %v660_v30 = vpop.f32.mrf.mxu1  ;;  %v724_v31 = vrot.slane %v723_v23, 1  ;;  %v820_v32 = vrot.slane %v819_v24, 1 }
 0x11a   : > { %v1119_v37 = vrot.slane %v1088_v12, 7  ;;  %v1154_v38 = vrot.slane %v1104_v13, 7  ;;  %v727_v43 = vmax.f32 %v588_v54, %v726_v33  ;;  %v823_v44 = vmax.f32 %v652_v55, %v822_v34 }
 0x11b   : > { %v598_v39 = vpop.f32.mrf.mxu0  ;;  %v662_v40 = vpop.f32.mrf.mxu1  ;;  %v725_v41 = vmax.f32 %v723_v23, %v724_v31  ;;  %v821_v42 = vmax.f32 %v819_v24, %v820_v32  ;;  %v1122_v45 = vrot.slane %v1089_v25, 6  ;;  %v1156_v46 = vrot.slane %v1105_v26, 6 }
 0x11c   : > { %v1393_v47 = vpack.c.bf16 %v930_v27, %v930_v27  ;;  %v1409_v48 = vpack.c.bf16 %v946_v28, %v946_v28  ;;  %v728_v53 = vrot.slane %v727_v43, 2  ;;  %v824_v56 = vrot.slane %v823_v44, 2 }
 0x11d   : > { %v1723_v49 = vpop.f32.mrf.mxu0  ;;  %v1725_v50 = vpop.f32.mrf.mxu1  ;;  %v899_v51 = vadd.f32 %v1713_v15, %v725_v41  ;;  %v915_v52 = vadd.f32 %v1713_v15, %v821_v42  ;;  %v1121_v57 = vsel %vm1120_vm1, %v1119_v37, %v1087_v35  ;;  %v1155_v58 = vsel %vm1120_vm1, %v1154_v38, %v1103_v36 }
 0x11e   : > { %v732_v54 = vrot.slane %v593_v10, 4  ;;  %v828_v55 = vrot.slane %v657_v11, 4  ;;  %v729_v63 = vmax.f32 %v727_v43, %v728_v53  ;;  %v825_v0 = vmax.f32 %v823_v44, %v824_v56 }
 0x11f   : > { %v603_v59 = vpop.f32.mrf.mxu0  ;;  %v667_v60 = vpop.f32.mrf.mxu1  ;;  %v931_v61 = vmax.f32 %v899_v51, 0.0  ;;  %v947_v62 = vmax.f32 %v915_v52, 0.0  ;;  %v1732_v1 = vsel %vm1123_vm2, %v1122_v45, %v1121_v57  ;;  %v1735_v2 = vsel %vm1123_vm2, %v1156_v46, %v1155_v58 }
 0x120   : > { %v733_v3 = vmax.f32 %v593_v10, %v732_v54  ;;  %v829_v4 = vmax.f32 %v657_v11, %v828_v55  ;;  %v1090_v7 = vunpack.c.l.b16 %v1393_v47  ;;  %v1106_v8 = vunpack.c.l.b16 %v1409_v48 }
 0x121   : > { %v1737_v5 = vpop.f32.mrf.mxu0  ;;  %v1739_v6 = vpop.f32.mrf.mxu1  ;;  %v730_v9 = vrot.slane %v729_v63, 1  ;;  %v826_v12 = vrot.slane %v825_v0, 1  ;;  %v738_v16 = vrot.slane %v596_v29, 4  ;;  %v834_v17 = vrot.slane %v660_v30, 4 }
 0x122   : > { %v734_v13 = vrot.slane %v733_v3, 2  ;;  %v830_v14 = vrot.slane %v829_v4, 2  ;;  %v1394_v20 = vpack.c.bf16 %v931_v61, %v931_v61  ;;  %v1410_v21 = vpack.c.bf16 %v947_v62, %v947_v62 }
 0x123   : > { %v606_v18 = vpop.f32.mrf.mxu0  ;;  %v670_v19 = vpop.f32.mrf.mxu1  ;;  %v731_v22 = vmax.f32 %v729_v63, %v730_v9  ;;  %v827_v23 = vmax.f32 %v825_v0, %v826_v12  ;;  %v739_v24 = vmax.f32 %v596_v29, %v738_v16  ;;  %v835_v25 = vmax.f32 %v660_v30, %v834_v17 }
 0x124   : > { %v735_v10 = vmax.f32 %v733_v3, %v734_v13  ;;  %v831_v11 = vmax.f32 %v829_v4, %v830_v14  ;;  %v1125_v28 = vrot.slane %v1090_v7, 5  ;;  %v1158_v31 = vrot.slane %v1106_v8, 5 }
 0x125   : > { %v1741_v26 = vpop.f32.mrf.mxu0  ;;  %v1743_v27 = vpop.f32.mrf.mxu1  ;;  %v900_v32 = vadd.f32 %v1713_v15, %v731_v22  ;;  %v916_v33 = vadd.f32 %v1713_v15, %v827_v23  ;;  %v740_v36 = vrot.slane %v739_v24, 2  ;;  %v836_v37 = vrot.slane %v835_v25, 2 }
 0x126   : > { %v736_v34 = vrot.slane %v735_v10, 1  ;;  %v832_v35 = vrot.slane %v831_v11, 1  ;;  %v1091_v40 = vunpack.c.l.b16 %v1394_v20  ;;  %v1107_v29 = vunpack.c.l.b16 %v1410_v21 }
 0x127   : > { %v611_v38 = vpop.f32.mrf.mxu0  ;;  %v675_v39 = vpop.f32.mrf.mxu1  ;;  %v932_v30 = vmax.f32 %v900_v32, 0.0  ;;  %v948_v41 = vmax.f32 %v916_v33, 0.0  ;;  %v741_v44 = vmax.f32 %v739_v24, %v740_v36  ;;  %v837_v45 = vmax.f32 %v835_v25, %v836_v37 }
 0x128   : > { %v737_v42 = vmax.f32 %v735_v10, %v736_v34  ;;  %v833_v43 = vmax.f32 %v831_v11, %v832_v35  ;;  %v744_v52 = vrot.slane %v1723_v49, 4  ;;  %v840_v53 = vrot.slane %v1725_v50, 4 }
 0x129   : > { %v1747_v46 = vpop.f32.mrf.mxu0  ;;  %v1749_v47 = vpop.f32.mrf.mxu1  ;;  %v1395_v48 = vpack.c.bf16 %v932_v30, %v932_v30  ;;  %v1411_v51 = vpack.c.bf16 %v948_v41, %v948_v41  ;;  %v742_v58 = vrot.slane %v741_v44, 1  ;;  %v838_v54 = vrot.slane %v837_v45, 1 }
 0x12a   : > { %v901_v56 = vadd.f32 %v1713_v15, %v737_v42  ;;  %v917_v57 = vadd.f32 %v1713_v15, %v833_v43  ;;  %v745_v62 = vmax.f32 %v1723_v49, %v744_v52  ;;  %v841_v63 = vmax.f32 %v1725_v50, %v840_v53 }
 0x12b   : > { %v614_v55 = vpop.f32.mrf.mxu0  ;;  %v678_v59 = vpop.f32.mrf.mxu1  ;;  %v1092_v60 = vunpack.c.l.b16 %v1395_v48  ;;  %v1108_v61 = vunpack.c.l.b16 %v1411_v51  ;;  %v743_v4 = vmax.f32 %v741_v44, %v742_v58  ;;  %v839_v7 = vmax.f32 %v837_v45, %v838_v54 }
 0x12c   : > { %v933_v0 = vmax.f32 %v901_v56, 0.0  ;;  %v949_v3 = vmax.f32 %v917_v57, 0.0  ;;  %v1128_v12 = vrot.slane %v1091_v40, 4  ;;  %v1160_v13 = vrot.slane %v1107_v29, 4 }
 0x12d   : > { %v1757_v8 = vpop.f32.mrf.mxu0  ;;  %v1759_v9 = vpop.f32.mrf.mxu1  ;;  %v746_v14 = vrot.slane %v745_v62, 2  ;;  %v842_v16 = vrot.slane %v841_v63, 2  ;;  %v902_v49 = vadd.f32 %v1713_v15, %v743_v4  ;;  %v918_v50 = vadd.f32 %v1713_v15, %v839_v7 }
 0x12e   : > { %v1396_v17 = vpack.c.bf16 %v933_v0, %v933_v0  ;;  %v1412_v18 = vpack.c.bf16 %v949_v3, %v949_v3  ;;  %v1127_v21 = vsel %vm1126_vm3, %v1125_v28, %v1732_v1  ;;  %v1159_v22 = vsel %vm1126_vm3, %v1158_v31, %v1735_v2 }
 0x12f   : > { %v619_v19 = vpop.f32.mrf.mxu0  ;;  %v683_v20 = vpop.f32.mrf.mxu1  ;;  %v1131_v23 = vrot.slane %v1092_v60, 3  ;;  %v1162_v10 = vrot.slane %v1108_v61, 3  ;;  %v934_v25 = vmax.f32 %v902_v49, 0.0  ;;  %v950_v32 = vmax.f32 %v918_v50, 0.0 }
 0x130   : > { %v1093_v11 = vunpack.c.l.b16 %v1396_v17  ;;  %v1109_v24 = vunpack.c.l.b16 %v1412_v18  ;;  %v747_v35 = vmax.f32 %v745_v62, %v746_v14  ;;  %v843_v36 = vmax.f32 %v841_v63, %v842_v16 }
 0x131   : > { %v1767_v33 = vpop.f32.mrf.mxu0  ;;  %v1769_v34 = vpop.f32.mrf.mxu1  ;;  %v750_v37 = vrot.slane %v1737_v5, 4  ;;  %v846_v38 = vrot.slane %v1739_v6, 4  ;;  %v1130_v1 = vsel %vm1129_vm4, %v1128_v12, %v1127_v21  ;;  %v1161_v2 = vsel %vm1129_vm4, %v1160_v13, %v1159_v22 }
 0x132   : > { %v1397_v28 = vpack.c.bf16 %v934_v25, %v934_v25  ;;  %v1413_v31 = vpack.c.bf16 %v950_v32, %v950_v32  ;;  %v1134_v29 = vrot.slane %v1093_v11, 2  ;;  %v1164_v30 = vrot.slane %v1109_v24, 2 }
 0x133   : > { %v622_v39 = vpop.f32.mrf.mxu0  ;;  %v686_v40 = vpop.f32.mrf.mxu1  ;;  %v751_v41 = vmax.f32 %v1737_v5, %v750_v37  ;;  %v847_v42 = vmax.f32 %v1739_v6, %v846_v38  ;;  %v1133_v43 = vsel %vm1132_vm5, %v1131_v23, %v1130_v1  ;;  %v1163_v44 = vsel %vm1132_vm5, %v1162_v10, %v1161_v2 }
 0x134   : > { %v1094_v45 = vunpack.c.l.b16 %v1397_v28  ;;  %v1110_v48 = vunpack.c.l.b16 %v1413_v31  ;;  %v748_v53 = vrot.slane %v747_v35, 1  ;;  %v844_v56 = vrot.slane %v843_v36, 1 }
 0x135   : > { %v1779_v51 = vpop.f32.mrf.mxu0  ;;  %v1781_v52 = vpop.f32.mrf.mxu1  ;;  %v752_v57 = vrot.slane %v751_v41, 2  ;;  %v848_v58 = vrot.slane %v847_v42, 2  ;;  %v756_v5 = vrot.slane %v1741_v26, 4  ;;  %v852_v6 = vrot.slane %v1743_v27, 4 }
 0x136   : > { %v1137_v54 = vrot.slane %v1094_v45, 1  ;;  %v1166_v55 = vrot.slane %v1110_v48, 1  ;;  %v1136_v61 = vsel %vm1135_vm6, %v1134_v29, %v1133_v43  ;;  %v1165_v62 = vsel %vm1135_vm6, %v1164_v30, %v1163_v44 }
 0x137   : > { %v627_v59 = vpop.f32.mrf.mxu0  ;;  %v691_v60 = vpop.f32.mrf.mxu1  ;;  %v753_v63 = vmax.f32 %v751_v41, %v752_v57  ;;  %v849_v0 = vmax.f32 %v847_v42, %v848_v58  ;;  %v757_v7 = vmax.f32 %v1741_v26, %v756_v5  ;;  %v853_v12 = vmax.f32 %v1743_v27, %v852_v6 }
 0x138   : > { %v1139_v3 = vsel %vm1138_vm7, %v1137_v54, %v1136_v61  ;;  %v1167_v4 = vsel %vm1138_vm7, %v1166_v55, %v1165_v62  ;;  %v762_v22 = vrot.slane %v1747_v46, 4  ;;  %v858_v26 = vrot.slane %v1749_v47, 4 }
 0x139   : > { %v1797_v13 = vpop.f32.mrf.mxu0  ;;  %v1799_v14 = vpop.f32.mrf.mxu1  ;;  %v1182_v16 = vpack.c.b16 %v1139_v3, %v1139_v3  ;;  %v1184_v17 = vpack.c.b16 %v1167_v4, %v1167_v4  ;;  %v754_v18 = vrot.slane %v753_v63, 1  ;;  %v850_v49 = vrot.slane %v849_v0, 1 }
 0x13a   : > { %v758_v50 = vrot.slane %v757_v7, 2  ;;  %v854_v19 = vrot.slane %v853_v12, 2  ;;  %v749_v23 = vmax.f32 %v747_v35, %v748_v53  ;;  %v845_v27 = vmax.f32 %v843_v36, %v844_v56 }
 0x13b   : > { %v630_v20 = vpop.f32.mrf.mxu0  ;;  %v694_v21 = vpop.f32.mrf.mxu1  ;;  %1190 = vst [vmem:[%s1791_s25] sm:$0xf] %v1182_v16  ;;  %1192 = vst [vmem:[%s1791_s25 + $0x8] sm:$0xf] %v1184_v17  ;;  %v755_v10 = vmax.f32 %v753_v63, %v754_v18  ;;  %v851_v11 = vmax.f32 %v849_v0, %v850_v49  ;;  %v763_v24 = vmax.f32 %v1747_v46, %v762_v22  ;;  %v768_v32 = vrot.slane %v1757_v8, 4 }
 0x13c   : > { %v859_v25 = vmax.f32 %v1749_v47, %v858_v26  ;;  %v864_v37 = vrot.slane %v1759_v9, 4  ;;  %v759_v38 = vmax.f32 %v757_v7, %v758_v50  ;;  %v855_v1 = vmax.f32 %v853_v12, %v854_v19 }
 0x13d   : > { %v764_v2 = vrot.slane %v763_v24, 2  ;;  %v769_v31 = vmax.f32 %v1757_v8, %v768_v32  ;;  %v903_v35 = vadd.f32 %v1713_v15, %v749_v23  ;;  %v919_v36 = vadd.f32 %v1713_v15, %v845_v27 }
 0x13e   : > { %v860_v28 = vrot.slane %v859_v25, 2  ;;  %v865_v39 = vmax.f32 %v1759_v9, %v864_v37  ;;  %v904_v46 = vadd.f32 %v1713_v15, %v755_v10  ;;  %v920_v47 = vadd.f32 %v1713_v15, %v851_v11 }
 0x13f   : > { %v770_v40 = vrot.slane %v769_v31, 2  ;;  %v760_v30 = vrot.slane %v759_v38, 1  ;;  %v856_v41 = vrot.slane %v855_v1, 1  ;;  %v765_v42 = vmax.f32 %v763_v24, %v764_v2 }
 0x140   : > { %v866_v29 = vrot.slane %v865_v39, 2  ;;  %v861_v43 = vmax.f32 %v859_v25, %v860_v28  ;;  %v935_v44 = vmax.f32 %v903_v35, 0.0  ;;  %v951_v45 = vmax.f32 %v919_v36, 0.0 }
 0x141   : > { %v936_v48 = vmax.f32 %v904_v46, 0.0  ;;  %v952_v8 = vmax.f32 %v920_v47, 0.0  ;;  %v771_v53 = vmax.f32 %v769_v31, %v770_v40  ;;  %v761_v56 = vmax.f32 %v759_v38, %v760_v30 }
 0x142   : > { %v867_v9 = vmax.f32 %v865_v39, %v866_v29  ;;  %v857_v57 = vmax.f32 %v855_v1, %v856_v41  ;;  %v766_v58 = vrot.slane %v765_v42, 1  ;;  %v862_v54 = vrot.slane %v861_v43, 1 }
 0x143   : > { %v1815_v55 = vpack.c.bf16 %v935_v44, %v935_v44  ;;  %v1817_v5 = vpack.c.bf16 %v951_v45, %v951_v45  ;;  %v1399_v6 = vpack.c.bf16 %v936_v48, %v936_v48  ;;  %v1415_v59 = vpack.c.bf16 %v952_v8, %v952_v8 }
 0x144   : > { %v772_v60 = vrot.slane %v771_v53, 1  ;;  %v868_v61 = vrot.slane %v867_v9, 1  ;;  %v774_v62 = vrot.slane %v1767_v33, 4  ;;  %v870_v63 = vrot.slane %v1769_v34, 4 }
 0x145   : > { %v905_v0 = vadd.f32 %v1713_v15, %v761_v56  ;;  %v921_v3 = vadd.f32 %v1713_v15, %v857_v57  ;;  %v767_v4 = vmax.f32 %v765_v42, %v766_v58  ;;  %v863_v7 = vmax.f32 %v861_v43, %v862_v54 }
 0x146   : > { %v1095_v12 = vunpack.c.l.b16 %v1815_v55  ;;  %v1111_v16 = vunpack.c.l.b16 %v1817_v5  ;;  %v775_v17 = vmax.f32 %v1767_v33, %v774_v62  ;;  %v871_v18 = vmax.f32 %v1769_v34, %v870_v63 }
 0x147   : > { %v1096_v49 = vunpack.c.l.b16 %v1399_v6  ;;  %v1112_v50 = vunpack.c.l.b16 %v1415_v59  ;;  %v773_v19 = vmax.f32 %v771_v53, %v772_v60  ;;  %v869_v20 = vmax.f32 %v867_v9, %v868_v61 }
 0x148   : > { %v776_v21 = vrot.slane %v775_v17, 2  ;;  %v872_v22 = vrot.slane %v871_v18, 2  ;;  %v780_v26 = vrot.slane %v1779_v51, 4  ;;  %v876_v23 = vrot.slane %v1781_v52, 4 }
 0x149   : > { %v937_v27 = vmax.f32 %v905_v0, 0.0  ;;  %v953_v10 = vmax.f32 %v921_v3, 0.0  ;;  %v906_v11 = vadd.f32 %v1713_v15, %v767_v4  ;;  %v922_v24 = vadd.f32 %v1713_v15, %v863_v7 }
 0x14a   : > { %v777_v25 = vmax.f32 %v775_v17, %v776_v21  ;;  %v873_v33 = vmax.f32 %v871_v18, %v872_v22  ;;  %v781_v34 = vmax.f32 %v1779_v51, %v780_v26  ;;  %v877_v32 = vmax.f32 %v1781_v52, %v876_v23 }
 0x14b   : > { %v1833_v37 = vrot.slane %v1096_v49, 7  ;;  %v1835_v38 = vrot.slane %v1112_v50, 7  ;;  %v907_v1 = vadd.f32 %v1713_v15, %v773_v19  ;;  %v923_v2 = vadd.f32 %v1713_v15, %v869_v20 }
 0x14c   : > { %v778_v28 = vrot.slane %v777_v25, 1  ;;  %v874_v31 = vrot.slane %v873_v33, 1  ;;  %v782_v39 = vrot.slane %v781_v34, 2  ;;  %v878_v35 = vrot.slane %v877_v32, 2 }
 0x14d   : > { %v938_v36 = vmax.f32 %v906_v11, 0.0  ;;  %v954_v46 = vmax.f32 %v922_v24, 0.0  ;;  %v786_v47 = vrot.slane %v1797_v13, 4  ;;  %v882_v51 = vrot.slane %v1799_v14, 4 }
 0x14e   : > { %v779_v40 = vmax.f32 %v777_v25, %v778_v28  ;;  %v875_v52 = vmax.f32 %v873_v33, %v874_v31  ;;  %v783_v29 = vmax.f32 %v781_v34, %v782_v39  ;;  %v879_v30 = vmax.f32 %v877_v32, %v878_v35 }
 0x14f   : > { %v939_v41 = vmax.f32 %v907_v1, 0.0  ;;  %v955_v42 = vmax.f32 %v923_v2, 0.0  ;;  %v787_v43 = vmax.f32 %v1797_v13, %v786_v47  ;;  %v883_v44 = vmax.f32 %v1799_v14, %v882_v51 }
 0x150   : > { %v908_v45 = vadd.f32 %v1713_v15, %v779_v40  ;;  %v924_v48 = vadd.f32 %v1713_v15, %v875_v52  ;;  %v784_v8 = vrot.slane %v783_v29, 1  ;;  %v880_v53 = vrot.slane %v879_v30, 1 }
 0x151   : > { %v1400_v9 = vpack.c.bf16 %v937_v27, %v937_v27  ;;  %v1416_v56 = vpack.c.bf16 %v953_v10, %v953_v10  ;;  %v788_v57 = vrot.slane %v787_v43, 2  ;;  %v884_v58 = vrot.slane %v883_v44, 2 }
 0x152   : > { %v940_v54 = vmax.f32 %v908_v45, 0.0  ;;  %v956_v6 = vmax.f32 %v924_v48, 0.0  ;;  %v785_v59 = vmax.f32 %v783_v29, %v784_v8  ;;  %v881_v60 = vmax.f32 %v879_v30, %v880_v53 }
 0x153   : > { %v1401_v61 = vpack.c.bf16 %v938_v36, %v938_v36  ;;  %v1417_v62 = vpack.c.bf16 %v954_v46, %v954_v46  ;;  %v789_v63 = vmax.f32 %v787_v43, %v788_v57  ;;  %v885_v13 = vmax.f32 %v883_v44, %v884_v58 }
 0x154   : > { %v1402_v0 = vpack.c.bf16 %v939_v41, %v939_v41  ;;  %v1418_v14 = vpack.c.bf16 %v955_v42, %v955_v42  ;;  %v909_v3 = vadd.f32 %v1713_v15, %v785_v59  ;;  %v925_v4 = vadd.f32 %v1713_v15, %v881_v60 }
 0x155   : > { %v1403_v7 = vpack.c.bf16 %v940_v54, %v940_v54  ;;  %v1419_v17 = vpack.c.bf16 %v956_v6, %v956_v6  ;;  %v790_v18 = vrot.slane %v789_v63, 1  ;;  %v886_v49 = vrot.slane %v885_v13, 1 }
 0x156   : > { %v1097_v50 = vunpack.c.l.b16 %v1400_v9  ;;  %v1113_v19 = vunpack.c.l.b16 %v1416_v56  ;;  %v941_v20 = vmax.f32 %v909_v3, 0.0  ;;  %v957_v21 = vmax.f32 %v925_v4, 0.0 }
 0x157   : > { %v1098_v22 = vunpack.c.l.b16 %v1401_v61  ;;  %v1114_v26 = vunpack.c.l.b16 %v1417_v62  ;;  %v791_v23 = vmax.f32 %v789_v63, %v790_v18  ;;  %v887_v27 = vmax.f32 %v885_v13, %v886_v49 }
 0x158   : > { %v1099_v10 = vunpack.c.l.b16 %v1402_v0  ;;  %v1115_v11 = vunpack.c.l.b16 %v1418_v14  ;;  %v1404_v24 = vpack.c.bf16 %v941_v20, %v941_v20  ;;  %v1420_v25 = vpack.c.bf16 %v957_v21, %v957_v21 }
 0x159   : > { %v1100_v33 = vunpack.c.l.b16 %v1403_v7  ;;  %v1116_v34 = vunpack.c.l.b16 %v1419_v17  ;;  %v910_v32 = vadd.f32 %v1713_v15, %v791_v23  ;;  %v926_v1 = vadd.f32 %v1713_v15, %v887_v27 }
 0x15a   : > { %v1142_v2 = vrot.slane %v1097_v50, 6  ;;  %v1170_v28 = vrot.slane %v1113_v19, 6  ;;  %v1101_v31 = vunpack.c.l.b16 %v1404_v24  ;;  %v1117_v39 = vunpack.c.l.b16 %v1420_v25 }
 0x15b   : > { %v1144_v35 = vrot.slane %v1098_v22, 5  ;;  %v1172_v36 = vrot.slane %v1114_v26, 5  ;;  %v942_v46 = vmax.f32 %v910_v32, 0.0  ;;  %v958_v47 = vmax.f32 %v926_v1, 0.0 }
 0x15c   : > { %v1141_v51 = vsel %vm1120_vm1, %v1833_v37, %v1095_v12  ;;  %v1169_v40 = vsel %vm1120_vm1, %v1835_v38, %v1111_v16  ;;  %v1146_v52 = vrot.slane %v1099_v10, 4  ;;  %v1174_v15 = vrot.slane %v1115_v11, 4 }
 0x15d   : > { %v1148_v29 = vrot.slane %v1100_v33, 3  ;;  %v1176_v30 = vrot.slane %v1116_v34, 3  ;;  %v1405_v41 = vpack.c.bf16 %v942_v46, %v942_v46  ;;  %v1421_v42 = vpack.c.bf16 %v958_v47, %v958_v47 }
 0x15e   : > { %v1143_v43 = vsel %vm1123_vm2, %v1142_v2, %v1141_v51  ;;  %v1171_v44 = vsel %vm1123_vm2, %v1170_v28, %v1169_v40  ;;  %v1150_v45 = vrot.slane %v1101_v31, 2  ;;  %v1178_v55 = vrot.slane %v1117_v39, 2 }
 0x15f   : > { %v1145_v48 = vsel %vm1126_vm3, %v1144_v35, %v1143_v43  ;;  %v1173_v5 = vsel %vm1126_vm3, %v1172_v36, %v1171_v44  ;;  %v1102_v12 = vunpack.c.l.b16 %v1405_v41  ;;  %v1118_v16 = vunpack.c.l.b16 %v1421_v42 }
 0x160   : > { %v1147_v37 = vsel %vm1129_vm4, %v1146_v52, %v1145_v48  ;;  %v1175_v38 = vsel %vm1129_vm4, %v1174_v15, %v1173_v5 }
 0x161   : > { %v1149_v8 = vsel %vm1132_vm5, %v1148_v29, %v1147_v37  ;;  %v1177_v53 = vsel %vm1132_vm5, %v1176_v30, %v1175_v38  ;;  %v1152_v9 = vrot.slane %v1102_v12, 1  ;;  %v1180_v56 = vrot.slane %v1118_v16, 1 }
 0x162   : > { %v1151_v57 = vsel %vm1135_vm6, %v1150_v45, %v1149_v8  ;;  %v1179_v58 = vsel %vm1135_vm6, %v1178_v55, %v1177_v53 }
 0x163   : > { %v1153_v54 = vsel %vm1138_vm7, %v1152_v9, %v1151_v57  ;;  %v1181_v6 = vsel %vm1138_vm7, %v1180_v56, %v1179_v58 }
 0x164   : > { %v1183_v59 = vpack.c.b16 %v1153_v54, %v1153_v54  ;;  %v1185_v60 = vpack.c.b16 %v1181_v6, %v1181_v6 }
 0x166   : > { %1191 = vst [vmem:[%s1791_s25 + $0x4] sm:$0xf] %v1183_v59  ;;  %1193 = vst [vmem:[%s1791_s25 + $0xc] sm:$0xf] %v1185_v60 }
 0x167 PF: > { %s13_s14 = sadd.s32 1, %s1553_s14   ;;  %s1884_s12 = smov %s1549_s13 }
 0x168   : > { %p10_p5 = scmp.ge.s32.totalorder %s13_s14, 4   ;;  %s1885_s13 = smov %s1887_s15 }
 0x16a   :  { %12 = sbr.rel (!%p10_p5) target bundleno = 2 (0x2), region = 62 }

// kernel: _lambda_.3
= control target key start
LH: loop header
LB: loop body
LE: loop exit
PB: predicated region body
PF: predicated region fallthrough
CT: control target
= control target key end

     0   :  { %vm10810_vm0 = vmmov 0   ;;  %s12772_s1 = inlined_call_operand.vmem [shape: bf16[8,128,128], index: 1, kind: input, shape index: {}]   ;;  %s12773_s0 = inlined_call_operand.vmem [shape: bf16[32,16,128], index: 0, kind: input, shape index: {}]   ;;  %s12774_s3 = inlined_call_operand.vmem [shape: bf16[8,128,128], index: 3, kind: input, shape index: {}]   ;;  %s12775_s2 = inlined_call_operand.vmem [shape: f32[1,128], index: 2, kind: input, shape index: {}]   ;;  %s12776_s5 = inlined_call_operand.vmem [shape: bf16[8,128,128], index: 5, kind: input, shape index: {}]   ;;  %s12777_s4 = inlined_call_operand.vmem [shape: f32[1,128], index: 4, kind: input, shape index: {}]   ;;  %s12778_s6 = inlined_call_operand.vmem [shape: f32[1,128], index: 6, kind: input, shape index: {}]   ;;  %s12779_s7 = inlined_call_operand.vmem [shape: f32[1,16,128], index: 7, kind: output, shape index: {}]  }
   0x1   :  { %v10353_v0 = vld [vmem:[%s12772_s1 + $0x78] sm:$0xff]   ;;  %v10355_v2 = vld [vmem:[%s12772_s1 + $0x70] sm:$0xff]   ;;  %v10357_v4 = vld [vmem:[%s12772_s1 + $0x68] sm:$0xff]  }
   0x2   :  { %v10354_v1 = vld [vmem:[%s12772_s1 + $0x38] sm:$0xff]   ;;  %9263 = vmatprep.subr.bf16.mxu0 %v10353_v0  ;;  %v10356_v3 = vld [vmem:[%s12772_s1 + $0x30] sm:$0xff]   ;;  %v10358_v5 = vld [vmem:[%s12772_s1 + $0x28] sm:$0xff]  }
   0x3   :  { %9315 = vmatprep.subr.bf16.mxu1 %v10354_v1  ;;  %9264 = vmatpush3.bf16.msra.mxu0 %v10353_v0  ;;  %v10359_v6 = vld [vmem:[%s12772_s1 + $0x60] sm:$0xff]   ;;  %v10361_v8 = vld [vmem:[%s12772_s1 + $0x58] sm:$0xff]   ;;  %v10363_v10 = vld [vmem:[%s12772_s1 + $0x50] sm:$0xff]  }
   0x4   :  { %9316 = vmatpush3.bf16.msra.mxu1 %v10354_v1  ;;  %9265 = vmatprep.subr.bf16.mxu0 %v10355_v2  ;;  %v10360_v7 = vld [vmem:[%s12772_s1 + $0x20] sm:$0xff]   ;;  %v10362_v9 = vld [vmem:[%s12772_s1 + $0x18] sm:$0xff]   ;;  %v10364_v11 = vld [vmem:[%s12772_s1 + $0x10] sm:$0xff]  }
   0x5   :  { %9317 = vmatprep.subr.bf16.mxu1 %v10356_v3  ;;  %v10369_v12 = vld [vmem:[%s12773_s0 + $0x8] sm:$0xff]   ;;  %v10370_v13 = vld [vmem:[%s12773_s0] sm:$0xff]   ;;  %v10371_v18 = vld [vmem:[%s12773_s0 + $0x10] sm:$0xff]  }
   0x6   :  { %9279 = vmatprep.mubr.bf16.mxu0 %v10369_v12  ;;  %9331 = vmatprep.mubr.bf16.mxu1 %v10370_v13  ;;  %v10365_v14 = vld [vmem:[%s12772_s1 + $0x48] sm:$0xff]   ;;  %v10367_v16 = vld [vmem:[%s12772_s1 + $0x40] sm:$0xff]   ;;  %v10373_v19 = vld [vmem:[%s12772_s1 + $0xb8] sm:$0xff]  }
   0x7   :  { %9266 = vmatpush3.bf16.msra.mxu0 %v10355_v2  ;;  %v10366_v15 = vld [vmem:[%s12772_s1 + $0x8] sm:$0xff]   ;;  %v10368_v17 = vld [vmem:[%s12772_s1] sm:$0xff]   ;;  %v10374_v20 = vld [vmem:[%s12772_s1 + $0xf8] sm:$0xff]  }
   0x8   :  { %9318 = vmatpush3.bf16.msra.mxu1 %v10356_v3  ;;  %9267 = vmatprep.subr.bf16.mxu0 %v10357_v4  ;;  %v10372_v21 = vld [vmem:[%s12773_s0 + $0x8] sm:$0xff]   ;;  %v10375_v22 = vld [vmem:[%s12773_s0 + $0x18] sm:$0xff]   ;;  %v10376_v23 = vld [vmem:[%s12773_s0 + $0x10] sm:$0xff]  }
   0x9   :  { %9319 = vmatprep.subr.bf16.mxu1 %v10358_v5  ;;  %v10379_v24 = vld [vmem:[%s12772_s1 + $0xb0] sm:$0xff]   ;;  %v10377_v26 = vld [vmem:[%s12773_s0 + $0x20] sm:$0xff]   ;;  %v10385_v27 = vld [vmem:[%s12772_s1 + $0xa8] sm:$0xff]  }
   0xa   :  { %v10380_v25 = vld [vmem:[%s12772_s1 + $0xf0] sm:$0xff]   ;;  %v10386_v28 = vld [vmem:[%s12772_s1 + $0xe8] sm:$0xff]   ;;  %v10378_v29 = vld [vmem:[%s12773_s0 + $0x18] sm:$0xff]  }
   0xb   :  { %9268 = vmatpush3.bf16.msra.mxu0 %v10357_v4  ;;  %v10381_v30 = vld [vmem:[%s12773_s0 + $0x28] sm:$0xff]   ;;  %v10382_v31 = vld [vmem:[%s12773_s0 + $0x20] sm:$0xff]   ;;  %v10383_v34 = vld [vmem:[%s12773_s0 + $0x30] sm:$0xff]  }
   0xc   :  { %9320 = vmatpush3.bf16.msra.mxu1 %v10358_v5  ;;  %9269 = vmatprep.subr.bf16.mxu0 %v10359_v6  ;;  %v10391_v32 = vld [vmem:[%s12772_s1 + $0xa0] sm:$0xff]   ;;  %v10384_v35 = vld [vmem:[%s12773_s0 + $0x28] sm:$0xff]   ;;  %v10397_v36 = vld [vmem:[%s12772_s1 + $0x98] sm:$0xff]  }
   0xd   :  { %9321 = vmatprep.subr.bf16.mxu1 %v10360_v7  ;;  %v10392_v33 = vld [vmem:[%s12772_s1 + $0xe0] sm:$0xff]   ;;  %v10398_v37 = vld [vmem:[%s12772_s1 + $0xd8] sm:$0xff]   ;;  %v10388_v39 = vld [vmem:[%s12773_s0 + $0x30] sm:$0xff]  }
   0xe   :  { %v10387_v38 = vld [vmem:[%s12773_s0 + $0x38] sm:$0xff]   ;;  %v10403_v40 = vld [vmem:[%s12772_s1 + $0x90] sm:$0xff]   ;;  %v10389_v41 = vld [vmem:[%s12773_s0 + $0x40] sm:$0xff]  }
   0xf   :  { %9270 = vmatpush3.bf16.msra.mxu0 %v10359_v6  ;;  %v10390_v42 = vld [vmem:[%s12773_s0 + $0x38] sm:$0xff]   ;;  %v10406_v43 = vld [vmem:[%s12772_s1 + $0xd0] sm:$0xff]   ;;  %v10393_v44 = vld [vmem:[%s12773_s0 + $0x48] sm:$0xff]  }
  0x10   :  { %9322 = vmatpush3.bf16.msra.mxu1 %v10360_v7  ;;  %9271 = vmatprep.subr.bf16.mxu0 %v10361_v8  ;;  %v10394_v45 = vld [vmem:[%s12773_s0 + $0x40] sm:$0xff]   ;;  %v10409_v46 = vld [vmem:[%s12772_s1 + $0x88] sm:$0xff]   ;;  %v10395_v47 = vld [vmem:[%s12773_s0 + $0x50] sm:$0xff]  }
  0x11   :  { %9323 = vmatprep.subr.bf16.mxu1 %v10362_v9  ;;  %v10396_v48 = vld [vmem:[%s12773_s0 + $0x48] sm:$0xff]   ;;  %v10399_v50 = vld [vmem:[%s12773_s0 + $0x58] sm:$0xff]   ;;  %v10400_v51 = vld [vmem:[%s12773_s0 + $0x50] sm:$0xff]  }
  0x12   :  { %v10414_v49 = vld [vmem:[%s12772_s1 + $0xc8] sm:$0xff]   ;;  %v10417_v52 = vld [vmem:[%s12772_s1 + $0x80] sm:$0xff]   ;;  %v10402_v55 = vld [vmem:[%s12773_s0 + $0x58] sm:$0xff]  }
  0x13   :  { %9272 = vmatpush3.bf16.msra.mxu0 %v10361_v8  ;;  %v10420_v53 = vld [vmem:[%s12772_s1 + $0xc0] sm:$0xff]   ;;  %v10404_v56 = vld [vmem:[%s12773_s0 + $0x68] sm:$0xff]   ;;  %v10425_v58 = vld [vmem:[%s12772_s1 + $0x138] sm:$0xff]  }
  0x14   :  { %9324 = vmatpush3.bf16.msra.mxu1 %v10362_v9  ;;  %9273 = vmatprep.subr.bf16.mxu0 %v10363_v10  ;;  %v10401_v54 = vld [vmem:[%s12773_s0 + $0x60] sm:$0xff]   ;;  %v10426_v59 = vld [vmem:[%s12772_s1 + $0x178] sm:$0xff]   ;;  %v10407_v60 = vld [vmem:[%s12773_s0 + $0x70] sm:$0xff]  }
  0x15   :  { %9325 = vmatprep.subr.bf16.mxu1 %v10364_v11  ;;  %v10405_v57 = vld [vmem:[%s12773_s0 + $0x60] sm:$0xff]   ;;  %v10408_v61 = vld [vmem:[%s12773_s0 + $0x68] sm:$0xff]   ;;  %v10410_v62 = vld [vmem:[%s12773_s0 + $0x78] sm:$0xff]  }
  0x16   :  { %v10411_v63 = vld [vmem:[%s12773_s0 + $0x70] sm:$0xff]   ;;  %v10412_v0 = vld [vmem:[%s12773_s0 + $0x80] sm:$0xff]   ;;  %v10413_v1 = vld [vmem:[%s12773_s0 + $0x78] sm:$0xff]  }
  0x17   :  { %9274 = vmatpush3.bf16.msra.mxu0 %v10363_v10  ;;  %v10415_v2 = vld [vmem:[%s12773_s0 + $0x88] sm:$0xff]   ;;  %v10416_v3 = vld [vmem:[%s12773_s0 + $0x80] sm:$0xff]   ;;  %v10418_v4 = vld [vmem:[%s12773_s0 + $0x90] sm:$0xff]  }
  0x18   :  { %9326 = vmatpush3.bf16.msra.mxu1 %v10364_v11  ;;  %9275 = vmatprep.subr.bf16.mxu0 %v10365_v14  ;;  %v10419_v5 = vld [vmem:[%s12773_s0 + $0x88] sm:$0xff]   ;;  %v10421_v6 = vld [vmem:[%s12773_s0 + $0x10] sm:$0xff]   ;;  %v10422_v7 = vld [vmem:[%s12773_s0 + $0x18] sm:$0xff]  }
  0x19   :  { %9327 = vmatprep.subr.bf16.mxu1 %v10366_v15  ;;  %v10423_v8 = vld [vmem:[%s12773_s0 + $0x18] sm:$0xff]   ;;  %v10424_v9 = vld [vmem:[%s12773_s0 + $0x20] sm:$0xff]   ;;  %v10428_v11 = vld [vmem:[%s12773_s0 + $0x28] sm:$0xff]  }
  0x1a   :  { %v10427_v10 = vld [vmem:[%s12773_s0 + $0x20] sm:$0xff]   ;;  %v10431_v12 = vld [vmem:[%s12772_s1 + $0x130] sm:$0xff]  }
  0x1b   :  { %9276 = vmatpush3.bf16.msra.mxu0 %v10365_v14  ;;  %v10432_v13 = vld [vmem:[%s12772_s1 + $0x170] sm:$0xff]   ;;  %v10429_v14 = vld [vmem:[%s12773_s0 + $0x28] sm:$0xff]  }
  0x1c   :  { %9328 = vmatpush3.bf16.msra.mxu1 %v10366_v15  ;;  %9277 = vmatprep.subr.bf16.mxu0 %v10367_v16  ;;  %v10437_v15 = vld [vmem:[%s12772_s1 + $0x128] sm:$0xff]  }
  0x1d   :  { %9329 = vmatprep.subr.bf16.mxu1 %v10368_v17 }
  0x1f   :  { %9278 = vmatpush3.bf16.msra.mxu0 %v10367_v16  ;;  %v10438_v16 = vld [vmem:[%s12772_s1 + $0x168] sm:$0xff]  }
  0x20   :  { %9330 = vmatpush3.bf16.msra.mxu1 %v10368_v17  ;;  %9367 = vmatprep.subr.bf16.mxu0 %v10373_v19  ;;  %v10430_v17 = vld [vmem:[%s12773_s0 + $0x30] sm:$0xff]  }
  0x21   :  { %9419 = vmatprep.subr.bf16.mxu1 %v10374_v20 }
  0x22   :  { %9280 = vmatmul.mubr.bf16.vlgmr.msra.gmra.mxu0 %v10371_v18  ;;  %v10433_v18 = vld [vmem:[%s12773_s0 + $0x30] sm:$0xff]  }
  0x23   :  { %9332 = vmatmul.mubr.bf16.vlgmr.msra.gmra.mxu1 %v10372_v21  ;;  %9368 = vmatpush3.bf16.msra.mxu0 %v10373_v19  ;;  %v10434_v19 = vld [vmem:[%s12773_s0 + $0x38] sm:$0xff]   ;;  %v10444_v21 = vld [vmem:[%s12772_s1 + $0x160] sm:$0xff]  }
  0x24   :  { %9420 = vmatpush3.bf16.msra.mxu1 %v10374_v20  ;;  %9283 = vmatprep.mubr.bf16.mxu0 %v10375_v22  ;;  %v10443_v20 = vld [vmem:[%s12772_s1 + $0x120] sm:$0xff]   ;;  %v10435_v22 = vld [vmem:[%s12773_s0 + $0x38] sm:$0xff]  }
  0x25   :  { %9335 = vmatprep.mubr.bf16.mxu1 %v10376_v23  ;;  %9369 = vmatprep.subr.bf16.mxu0 %v10379_v24  ;;  %v10436_v23 = vld [vmem:[%s12773_s0 + $0x40] sm:$0xff]  }
  0x26   :  { %9421 = vmatprep.subr.bf16.mxu1 %v10380_v25 }
  0x27   :  { %9370 = vmatpush3.bf16.msra.mxu0 %v10379_v24  ;;  %v10449_v24 = vld [vmem:[%s12772_s1 + $0x118] sm:$0xff]  }
  0x28   :  { %9422 = vmatpush3.bf16.msra.mxu1 %v10380_v25  ;;  %9371 = vmatprep.subr.bf16.mxu0 %v10385_v27  ;;  %v10450_v25 = vld [vmem:[%s12772_s1 + $0x158] sm:$0xff]  }
  0x29   :  { %9423 = vmatprep.subr.bf16.mxu1 %v10386_v28 }
  0x2a   :  { %9284 = vmatmul.mubr.bf16.gmra.mxu0 %v10377_v26  ;;  %v10439_v26 = vld [vmem:[%s12773_s0 + $0x40] sm:$0xff]  }
  0x2b   :  { %9336 = vmatmul.mubr.bf16.gmra.mxu1 %v10378_v29  ;;  %9287 = vmatprep.mubr.bf16.mxu0 %v10381_v30  ;;  %v10458_v29 = vld [vmem:[%s12772_s1 + $0x150] sm:$0xff]   ;;  %v10441_v30 = vld [vmem:[%s12773_s0 + $0x48] sm:$0xff]  }
  0x2c   :  { %9339 = vmatprep.mubr.bf16.mxu1 %v10382_v31  ;;  %9372 = vmatpush3.bf16.msra.mxu0 %v10385_v27  ;;  %v10440_v27 = vld [vmem:[%s12773_s0 + $0x48] sm:$0xff]   ;;  %v10442_v31 = vld [vmem:[%s12773_s0 + $0x50] sm:$0xff]  }
  0x2d   :  { %9424 = vmatpush3.bf16.msra.mxu1 %v10386_v28  ;;  %9373 = vmatprep.subr.bf16.mxu0 %v10391_v32  ;;  %v10455_v28 = vld [vmem:[%s12772_s1 + $0x110] sm:$0xff]  }
  0x2e   :  { %9425 = vmatprep.subr.bf16.mxu1 %v10392_v33 }
  0x30   :  { %9374 = vmatpush3.bf16.msra.mxu0 %v10391_v32  ;;  %v10461_v32 = vld [vmem:[%s12772_s1 + $0x108] sm:$0xff]  }
  0x31   :  { %9426 = vmatpush3.bf16.msra.mxu1 %v10392_v33  ;;  %9375 = vmatprep.subr.bf16.mxu0 %v10397_v36  ;;  %v10466_v33 = vld [vmem:[%s12772_s1 + $0x148] sm:$0xff]  }
  0x32   :  { %9288 = vmatmul.mubr.bf16.gmra.mxu0 %v10383_v34  ;;  %9427 = vmatprep.subr.bf16.mxu1 %v10398_v37  ;;  %v10445_v34 = vld [vmem:[%s12773_s0 + $0x50] sm:$0xff]  }
  0x33   :  { %9340 = vmatmul.mubr.bf16.gmra.mxu1 %v10384_v35  ;;  %9291 = vmatprep.mubr.bf16.mxu0 %v10387_v38  ;;  %v10446_v35 = vld [vmem:[%s12773_s0 + $0x58] sm:$0xff]  }
  0x34   :  { %9343 = vmatprep.mubr.bf16.mxu1 %v10388_v39  ;;  %9376 = vmatpush3.bf16.msra.mxu0 %v10397_v36  ;;  %v10469_v36 = vld [vmem:[%s12772_s1 + $0x100] sm:$0xff]   ;;  %v10447_v38 = vld [vmem:[%s12773_s0 + $0x58] sm:$0xff]  }
  0x35   :  { %9428 = vmatpush3.bf16.msra.mxu1 %v10398_v37  ;;  %9377 = vmatprep.subr.bf16.mxu0 %v10403_v40  ;;  %v10472_v37 = vld [vmem:[%s12772_s1 + $0x140] sm:$0xff]  }
  0x36   :  { %9429 = vmatprep.subr.bf16.mxu1 %v10406_v43  ;;  %v10448_v39 = vld [vmem:[%s12773_s0 + $0x60] sm:$0xff]  }
  0x38   :  { %9378 = vmatpush3.bf16.msra.mxu0 %v10403_v40  ;;  %v10477_v40 = vld [vmem:[%s12772_s1 + $0x1b8] sm:$0xff]  }
  0x39   :  { %9430 = vmatpush3.bf16.msra.mxu1 %v10406_v43  ;;  %9379 = vmatprep.subr.bf16.mxu0 %v10409_v46  ;;  %v10452_v43 = vld [vmem:[%s12773_s0 + $0x68] sm:$0xff]  }
  0x3a   :  { %9292 = vmatmul.mubr.bf16.gmra.mxu0 %v10389_v41  ;;  %9431 = vmatprep.subr.bf16.mxu1 %v10414_v49  ;;  %v10478_v41 = vld [vmem:[%s12772_s1 + $0x1f8] sm:$0xff]  }
  0x3b   :  { %9344 = vmatmul.mubr.bf16.gmra.mxu1 %v10390_v42  ;;  %9295 = vmatprep.mubr.bf16.mxu0 %v10393_v44  ;;  %v10451_v42 = vld [vmem:[%s12773_s0 + $0x60] sm:$0xff]   ;;  %v10453_v44 = vld [vmem:[%s12773_s0 + $0x68] sm:$0xff]  }
  0x3c   :  { %9347 = vmatprep.mubr.bf16.mxu1 %v10394_v45  ;;  %9380 = vmatpush3.bf16.msra.mxu0 %v10409_v46  ;;  %v10454_v45 = vld [vmem:[%s12773_s0 + $0x70] sm:$0xff]  }
  0x3d   :  { %9432 = vmatpush3.bf16.msra.mxu1 %v10414_v49  ;;  %9381 = vmatprep.subr.bf16.mxu0 %v10417_v52  ;;  %v10456_v46 = vld [vmem:[%s12773_s0 + $0x70] sm:$0xff]   ;;  %v10460_v49 = vld [vmem:[%s12773_s0 + $0x80] sm:$0xff]  }
  0x3e   :  { %9433 = vmatprep.subr.bf16.mxu1 %v10420_v53 }
  0x40   :  { %9382 = vmatpush3.bf16.msra.mxu0 %v10417_v52  ;;  %v10464_v52 = vld [vmem:[%s12773_s0 + $0x88] sm:$0xff]  }
  0x41   :  { %9434 = vmatpush3.bf16.msra.mxu1 %v10420_v53  ;;  %9471 = vmatprep.subr.bf16.mxu0 %v10425_v58  ;;  %v10465_v53 = vld [vmem:[%s12773_s0 + $0x90] sm:$0xff]  }
  0x42   :  { %9296 = vmatmul.mubr.bf16.gmra.mxu0 %v10395_v47  ;;  %9523 = vmatprep.subr.bf16.mxu1 %v10426_v59  ;;  %v10457_v47 = vld [vmem:[%s12773_s0 + $0x78] sm:$0xff]  }
  0x43   :  { %9348 = vmatmul.mubr.bf16.gmra.mxu1 %v10396_v48  ;;  %9299 = vmatprep.mubr.bf16.mxu0 %v10399_v50  ;;  %v10459_v48 = vld [vmem:[%s12773_s0 + $0x78] sm:$0xff]   ;;  %v10462_v50 = vld [vmem:[%s12773_s0 + $0x80] sm:$0xff]  }
  0x44   :  { %9351 = vmatprep.mubr.bf16.mxu1 %v10400_v51  ;;  %v10463_v51 = vld [vmem:[%s12773_s0 + $0x88] sm:$0xff]  }
  0x4a   :  { %9300 = vmatmul.mubr.bf16.gmra.mxu0 %v10401_v54  ;;  %v10467_v54 = vld [vmem:[%s12773_s0 + $0x90] sm:$0xff]  }
  0x4b   :  { %9352 = vmatmul.mubr.bf16.gmra.mxu1 %v10402_v55  ;;  %9303 = vmatprep.mubr.bf16.mxu0 %v10404_v56  ;;  %v10468_v55 = vld [vmem:[%s12773_s0 + $0x98] sm:$0xff]  }
  0x4c   :  { %9355 = vmatprep.mubr.bf16.mxu1 %v10405_v57  ;;  %v10470_v56 = vld [vmem:[%s12773_s0 + $0x98] sm:$0xff]   ;;  %v10471_v57 = vld [vmem:[%s12773_s0 + $0xa0] sm:$0xff]  }
  0x52   :  { %9304 = vmatmul.mubr.bf16.gmra.mxu0 %v10407_v60  ;;  %v10475_v60 = vld [vmem:[%s12773_s0 + $0x28] sm:$0xff]  }
  0x53   :  { %9356 = vmatmul.mubr.bf16.gmra.mxu1 %v10408_v61  ;;  %9307 = vmatprep.mubr.bf16.mxu0 %v10410_v62  ;;  %v10476_v61 = vld [vmem:[%s12773_s0 + $0x30] sm:$0xff]  }
  0x54   :  { %9359 = vmatprep.mubr.bf16.mxu1 %v10411_v63  ;;  %v10479_v62 = vld [vmem:[%s12773_s0 + $0x30] sm:$0xff]   ;;  %v10480_v63 = vld [vmem:[%s12773_s0 + $0x38] sm:$0xff]  }
  0x5a   :  { %9308 = vmatmul.mubr.bf16.gmra.mxu0 %v10412_v0  ;;  %v10483_v0 = vld [vmem:[%s12772_s1 + $0x1b0] sm:$0xff]  }
  0x5b   :  { %9360 = vmatmul.mubr.bf16.gmra.mxu1 %v10413_v1  ;;  %9311 = vmatprep.mubr.bf16.mxu0 %v10415_v2  ;;  %v10484_v1 = vld [vmem:[%s12772_s1 + $0x1f0] sm:$0xff]   ;;  %v10481_v2 = vld [vmem:[%s12773_s0 + $0x38] sm:$0xff]  }
  0x5c   :  { %9363 = vmatprep.mubr.bf16.mxu1 %v10416_v3  ;;  %v10489_v3 = vld [vmem:[%s12772_s1 + $0x1a8] sm:$0xff]  }
  0x62   :  { %9312 = vmatmul.mubr.bf16.gmra.mxu0 %v10418_v4  ;;  %v10490_v4 = vld [vmem:[%s12772_s1 + $0x1e8] sm:$0xff]  }
  0x63   :  { %9364 = vmatmul.mubr.bf16.gmra.mxu1 %v10419_v5  ;;  %9383 = vmatprep.mubr.bf16.mxu0 %v10421_v6  ;;  %v10482_v5 = vld [vmem:[%s12773_s0 + $0x40] sm:$0xff]  }
  0x64   :  { %9435 = vmatprep.mubr.bf16.mxu1 %v10422_v7  ;;  %v10485_v6 = vld [vmem:[%s12773_s0 + $0x40] sm:$0xff]   ;;  %v10486_v7 = vld [vmem:[%s12773_s0 + $0x48] sm:$0xff]  }
  0x6a   :  { %9384 = vmatmul.mubr.bf16.vlgmr.msra.gmra.mxu0 %v10423_v8  ;;  %v10495_v8 = vld [vmem:[%s12772_s1 + $0x1a0] sm:$0xff]  }
  0x6b   :  { %9436 = vmatmul.mubr.bf16.vlgmr.msra.gmra.mxu1 %v10424_v9  ;;  %9472 = vmatpush3.bf16.msra.mxu0 %v10425_v58  ;;  %v10473_v58 = vld [vmem:[%s12773_s0 + $0x20] sm:$0xff]  }
  0x6c   :  { %9524 = vmatpush3.bf16.msra.mxu1 %v10426_v59  ;;  %9387 = vmatprep.mubr.bf16.mxu0 %v10427_v10  ;;  %v10474_v59 = vld [vmem:[%s12773_s0 + $0x28] sm:$0xff]   ;;  %v10496_v9 = vld [vmem:[%s12772_s1 + $0x1e0] sm:$0xff]  }
  0x6d   :  { %9439 = vmatprep.mubr.bf16.mxu1 %v10428_v11  ;;  %9473 = vmatprep.subr.bf16.mxu0 %v10431_v12  ;;  %v10487_v10 = vld [vmem:[%s12773_s0 + $0x48] sm:$0xff]   ;;  %v10488_v11 = vld [vmem:[%s12773_s0 + $0x50] sm:$0xff]  }
  0x6e   :  { %9525 = vmatprep.subr.bf16.mxu1 %v10432_v13 }
  0x6f   :  { %9474 = vmatpush3.bf16.msra.mxu0 %v10431_v12  ;;  %v10501_v12 = vld [vmem:[%s12772_s1 + $0x198] sm:$0xff]  }
  0x70   :  { %9526 = vmatpush3.bf16.msra.mxu1 %v10432_v13  ;;  %9475 = vmatprep.subr.bf16.mxu0 %v10437_v15  ;;  %v10502_v13 = vld [vmem:[%s12772_s1 + $0x1d8] sm:$0xff]  }
  0x71   :  { %9527 = vmatprep.subr.bf16.mxu1 %v10438_v16 }
  0x72   :  { %9388 = vmatmul.mubr.bf16.gmra.mxu0 %v10429_v14  ;;  %v10491_v14 = vld [vmem:[%s12773_s0 + $0x50] sm:$0xff]  }
  0x73   :  { %9440 = vmatmul.mubr.bf16.gmra.mxu1 %v10430_v17  ;;  %9391 = vmatprep.mubr.bf16.mxu0 %v10433_v18  ;;  %v10510_v17 = vld [vmem:[%s12772_s1 + $0x1d0] sm:$0xff]   ;;  %v10493_v18 = vld [vmem:[%s12773_s0 + $0x58] sm:$0xff]  }
  0x74   :  { %9443 = vmatprep.mubr.bf16.mxu1 %v10434_v19  ;;  %9476 = vmatpush3.bf16.msra.mxu0 %v10437_v15  ;;  %v10492_v15 = vld [vmem:[%s12773_s0 + $0x58] sm:$0xff]   ;;  %v10494_v19 = vld [vmem:[%s12773_s0 + $0x60] sm:$0xff]  }
  0x75   :  { %9528 = vmatpush3.bf16.msra.mxu1 %v10438_v16  ;;  %9477 = vmatprep.subr.bf16.mxu0 %v10443_v20  ;;  %v10507_v16 = vld [vmem:[%s12772_s1 + $0x190] sm:$0xff]  }
  0x76   :  { %9529 = vmatprep.subr.bf16.mxu1 %v10444_v21 }
  0x78   :  { %9478 = vmatpush3.bf16.msra.mxu0 %v10443_v20  ;;  %v10513_v20 = vld [vmem:[%s12772_s1 + $0x188] sm:$0xff]  }
  0x79   :  { %9530 = vmatpush3.bf16.msra.mxu1 %v10444_v21  ;;  %9479 = vmatprep.subr.bf16.mxu0 %v10449_v24  ;;  %v10518_v21 = vld [vmem:[%s12772_s1 + $0x1c8] sm:$0xff]  }
  0x7a   :  { %9392 = vmatmul.mubr.bf16.gmra.mxu0 %v10435_v22  ;;  %9531 = vmatprep.subr.bf16.mxu1 %v10450_v25  ;;  %v10497_v22 = vld [vmem:[%s12773_s0 + $0x60] sm:$0xff]  }
  0x7b   :  { %9444 = vmatmul.mubr.bf16.gmra.mxu1 %v10436_v23  ;;  %9395 = vmatprep.mubr.bf16.mxu0 %v10439_v26  ;;  %v10498_v23 = vld [vmem:[%s12773_s0 + $0x68] sm:$0xff]  }
  0x7c   :  { %9447 = vmatprep.mubr.bf16.mxu1 %v10440_v27  ;;  %9480 = vmatpush3.bf16.msra.mxu0 %v10449_v24  ;;  %v10521_v24 = vld [vmem:[%s12772_s1 + $0x180] sm:$0xff]   ;;  %v10499_v26 = vld [vmem:[%s12773_s0 + $0x68] sm:$0xff]   ;;  %v10500_v27 = vld [vmem:[%s12773_s0 + $0x70] sm:$0xff]  }
  0x7d   :  { %9532 = vmatpush3.bf16.msra.mxu1 %v10450_v25  ;;  %9481 = vmatprep.subr.bf16.mxu0 %v10455_v28  ;;  %v10524_v25 = vld [vmem:[%s12772_s1 + $0x1c0] sm:$0xff]  }
  0x7e   :  { %9533 = vmatprep.subr.bf16.mxu1 %v10458_v29 }
  0x80   :  { %9482 = vmatpush3.bf16.msra.mxu0 %v10455_v28  ;;  %v10503_v28 = vld [vmem:[%s12773_s0 + $0x70] sm:$0xff]  }
  0x81   :  { %9534 = vmatpush3.bf16.msra.mxu1 %v10458_v29  ;;  %9483 = vmatprep.subr.bf16.mxu0 %v10461_v32  ;;  %v10504_v29 = vld [vmem:[%s12773_s0 + $0x78] sm:$0xff]  }
  0x82   :  { %9396 = vmatmul.mubr.bf16.gmra.mxu0 %v10441_v30  ;;  %9535 = vmatprep.subr.bf16.mxu1 %v10466_v33  ;;  %v10505_v30 = vld [vmem:[%s12773_s0 + $0x78] sm:$0xff]  }
  0x83   :  { %9448 = vmatmul.mubr.bf16.gmra.mxu1 %v10442_v31  ;;  %9399 = vmatprep.mubr.bf16.mxu0 %v10445_v34  ;;  %v10506_v31 = vld [vmem:[%s12773_s0 + $0x80] sm:$0xff]   ;;  %v10511_v34 = vld [vmem:[%s12773_s0 + $0x88] sm:$0xff]  }
  0x84   :  { %9451 = vmatprep.mubr.bf16.mxu1 %v10446_v35  ;;  %9484 = vmatpush3.bf16.msra.mxu0 %v10461_v32  ;;  %v10508_v32 = vld [vmem:[%s12773_s0 + $0x80] sm:$0xff]   ;;  %v10512_v35 = vld [vmem:[%s12773_s0 + $0x90] sm:$0xff]  }
  0x85   :  { %9536 = vmatpush3.bf16.msra.mxu1 %v10466_v33  ;;  %9485 = vmatprep.subr.bf16.mxu0 %v10469_v36  ;;  %v10509_v33 = vld [vmem:[%s12773_s0 + $0x88] sm:$0xff]  }
  0x86   :  { %9537 = vmatprep.subr.bf16.mxu1 %v10472_v37 }
  0x88   :  { %9486 = vmatpush3.bf16.msra.mxu0 %v10469_v36  ;;  %v10514_v36 = vld [vmem:[%s12773_s0 + $0x90] sm:$0xff]  }
  0x89   :  { %9538 = vmatpush3.bf16.msra.mxu1 %v10472_v37  ;;  %9575 = vmatprep.subr.bf16.mxu0 %v10477_v40  ;;  %v10515_v37 = vld [vmem:[%s12773_s0 + $0x98] sm:$0xff]  }
  0x8a   :  { %9400 = vmatmul.mubr.bf16.gmra.mxu0 %v10447_v38  ;;  %9627 = vmatprep.subr.bf16.mxu1 %v10478_v41 }
  0x8b   :  { %9452 = vmatmul.mubr.bf16.gmra.mxu1 %v10448_v39  ;;  %9403 = vmatprep.mubr.bf16.mxu0 %v10451_v42 }
  0x8c   :  { %9455 = vmatprep.mubr.bf16.mxu1 %v10452_v43 }
  0x92   :  { %9404 = vmatmul.mubr.bf16.gmra.mxu0 %v10453_v44 }
  0x93   :  { %9456 = vmatmul.mubr.bf16.gmra.mxu1 %v10454_v45  ;;  %9407 = vmatprep.mubr.bf16.mxu0 %v10456_v46  ;;  %v10516_v45 = vld [vmem:[%s12773_s0 + $0x98] sm:$0xff]  }
  0x94   :  { %9459 = vmatprep.mubr.bf16.mxu1 %v10457_v47  ;;  %v10517_v47 = vld [vmem:[%s12773_s0 + $0xa0] sm:$0xff]  }
  0x9a   :  { %9408 = vmatmul.mubr.bf16.gmra.mxu0 %v10459_v48  ;;  %v10519_v48 = vld [vmem:[%s12773_s0 + $0xa0] sm:$0xff]  }
  0x9b   :  { %9460 = vmatmul.mubr.bf16.gmra.mxu1 %v10460_v49  ;;  %9411 = vmatprep.mubr.bf16.mxu0 %v10462_v50 }
  0x9c   :  { %9463 = vmatprep.mubr.bf16.mxu1 %v10463_v51  ;;  %v10520_v51 = vld [vmem:[%s12773_s0 + $0xa8] sm:$0xff]  }
  0xa2   :  { %9412 = vmatmul.mubr.bf16.gmra.mxu0 %v10464_v52 }
  0xa3   :  { %9464 = vmatmul.mubr.bf16.gmra.mxu1 %v10465_v53  ;;  %9415 = vmatprep.mubr.bf16.mxu0 %v10467_v54 }
  0xa4   :  { %9467 = vmatprep.mubr.bf16.mxu1 %v10468_v55 }
  0xaa   :  { %9416 = vmatmul.mubr.bf16.gmra.mxu0 %v10470_v56 }
  0xab   :  { %9468 = vmatmul.mubr.bf16.gmra.mxu1 %v10471_v57  ;;  %9487 = vmatprep.mubr.bf16.mxu0 %v10473_v58 }
  0xac   :  { %9539 = vmatprep.mubr.bf16.mxu1 %v10474_v59 }
  0xb2   :  { %9488 = vmatmul.mubr.bf16.vlgmr.msra.gmra.mxu0 %v10475_v60 }
  0xb3   :  { %9540 = vmatmul.mubr.bf16.vlgmr.msra.gmra.mxu1 %v10476_v61  ;;  %9576 = vmatpush3.bf16.msra.mxu0 %v10477_v40  ;;  %v10522_v61 = vld [vmem:[%s12773_s0 + $0xa8] sm:$0xff]  }
  0xb4   :  { %9628 = vmatpush3.bf16.msra.mxu1 %v10478_v41  ;;  %9491 = vmatprep.mubr.bf16.mxu0 %v10479_v62 }
  0xb5   :  { %9543 = vmatprep.mubr.bf16.mxu1 %v10480_v63  ;;  %9577 = vmatprep.subr.bf16.mxu0 %v10483_v0  ;;  %v10523_v63 = vld [vmem:[%s12773_s0 + $0xb0] sm:$0xff]  }
  0xb6   :  { %9629 = vmatprep.subr.bf16.mxu1 %v10484_v1 }
  0xb7   :  { %9578 = vmatpush3.bf16.msra.mxu0 %v10483_v0  ;;  %v10525_v0 = vld [vmem:[%s12773_s0 + $0x30] sm:$0xff]  }
  0xb8   :  { %9630 = vmatpush3.bf16.msra.mxu1 %v10484_v1  ;;  %9579 = vmatprep.subr.bf16.mxu0 %v10489_v3 }
  0xb9   :  { %9631 = vmatprep.subr.bf16.mxu1 %v10490_v4 }
  0xba   :  { %9492 = vmatmul.mubr.bf16.gmra.mxu0 %v10481_v2 }
  0xbb   :  { %9544 = vmatmul.mubr.bf16.gmra.mxu1 %v10482_v5  ;;  %9495 = vmatprep.mubr.bf16.mxu0 %v10485_v6 }
  0xbc   :  { %9547 = vmatprep.mubr.bf16.mxu1 %v10486_v7  ;;  %9580 = vmatpush3.bf16.msra.mxu0 %v10489_v3  ;;  %v10526_v3 = vld [vmem:[%s12773_s0 + $0x38] sm:$0xff]  }
  0xbd   :  { %9632 = vmatpush3.bf16.msra.mxu1 %v10490_v4  ;;  %9581 = vmatprep.subr.bf16.mxu0 %v10495_v8 }
  0xbe   :  { %9633 = vmatprep.subr.bf16.mxu1 %v10496_v9 }
  0xc0   :  { %9582 = vmatpush3.bf16.msra.mxu0 %v10495_v8 }
  0xc1   :  { %9634 = vmatpush3.bf16.msra.mxu1 %v10496_v9  ;;  %9583 = vmatprep.subr.bf16.mxu0 %v10501_v12 }
  0xc2   :  { %9496 = vmatmul.mubr.bf16.gmra.mxu0 %v10487_v10  ;;  %9635 = vmatprep.subr.bf16.mxu1 %v10502_v13 }
  0xc3   :  { %9548 = vmatmul.mubr.bf16.gmra.mxu1 %v10488_v11  ;;  %9499 = vmatprep.mubr.bf16.mxu0 %v10491_v14 }
  0xc4   :  { %9551 = vmatprep.mubr.bf16.mxu1 %v10492_v15  ;;  %9584 = vmatpush3.bf16.msra.mxu0 %v10501_v12  ;;  %v10528_v15 = vld [vmem:[%s12773_s0 + $0x40] sm:$0xff]  }
  0xc5   :  { %9636 = vmatpush3.bf16.msra.mxu1 %v10502_v13  ;;  %9585 = vmatprep.subr.bf16.mxu0 %v10507_v16  ;;  %v10527_v13 = vld [vmem:[%s12773_s0 + $0x38] sm:$0xff]  }
  0xc6   :  { %9637 = vmatprep.subr.bf16.mxu1 %v10510_v17 }
  0xc8   :  { %9586 = vmatpush3.bf16.msra.mxu0 %v10507_v16  ;;  %v10529_v16 = vld [vmem:[%s12773_s0 + $0x40] sm:$0xff]  }
  0xc9   :  { %9638 = vmatpush3.bf16.msra.mxu1 %v10510_v17  ;;  %9587 = vmatprep.subr.bf16.mxu0 %v10513_v20 }
  0xca   :  { %9500 = vmatmul.mubr.bf16.gmra.mxu0 %v10493_v18  ;;  %9639 = vmatprep.subr.bf16.mxu1 %v10518_v21 }
  0xcb   :  { %9552 = vmatmul.mubr.bf16.gmra.mxu1 %v10494_v19  ;;  %9503 = vmatprep.mubr.bf16.mxu0 %v10497_v22  ;;  %v10530_v19 = vld [vmem:[%s12773_s0 + $0x48] sm:$0xff]  }
  0xcc   :  { %9555 = vmatprep.mubr.bf16.mxu1 %v10498_v23  ;;  %9588 = vmatpush3.bf16.msra.mxu0 %v10513_v20 }
  0xcd   :  { %9640 = vmatpush3.bf16.msra.mxu1 %v10518_v21  ;;  %9589 = vmatprep.subr.bf16.mxu0 %v10521_v24 }
  0xce   :  { %9641 = vmatprep.subr.bf16.mxu1 %v10524_v25 }
  0xd0   :  { %9590 = vmatpush3.bf16.msra.mxu0 %v10521_v24 }
  0xd1   :  { %9642 = vmatpush3.bf16.msra.mxu1 %v10524_v25 }
  0xd2   :  { %9504 = vmatmul.mubr.bf16.gmra.mxu0 %v10499_v26 }
  0xd3   :  { %9556 = vmatmul.mubr.bf16.gmra.mxu1 %v10500_v27  ;;  %9507 = vmatprep.mubr.bf16.mxu0 %v10503_v28 }
  0xd4   :  { %9559 = vmatprep.mubr.bf16.mxu1 %v10504_v29  ;;  %v10531_v29 = vld [vmem:[%s12773_s0 + $0x48] sm:$0xff]  }
  0xda   :  { %9508 = vmatmul.mubr.bf16.gmra.mxu0 %v10505_v30 }
  0xdb   :  { %9560 = vmatmul.mubr.bf16.gmra.mxu1 %v10506_v31  ;;  %9511 = vmatprep.mubr.bf16.mxu0 %v10508_v32  ;;  %v10532_v31 = vld [vmem:[%s12773_s0 + $0x50] sm:$0xff]  }
  0xdc   :  { %9563 = vmatprep.mubr.bf16.mxu1 %v10509_v33  ;;  %v10533_v32 = vld [vmem:[%s12773_s0 + $0x50] sm:$0xff]  }
  0xe2   :  { %v9281_v38 = vpop.f32.mrf.mxu0  ;;  %9512 = vmatmul.mubr.bf16.gmra.mxu0 %v10511_v34 }
  0xe3   :  { %v9333_v39 = vpop.f32.mrf.mxu1  ;;  %9564 = vmatmul.mubr.bf16.gmra.mxu1 %v10512_v35  ;;  %9515 = vmatprep.mubr.bf16.mxu0 %v10514_v36  ;;  %v10535_v35 = vld [vmem:[%s12773_s0 + $0x58] sm:$0xff]  }
  0xe4   :  { %v11349_v40 = vadd.f32 %v9333_v39, %v9281_v38  ;;  %v323_v41 = vpop.f32.mrf.mxu0  ;;  %9567 = vmatprep.mubr.bf16.mxu1 %v10515_v37 }
  0xe5   :  { %v656_v42 = vpop.f32.mrf.mxu1 }
  0xe6   :  { %v11351_v43 = vadd.f32 %v656_v42, %v323_v41  ;;  %v9282_v44 = vpop.f32.mrf.mxu0 }
  0xe7   :  { %v9334_v46 = vpop.f32.mrf.mxu1 }
  0xe8   :  { %v11362_v49 = vadd.f32 %v9334_v46, %v9282_v44  ;;  %v326_v50 = vpop.f32.mrf.mxu0 }
  0xe9   :  { %v659_v52 = vpop.f32.mrf.mxu1 }
  0xea   :  { %v11367_v53 = vadd.f32 %v659_v52, %v326_v50  ;;  %v9285_v54 = vpop.f32.mrf.mxu0  ;;  %9516 = vmatmul.mubr.bf16.gmra.mxu0 %v10516_v45  ;;  %v10536_v50 = vld [vmem:[%s12773_s0 + $0x60] sm:$0xff]  }
  0xeb   :  { %v9337_v55 = vpop.f32.mrf.mxu1  ;;  %9568 = vmatmul.mubr.bf16.gmra.mxu1 %v10517_v47  ;;  %9519 = vmatprep.mubr.bf16.mxu0 %v10519_v48  ;;  %v10534_v47 = vld [vmem:[%s12773_s0 + $0x58] sm:$0xff]  }
  0xec   :  { %v11369_v56 = vadd.f32 %v9337_v55, %v9285_v54  ;;  %v339_v57 = vpop.f32.mrf.mxu0  ;;  %9571 = vmatprep.mubr.bf16.mxu1 %v10520_v51  ;;  %v10537_v51 = vld [vmem:[%s12773_s0 + $0x60] sm:$0xff]   ;;  %v10539_v55 = vld [vmem:[%s12773_s0 + $0x68] sm:$0xff]  }
  0xed   :  { %v672_v58 = vpop.f32.mrf.mxu1 }
  0xee   :  { %v11371_v59 = vadd.f32 %v672_v58, %v339_v57  ;;  %v9286_v60 = vpop.f32.mrf.mxu0 }
  0xef   :  { %v9338_v62 = vpop.f32.mrf.mxu1 }
  0xf0   :  { %v11382_v1 = vadd.f32 %v9338_v62, %v9286_v60  ;;  %v342_v2 = vpop.f32.mrf.mxu0 }
  0xf1   :  { %v675_v4 = vpop.f32.mrf.mxu1 }
  0xf2   :  { %v11387_v5 = vadd.f32 %v675_v4, %v342_v2  ;;  %v9289_v6 = vpop.f32.mrf.mxu0  ;;  %9520 = vmatmul.mubr.bf16.gmra.mxu0 %v10522_v61  ;;  %v10538_v4 = vld [vmem:[%s12773_s0 + $0x68] sm:$0xff]  }
  0xf3   :  { %v9341_v7 = vpop.f32.mrf.mxu1  ;;  %9572 = vmatmul.mubr.bf16.gmra.mxu1 %v10523_v63  ;;  %9591 = vmatprep.mubr.bf16.mxu0 %v10525_v0 }
  0xf4   :  { %v11389_v8 = vadd.f32 %v9341_v7, %v9289_v6  ;;  %v355_v9 = vpop.f32.mrf.mxu0  ;;  %9643 = vmatprep.mubr.bf16.mxu1 %v10526_v3  ;;  %v10540_v7 = vld [vmem:[%s12773_s0 + $0x70] sm:$0xff]  }
  0xf5   :  { %v688_v10 = vpop.f32.mrf.mxu1 }
  0xf6   :  { %v11391_v11 = vadd.f32 %v688_v10, %v355_v9  ;;  %v9290_v12 = vpop.f32.mrf.mxu0  ;;  %v10541_v9 = vld [vmem:[%s12773_s0 + $0x70] sm:$0xff]  }
  0xf7   :  { %v9342_v14 = vpop.f32.mrf.mxu1 }
  0xf8   :  { %v11402_v17 = vadd.f32 %v9342_v14, %v9290_v12  ;;  %v358_v18 = vpop.f32.mrf.mxu0  ;;  %v12780_v14 = vmov 0.0  }
  0xf9   :  { %v691_v20 = vpop.f32.mrf.mxu1  ;;  %9679 = vmatprep.subr.bf16.mxu0 %v12780_v14  ;;  %9739 = vmatprep.subr.bf16.mxu1 %v12780_v14 }
  0xfa   :  { %v11407_v21 = vadd.f32 %v691_v20, %v358_v18  ;;  %v9293_v22 = vpop.f32.mrf.mxu0  ;;  %9592 = vmatmul.mubr.bf16.vlgmr.msra.gmra.mxu0 %v10527_v13  ;;  %v10543_v13 = vld [vmem:[%s12773_s0 + $0x78] sm:$0xff]  }
  0xfb   :  { %v9345_v23 = vpop.f32.mrf.mxu1  ;;  %9644 = vmatmul.mubr.bf16.vlgmr.msra.gmra.mxu1 %v10528_v15  ;;  %9595 = vmatprep.mubr.bf16.mxu0 %v10529_v16 }
  0xfc   :  { %v11409_v24 = vadd.f32 %v9345_v23, %v9293_v22  ;;  %v371_v25 = vpop.f32.mrf.mxu0  ;;  %9647 = vmatprep.mubr.bf16.mxu1 %v10530_v19  ;;  %v10561_v19 = vld [vmem:[%s12774_s3 + $0x78] sm:$0xff]  }
  0xfd   :  { %v704_v26 = vpop.f32.mrf.mxu1  ;;  %v10562_v22 = vld [vmem:[%s12774_s3 + $0x38] sm:$0xff]   ;;  %9680 = vmatpush3.bf16.msra.mxu0 %v10561_v19 }
  0xfe   :  { %v11411_v27 = vadd.f32 %v704_v26, %v371_v25  ;;  %v9294_v28 = vpop.f32.mrf.mxu0  ;;  %v10542_v26 = vld [vmem:[%s12773_s0 + $0x78] sm:$0xff]   ;;  %9740 = vmatpush3.bf16.msra.mxu1 %v10562_v22  ;;  %9681 = vmatprep.subr.bf16.mxu0 %v12780_v14 }
  0xff   :  { %v9346_v30 = vpop.f32.mrf.mxu1  ;;  %9741 = vmatprep.subr.bf16.mxu1 %v12780_v14 }
 0x100   :  { %v11422_v33 = vadd.f32 %v9346_v30, %v9294_v28  ;;  %v374_v34 = vpop.f32.mrf.mxu0  ;;  %v10545_v30 = vld [vmem:[%s12773_s0 + $0x80] sm:$0xff]  }
 0x101   :  { %v707_v36 = vpop.f32.mrf.mxu1 }
 0x102   :  { %v11427_v37 = vadd.f32 %v707_v36, %v374_v34  ;;  %v9297_v38 = vpop.f32.mrf.mxu0  ;;  %9596 = vmatmul.mubr.bf16.gmra.mxu0 %v10531_v29  ;;  %v10544_v29 = vld [vmem:[%s12773_s0 + $0x80] sm:$0xff]   ;;  %v10547_v34 = vld [vmem:[%s12773_s0 + $0x88] sm:$0xff]  }
 0x103   :  { %v9349_v39 = vpop.f32.mrf.mxu1  ;;  %9648 = vmatmul.mubr.bf16.gmra.mxu1 %v10532_v31  ;;  %9599 = vmatprep.mubr.bf16.mxu0 %v10533_v32 }
 0x104   :  { %v11429_v41 = vadd.f32 %v9349_v39, %v9297_v38  ;;  %v387_v42 = vpop.f32.mrf.mxu0  ;;  %9651 = vmatprep.mubr.bf16.mxu1 %v10535_v35 }
 0x105   :  { %v720_v44 = vpop.f32.mrf.mxu1 }
 0x106   :  { %v11431_v45 = vadd.f32 %v720_v44, %v387_v42  ;;  %v9298_v46 = vpop.f32.mrf.mxu0  ;;  %v10563_v42 = vld [vmem:[%s12774_s3 + $0x70] sm:$0xff]  }
 0x107   :  { %v9350_v48 = vpop.f32.mrf.mxu1  ;;  %9682 = vmatpush3.bf16.msra.mxu0 %v10563_v42 }
 0x108   :  { %v11442_v52 = vadd.f32 %v9350_v48, %v9298_v46  ;;  %v390_v54 = vpop.f32.mrf.mxu0  ;;  %v10564_v48 = vld [vmem:[%s12774_s3 + $0x30] sm:$0xff]   ;;  %9683 = vmatprep.subr.bf16.mxu0 %v12780_v14 }
 0x109   :  { %v723_v57 = vpop.f32.mrf.mxu1  ;;  %9742 = vmatpush3.bf16.msra.mxu1 %v10564_v48  ;;  %v10567_v48 = vld [vmem:[%s12774_s3 + $0x60] sm:$0xff]  }
 0x10a   :  { %v11447_v58 = vadd.f32 %v723_v57, %v390_v54  ;;  %v9301_v60 = vpop.f32.mrf.mxu0  ;;  %9600 = vmatmul.mubr.bf16.gmra.mxu0 %v10534_v47  ;;  %v10546_v54 = vld [vmem:[%s12773_s0 + $0x88] sm:$0xff]   ;;  %v10548_v57 = vld [vmem:[%s12773_s0 + $0x90] sm:$0xff]   ;;  %9743 = vmatprep.subr.bf16.mxu1 %v12780_v14 }
 0x10b   :  { %v9353_v61 = vpop.f32.mrf.mxu1  ;;  %9652 = vmatmul.mubr.bf16.gmra.mxu1 %v10536_v50  ;;  %9603 = vmatprep.mubr.bf16.mxu0 %v10537_v51 }
 0x10c   :  { %v11449_v62 = vadd.f32 %v9353_v61, %v9301_v60  ;;  %v403_v63 = vpop.f32.mrf.mxu0  ;;  %9655 = vmatprep.mubr.bf16.mxu1 %v10539_v55  ;;  %v10549_v60 = vld [vmem:[%s12773_s0 + $0x90] sm:$0xff]  }
 0x10d   :  { %v736_v0 = vpop.f32.mrf.mxu1 }
 0x10e   :  { %v11451_v2 = vadd.f32 %v736_v0, %v403_v63  ;;  %v9302_v3 = vpop.f32.mrf.mxu0  ;;  %v10551_v0 = vld [vmem:[%s12773_s0 + $0x98] sm:$0xff]  }
 0x10f   :  { %v9354_v6 = vpop.f32.mrf.mxu1 }
 0x110   :  { %v11462_v10 = vadd.f32 %v9354_v6, %v9302_v3  ;;  %v406_v12 = vpop.f32.mrf.mxu0 }
 0x111   :  { %v739_v15 = vpop.f32.mrf.mxu1 }
 0x112   :  { %v11469_v16 = vadd.f32 %v739_v15, %v406_v12  ;;  %v9305_v18 = vpop.f32.mrf.mxu0  ;;  %9604 = vmatmul.mubr.bf16.gmra.mxu0 %v10538_v4  ;;  %v10565_v15 = vld [vmem:[%s12774_s3 + $0x68] sm:$0xff]  }
 0x113   :  { %v9357_v20 = vpop.f32.mrf.mxu1  ;;  %9656 = vmatmul.mubr.bf16.gmra.mxu1 %v10540_v7  ;;  %9607 = vmatprep.mubr.bf16.mxu0 %v10541_v9 }
 0x114   :  { %12782 = vst [vmem:[#allocation4_spill] sm:$0xff] %v11469_v16  ;;  %v11477_v23 = vadd.f32 %v9357_v20, %v9305_v18  ;;  %v419_v25 = vpop.f32.mrf.mxu0  ;;  %9659 = vmatprep.mubr.bf16.mxu1 %v10543_v13  ;;  %v10550_v20 = vld [vmem:[%s12773_s0 + $0x98] sm:$0xff]   ;;  %9684 = vmatpush3.bf16.msra.mxu0 %v10565_v15 }
 0x115   :  { %v752_v28 = vpop.f32.mrf.mxu1  ;;  %9685 = vmatprep.subr.bf16.mxu0 %v12780_v14 }
 0x116   :  { %v11489_v31 = vadd.f32 %v752_v28, %v419_v25  ;;  %v9306_v32 = vpop.f32.mrf.mxu0  ;;  %v10552_v25 = vld [vmem:[%s12773_s0 + $0xa0] sm:$0xff]   ;;  %v10566_v28 = vld [vmem:[%s12774_s3 + $0x28] sm:$0xff]  }
 0x117   :  { %v9358_v35 = vpop.f32.mrf.mxu1  ;;  %9744 = vmatpush3.bf16.msra.mxu1 %v10566_v28 }
 0x118   :  { %v11495_v36 = vadd.f32 %v9358_v35, %v9306_v32  ;;  %v422_v38 = vpop.f32.mrf.mxu0  ;;  %v10555_v32 = vld [vmem:[%s12773_s0 + $0xa8] sm:$0xff]   ;;  %9745 = vmatprep.subr.bf16.mxu1 %v12780_v14  ;;  %9686 = vmatpush3.bf16.msra.mxu0 %v10567_v48 }
 0x119   :  { %v755_v39 = vpop.f32.mrf.mxu1  ;;  %9687 = vmatprep.subr.bf16.mxu0 %v12780_v14 }
 0x11a   :  { %v11500_v44 = vadd.f32 %v755_v39, %v422_v38  ;;  %v9309_v46 = vpop.f32.mrf.mxu0  ;;  %9608 = vmatmul.mubr.bf16.gmra.mxu0 %v10542_v26  ;;  %v10553_v26 = vld [vmem:[%s12773_s0 + $0xa0] sm:$0xff]  }
 0x11b   :  { %v9361_v47 = vpop.f32.mrf.mxu1  ;;  %9660 = vmatmul.mubr.bf16.gmra.mxu1 %v10544_v29  ;;  %9611 = vmatprep.mubr.bf16.mxu0 %v10545_v30 }
 0x11c   :  { %12783 = vst [vmem:[#allocation5_spill] sm:$0xff] %v11500_v44  ;;  %v11505_v50 = vadd.f32 %v9361_v47, %v9309_v46  ;;  %v435_v51 = vpop.f32.mrf.mxu0  ;;  %9663 = vmatprep.mubr.bf16.mxu1 %v10547_v34 }
 0x11d   :  { %v768_v55 = vpop.f32.mrf.mxu1 }
 0x11e   :  { %v11517_v61 = vadd.f32 %v768_v55, %v435_v51  ;;  %v9310_v63 = vpop.f32.mrf.mxu0 }
 0x11f   :  { %v9362_v3 = vpop.f32.mrf.mxu1 }
 0x120   :  { %v11523_v4 = vadd.f32 %v9362_v3, %v9310_v63  ;;  %v438_v6 = vpop.f32.mrf.mxu0  ;;  %v10557_v63 = vld [vmem:[%s12773_s0 + $0xb0] sm:$0xff]  }
 0x121   :  { %v771_v7 = vpop.f32.mrf.mxu1 }
 0x122   :  { %v11525_v9 = vadd.f32 %v771_v7, %v438_v6  ;;  %v9313_v12 = vpop.f32.mrf.mxu0  ;;  %9612 = vmatmul.mubr.bf16.gmra.mxu0 %v10546_v54  ;;  %v10554_v54 = vld [vmem:[%s12773_s0 + $0xa8] sm:$0xff]   ;;  %v10559_v6 = vld [vmem:[%s12773_s0 + $0xb8] sm:$0xff]  }
 0x123   :  { %v9365_v13 = vpop.f32.mrf.mxu1  ;;  %9664 = vmatmul.mubr.bf16.gmra.mxu1 %v10548_v57  ;;  %9615 = vmatprep.mubr.bf16.mxu0 %v10549_v60 }
 0x124   :  { %12784 = vst [vmem:[#allocation6_spill] sm:$0xff] %v11525_v9  ;;  %v11530_v18 = vadd.f32 %v9365_v13, %v9313_v12  ;;  %v451_v19 = vpop.f32.mrf.mxu0  ;;  %9667 = vmatprep.mubr.bf16.mxu1 %v10551_v0  ;;  %v10568_v0 = vld [vmem:[%s12774_s3 + $0x20] sm:$0xff]  }
 0x125   :  { %v784_v22 = vpop.f32.mrf.mxu1  ;;  %9746 = vmatpush3.bf16.msra.mxu1 %v10568_v0 }
 0x126   :  { %v11544_v29 = vadd.f32 %v784_v22, %v451_v19  ;;  %v9314_v30 = vpop.f32.mrf.mxu0  ;;  %9747 = vmatprep.subr.bf16.mxu1 %v12780_v14 }
 0x127   :  { %v9366_v34 = vpop.f32.mrf.mxu1 }
 0x128   :  { %v11550_v35 = vadd.f32 %v9366_v34, %v9314_v30  ;;  %v11552_v38 = vpop.f32.mrf.mxu0  ;;  %v10560_v34 = vld [vmem:[%s12773_s0 + $0xc0] sm:$0xff]  }
 0x129   :  { %12785 = vst [vmem:[#allocation7_spill] sm:$0xff] %v11552_v38  ;;  %v11555_v39 = vpop.f32.mrf.mxu1 }
 0x12a   :  { %12786 = vst [vmem:[#allocation8_spill] sm:$0xff] %v11555_v39  ;;  %v9385_v42 = vpop.f32.mrf.mxu0  ;;  %9616 = vmatmul.mubr.bf16.gmra.mxu0 %v10550_v20 }
 0x12b   :  { %v1188_v46 = vadd.f32 %v9385_v42, %v11349_v40  ;;  %v9437_v47 = vpop.f32.mrf.mxu1  ;;  %9668 = vmatmul.mubr.bf16.gmra.mxu1 %v10552_v25  ;;  %9619 = vmatprep.mubr.bf16.mxu0 %v10553_v26  ;;  %v10556_v40 = vld [vmem:[%s12773_s0 + $0xb0] sm:$0xff]  }
 0x12c   :  { %v1043_v51 = vpop.f32.mrf.mxu0  ;;  %9671 = vmatprep.mubr.bf16.mxu1 %v10555_v32 }
 0x12d   :  { %v11564_v55 = vadd.f32 %v9437_v47, %v1188_v46  ;;  %v1186_v57 = vadd.f32 %v1043_v51, %v11351_v43  ;;  %v1466_v60 = vpop.f32.mrf.mxu1 }
 0x12e   :  { %v9386_v3 = vpop.f32.mrf.mxu0 }
 0x12f   :  { %v11580_v43 = vadd.f32 %v1466_v60, %v1186_v57  ;;  %v1189_v7 = vadd.f32 %v9386_v3, %v11362_v49  ;;  %v9438_v12 = vpop.f32.mrf.mxu1  ;;  %v10558_v49 = vld [vmem:[%s12773_s0 + $0xb8] sm:$0xff]  }
 0x130   :  { %v11583_v13 = vpop.f32.mrf.mxu0 }
 0x131   :  { %v11586_v15 = vadd.f32 %v9438_v12, %v1189_v7  ;;  %v11588_v19 = vpop.f32.mrf.mxu1 }
 0x132   :  { %v9389_v20 = vpop.f32.mrf.mxu0  ;;  %9620 = vmatmul.mubr.bf16.gmra.mxu0 %v10554_v54 }
 0x133   :  { %v1192_v22 = vadd.f32 %v9389_v20, %v11369_v56  ;;  %v9441_v25 = vpop.f32.mrf.mxu1  ;;  %9672 = vmatmul.mubr.bf16.gmra.mxu1 %v10556_v40  ;;  %9623 = vmatprep.mubr.bf16.mxu0 %v10557_v63  ;;  %v10569_v56 = vld [vmem:[%s12774_s3 + $0x58] sm:$0xff]  }
 0x134   :  { %v1059_v26 = vpop.f32.mrf.mxu0  ;;  %9675 = vmatprep.mubr.bf16.mxu1 %v10559_v6  ;;  %9688 = vmatpush3.bf16.msra.mxu0 %v10569_v56 }
 0x135   :  { %v11594_v28 = vadd.f32 %v9441_v25, %v1192_v22  ;;  %v1190_v30 = vadd.f32 %v1059_v26, %v11371_v59  ;;  %v1482_v32 = vpop.f32.mrf.mxu1  ;;  %v10570_v59 = vld [vmem:[%s12774_s3 + $0x18] sm:$0xff]   ;;  %9689 = vmatprep.subr.bf16.mxu0 %v12780_v14 }
 0x136   :  { %v9390_v42 = vpop.f32.mrf.mxu0  ;;  %9748 = vmatpush3.bf16.msra.mxu1 %v10570_v59 }
 0x137   :  { %v11603_v46 = vadd.f32 %v1482_v32, %v1190_v30  ;;  %v1193_v47 = vadd.f32 %v9390_v42, %v11382_v1  ;;  %v9442_v48 = vpop.f32.mrf.mxu1  ;;  %9749 = vmatprep.subr.bf16.mxu1 %v12780_v14 }
 0x138   :  { %v11609_v51 = vpop.f32.mrf.mxu0 }
 0x139   :  { %v11612_v54 = vadd.f32 %v9442_v48, %v1193_v47  ;;  %v11614_v57 = vpop.f32.mrf.mxu1 }
 0x13a   :  { %v9393_v60 = vpop.f32.mrf.mxu0  ;;  %9624 = vmatmul.mubr.bf16.gmra.mxu0 %v10558_v49 }
 0x13b   :  { %v1196_v1 = vadd.f32 %v9393_v60, %v11389_v8  ;;  %v9445_v40 = vpop.f32.mrf.mxu1  ;;  %9676 = vmatmul.mubr.bf16.gmra.mxu1 %v10560_v34  ;;  %v10571_v8 = vld [vmem:[%s12774_s3 + $0x50] sm:$0xff]   ;;  %9695 = vmatprep.mubr.msk.bf16.mxu0 %vm10810_vm0, %v12780_v14 }
 0x13c   :  { %v1075_v63 = vpop.f32.mrf.mxu0  ;;  %9690 = vmatpush3.bf16.msra.mxu0 %v10571_v8  ;;  %9755 = vmatprep.mubr.msk.bf16.mxu1 %vm10810_vm0, %v12780_v14 }
 0x13d   :  { %v11618_v0 = vadd.f32 %v9445_v40, %v1196_v1  ;;  %v1194_v3 = vadd.f32 %v1075_v63, %v11391_v11  ;;  %v1498_v6 = vpop.f32.mrf.mxu1  ;;  %9691 = vmatprep.subr.bf16.mxu0 %v12780_v14 }
 0x13e   :  { %v9394_v7 = vpop.f32.mrf.mxu0 }
 0x13f   :  { %v11621_v12 = vadd.f32 %v1498_v6, %v1194_v3  ;;  %v1197_v20 = vadd.f32 %v9394_v7, %v11402_v17  ;;  %v9446_v22 = vpop.f32.mrf.mxu1  ;;  %v10572_v17 = vld [vmem:[%s12774_s3 + $0x10] sm:$0xff]  }
 0x140   :  { %v11624_v25 = vpop.f32.mrf.mxu0  ;;  %9750 = vmatpush3.bf16.msra.mxu1 %v10572_v17 }
 0x141   :  { %v11626_v26 = vadd.f32 %v9446_v22, %v1197_v20  ;;  %v11628_v49 = vpop.f32.mrf.mxu1  ;;  %9751 = vmatprep.subr.bf16.mxu1 %v12780_v14 }
 0x142   :  { %v9397_v30 = vpop.f32.mrf.mxu0 }
 0x143   :  { %v1200_v11 = vadd.f32 %v9397_v30, %v11409_v24  ;;  %v9449_v32 = vpop.f32.mrf.mxu1 }
 0x144   :  { %v1091_v34 = vpop.f32.mrf.mxu0 }
 0x145   :  { %v11638_v56 = vadd.f32 %v9449_v32, %v1200_v11  ;;  %v1198_v42 = vadd.f32 %v1091_v34, %v11411_v27  ;;  %v1514_v47 = vpop.f32.mrf.mxu1  ;;  %v10573_v27 = vld [vmem:[%s12774_s3 + $0x48] sm:$0xff]  }
 0x146   :  { %v9398_v48 = vpop.f32.mrf.mxu0  ;;  %9692 = vmatpush3.bf16.msra.mxu0 %v10573_v27 }
 0x147   :  { %v11642_v59 = vadd.f32 %v1514_v47, %v1198_v42  ;;  %v1201_v24 = vadd.f32 %v9398_v48, %v11422_v33  ;;  %v9450_v60 = vpop.f32.mrf.mxu1  ;;  %v10574_v33 = vld [vmem:[%s12774_s3 + $0x8] sm:$0xff]   ;;  %9693 = vmatprep.subr.bf16.mxu0 %v12780_v14 }
 0x148   :  { %v11645_v1 = vpop.f32.mrf.mxu0  ;;  %9752 = vmatpush3.bf16.msra.mxu1 %v10574_v33 }
 0x149   :  { %v11647_v40 = vadd.f32 %v9450_v60, %v1201_v24  ;;  %v11649_v63 = vpop.f32.mrf.mxu1  ;;  %9753 = vmatprep.subr.bf16.mxu1 %v12780_v14 }
 0x14a   :  { %v9401_v3 = vpop.f32.mrf.mxu0 }
 0x14b   :  { %v1204_v6 = vadd.f32 %v9401_v3, %v11429_v41  ;;  %v9453_v7 = vpop.f32.mrf.mxu1  ;;  %v10575_v41 = vld [vmem:[%s12774_s3 + $0x40] sm:$0xff]  }
 0x14c   :  { %v1107_v20 = vpop.f32.mrf.mxu0  ;;  %9694 = vmatpush3.bf16.msra.mxu0 %v10575_v41 }
 0x14d   :  { %v11658_v22 = vadd.f32 %v9453_v7, %v1204_v6  ;;  %v1202_v8 = vadd.f32 %v1107_v20, %v11431_v45  ;;  %v1530_v30 = vpop.f32.mrf.mxu1  ;;  %v10576_v45 = vld [vmem:[%s12774_s3] sm:$0xff]   ;;  %9799 = vmatprep.subr.bf16.mxu0 %v12780_v14 }
 0x14e   :  { %v9402_v11 = vpop.f32.mrf.mxu0  ;;  %9754 = vmatpush3.bf16.msra.mxu1 %v10576_v45 }
 0x14f   :  { %v11665_v32 = vadd.f32 %v1530_v30, %v1202_v8  ;;  %v1205_v17 = vadd.f32 %v9402_v11, %v11442_v52  ;;  %v9454_v34 = vpop.f32.mrf.mxu1  ;;  %9859 = vmatprep.subr.bf16.mxu1 %v12780_v14 }
 0x150   :  { %v11669_v42 = vpop.f32.mrf.mxu0 }
 0x151   :  { %v11674_v47 = vadd.f32 %v9454_v34, %v1205_v17  ;;  %v11676_v48 = vpop.f32.mrf.mxu1 }
 0x152   :  { %v9405_v24 = vpop.f32.mrf.mxu0 }
 0x153   :  { %v1208_v52 = vadd.f32 %v9405_v24, %v11449_v62  ;;  %v9457_v60 = vpop.f32.mrf.mxu1 }
 0x154   :  { %v1123_v3 = vpop.f32.mrf.mxu0 }
 0x155   :  { %v11685_v27 = vadd.f32 %v9457_v60, %v1208_v52  ;;  %v1206_v6 = vadd.f32 %v1123_v3, %v11451_v2  ;;  %v1546_v7 = vpop.f32.mrf.mxu1 }
 0x156   :  { %v9406_v20 = vpop.f32.mrf.mxu0 }
 0x157   :  { %v11688_v33 = vadd.f32 %v1546_v7, %v1206_v6  ;;  %v1209_v8 = vadd.f32 %v9406_v20, %v11462_v10  ;;  %v9458_v30 = vpop.f32.mrf.mxu1 }
 0x158   :  { %v11691_v11 = vpop.f32.mrf.mxu0 }
 0x159   :  { %12787 = vst [vmem:[#allocation9_spill] sm:$0xff] %v11691_v11  ;;  %v11693_v62 = vadd.f32 %v9458_v30, %v1209_v8  ;;  %v11695_v41 = vpop.f32.mrf.mxu1 }
 0x15a   :  { %12788 = vst [vmem:[#allocation10_spill] sm:$0xff] %v11695_v41  ;;  %v9409_v17 = vpop.f32.mrf.mxu0 }
 0x15b   :  { %v1212_v34 = vadd.f32 %v9409_v17, %v11477_v23  ;;  %v9461_v45 = vpop.f32.mrf.mxu1 }
 0x15c   :  { %v1139_v24 = vpop.f32.mrf.mxu0 }
 0x15d   :  { %v11698_v52 = vadd.f32 %v9461_v45, %v1212_v34  ;;  %v1210_v2 = vadd.f32 %v1139_v24, %v11489_v31  ;;  %v1562_v60 = vpop.f32.mrf.mxu1 }
 0x15e   :  { %v9410_v3 = vpop.f32.mrf.mxu0 }
 0x15f   :  { %v11701_v6 = vadd.f32 %v1562_v60, %v1210_v2  ;;  %v1213_v10 = vadd.f32 %v9410_v3, %v11495_v36  ;;  %v9462_v7 = vpop.f32.mrf.mxu1 }
 0x160   :  { %v11704_v20 = vpop.f32.mrf.mxu0 }
 0x161   :  { %12789 = vst [vmem:[#allocation11_spill] sm:$0xff] %v11704_v20  ;;  %v11706_v8 = vadd.f32 %v9462_v7, %v1213_v10  ;;  %v11708_v30 = vpop.f32.mrf.mxu1 }
 0x162   :  { %12790 = vst [vmem:[#allocation12_spill] sm:$0xff] %v11708_v30  ;;  %v9413_v23 = vpop.f32.mrf.mxu0 }
 0x163   :  { %v1216_v17 = vadd.f32 %v9413_v23, %v11505_v50  ;;  %v9465_v34 = vpop.f32.mrf.mxu1 }
 0x164   :  { %v1155_v45 = vpop.f32.mrf.mxu0 }
 0x165   :  { %v11711_v14 = vadd.f32 %v9465_v34, %v1216_v17  ;;  %v1214_v31 = vadd.f32 %v1155_v45, %v11517_v61  ;;  %v1578_v24 = vpop.f32.mrf.mxu1 }
 0x166   :  { %v9414_v2 = vpop.f32.mrf.mxu0 }
 0x167   :  { %v11714_v60 = vadd.f32 %v1578_v24, %v1214_v31  ;;  %v1217_v36 = vadd.f32 %v9414_v2, %v11523_v4  ;;  %v9466_v3 = vpop.f32.mrf.mxu1 }
 0x168   :  { %v11717_v10 = vpop.f32.mrf.mxu0 }
 0x169   :  { %12791 = vst [vmem:[#allocation13_spill] sm:$0xff] %v11717_v10  ;;  %v11719_v7 = vadd.f32 %v9466_v3, %v1217_v36  ;;  %v11721_v39 = vpop.f32.mrf.mxu1 }
 0x16a   :  { %12792 = vst [vmem:[#allocation14_spill] sm:$0xff] %v11721_v39  ;;  %v9417_v50 = vpop.f32.mrf.mxu0 }
 0x16b   :  { %v1220_v23 = vadd.f32 %v9417_v50, %v11530_v18  ;;  %v9469_v17 = vpop.f32.mrf.mxu1 }
 0x16c   :  { %v1171_v34 = vpop.f32.mrf.mxu0 }
 0x16d   :  { %v11724_v38 = vadd.f32 %v9469_v17, %v1220_v23  ;;  %v1218_v61 = vadd.f32 %v1171_v34, %v11544_v29  ;;  %v1594_v45 = vpop.f32.mrf.mxu1 }
 0x16e   :  { %v9418_v31 = vpop.f32.mrf.mxu0 }
 0x16f   :  { %v11727_v24 = vadd.f32 %v1594_v45, %v1218_v61  ;;  %v1221_v4 = vadd.f32 %v9418_v31, %v11550_v35  ;;  %v9470_v2 = vpop.f32.mrf.mxu1 }
 0x170   :  { %v11730_v36 = vpop.f32.mrf.mxu0 }
 0x171   :  { %12793 = vst [vmem:[#allocation15_spill] sm:$0xff] %v11730_v36  ;;  %v11732_v3 = vadd.f32 %v9470_v2, %v1221_v4  ;;  %v11734_v39 = vpop.f32.mrf.mxu1 }
 0x172   :  { %12794 = vst [vmem:[#allocation16_spill] sm:$0xff] %v11734_v39  ;;  %v9489_v18 = vpop.f32.mrf.mxu0 }
 0x173   :  { %v2034_v50 = vadd.f32 %v9489_v18, %v11564_v55  ;;  %v9541_v23 = vpop.f32.mrf.mxu1 }
 0x174   :  { %v1889_v17 = vpop.f32.mrf.mxu0 }
 0x175   :  { %v11737_v10 = vadd.f32 %v9541_v23, %v2034_v50  ;;  %v2032_v29 = vadd.f32 %v1889_v17, %v11580_v43  ;;  %v2312_v34 = vpop.f32.mrf.mxu1 }
 0x176   :  { %v9490_v61 = vpop.f32.mrf.mxu0 }
 0x177   :  { %v11740_v45 = vadd.f32 %v2312_v34, %v2032_v29  ;;  %v2035_v35 = vadd.f32 %v9490_v61, %v11586_v15  ;;  %v9542_v31 = vpop.f32.mrf.mxu1 }
 0x178   :  { %v11743_v4 = vpop.f32.mrf.mxu0 }
 0x179   :  { %v11745_v2 = vadd.f32 %v9542_v31, %v2035_v35  ;;  %v11747_v39 = vpop.f32.mrf.mxu1 }
 0x17a   :  { %v9493_v55 = vpop.f32.mrf.mxu0 }
 0x17b   :  { %v2038_v18 = vadd.f32 %v9493_v55, %v11594_v28  ;;  %v9545_v50 = vpop.f32.mrf.mxu1 }
 0x17c   :  { %v1905_v23 = vpop.f32.mrf.mxu0 }
 0x17d   :  { %v11750_v36 = vadd.f32 %v9545_v50, %v2038_v18  ;;  %v2036_v43 = vadd.f32 %v1905_v23, %v11603_v46  ;;  %v2328_v17 = vpop.f32.mrf.mxu1 }
 0x17e   :  { %v9494_v29 = vpop.f32.mrf.mxu0 }
 0x17f   :  { %v11753_v34 = vadd.f32 %v2328_v17, %v2036_v43  ;;  %v2039_v15 = vadd.f32 %v9494_v29, %v11612_v54  ;;  %v9546_v61 = vpop.f32.mrf.mxu1 }
 0x180   :  { %v11756_v35 = vpop.f32.mrf.mxu0 }
 0x181   :  { %v11758_v31 = vadd.f32 %v9546_v61, %v2039_v15  ;;  %v11760_v9 = vpop.f32.mrf.mxu1 }
 0x182   :  { %v9497_v28 = vpop.f32.mrf.mxu0 }
 0x183   :  { %v2042_v55 = vadd.f32 %v9497_v28, %v11618_v0  ;;  %v9549_v18 = vpop.f32.mrf.mxu1 }
 0x184   :  { %v1921_v50 = vpop.f32.mrf.mxu0 }
 0x185   :  { %v11763_v30 = vadd.f32 %v9549_v18, %v2042_v55  ;;  %v2040_v46 = vadd.f32 %v1921_v50, %v11621_v12  ;;  %v2344_v23 = vpop.f32.mrf.mxu1 }
 0x186   :  { %v9498_v43 = vpop.f32.mrf.mxu0 }
 0x187   :  { %v11766_v17 = vadd.f32 %v2344_v23, %v2040_v46  ;;  %v2043_v54 = vadd.f32 %v9498_v43, %v11626_v26  ;;  %v9550_v29 = vpop.f32.mrf.mxu1 }
 0x188   :  { %v11769_v15 = vpop.f32.mrf.mxu0 }
 0x189   :  { %v11771_v61 = vadd.f32 %v9550_v29, %v2043_v54  ;;  %v11773_v20 = vpop.f32.mrf.mxu1 }
 0x18a   :  { %v9501_v0 = vpop.f32.mrf.mxu0 }
 0x18b   :  { %v2046_v28 = vadd.f32 %v9501_v0, %v11638_v56  ;;  %v9553_v55 = vpop.f32.mrf.mxu1 }
 0x18c   :  { %v1937_v18 = vpop.f32.mrf.mxu0 }
 0x18d   :  { %v11776_v44 = vadd.f32 %v9553_v55, %v2046_v28  ;;  %v2044_v12 = vadd.f32 %v1937_v18, %v11642_v59  ;;  %v2360_v50 = vpop.f32.mrf.mxu1 }
 0x18e   :  { %v9502_v46 = vpop.f32.mrf.mxu0 }
 0x18f   :  { %v11779_v23 = vadd.f32 %v2360_v50, %v2044_v12  ;;  %v2047_v26 = vadd.f32 %v9502_v46, %v11647_v40  ;;  %v9554_v43 = vpop.f32.mrf.mxu1 }
 0x190   :  { %v11782_v54 = vpop.f32.mrf.mxu0 }
 0x191   :  { %v11784_v29 = vadd.f32 %v9554_v43, %v2047_v26  ;;  %v11786_v41 = vpop.f32.mrf.mxu1 }
 0x192   :  { %v9505_v56 = vpop.f32.mrf.mxu0 }
 0x193   :  { %v2050_v0 = vadd.f32 %v9505_v56, %v11658_v22  ;;  %v9557_v28 = vpop.f32.mrf.mxu1 }
 0x194   :  { %v1953_v55 = vpop.f32.mrf.mxu0 }
 0x195   :  { %v11789_v11 = vadd.f32 %v9557_v28, %v2050_v0  ;;  %v2048_v59 = vadd.f32 %v1953_v55, %v11665_v32  ;;  %v2376_v18 = vpop.f32.mrf.mxu1 }
 0x196   :  { %v9506_v12 = vpop.f32.mrf.mxu0 }
 0x197   :  { %12795 = vst [vmem:[#allocation17_spill] sm:$0xff] %v11789_v11  ;;  %v11792_v50 = vadd.f32 %v2376_v18, %v2048_v59  ;;  %v2051_v40 = vadd.f32 %v9506_v12, %v11674_v47  ;;  %v9558_v46 = vpop.f32.mrf.mxu1 }
 0x198   :  { %v11795_v26 = vpop.f32.mrf.mxu0 }
 0x199   :  { %v11797_v43 = vadd.f32 %v9558_v46, %v2051_v40  ;;  %v11799_v16 = vpop.f32.mrf.mxu1 }
 0x19a   :  { %v9509_v22 = vpop.f32.mrf.mxu0 }
 0x19b   :  { %12796 = vst [vmem:[#allocation18_spill] sm:$0xff] %v11797_v43  ;;  %v2054_v56 = vadd.f32 %v9509_v22, %v11685_v27  ;;  %v9561_v0 = vpop.f32.mrf.mxu1 }
 0x19c   :  { %v1969_v28 = vpop.f32.mrf.mxu0 }
 0x19d   :  { %v11802_v11 = vadd.f32 %v9561_v0, %v2054_v56  ;;  %v2052_v32 = vadd.f32 %v1969_v28, %v11688_v33  ;;  %v2392_v55 = vpop.f32.mrf.mxu1 }
 0x19e   :  { %v9510_v59 = vpop.f32.mrf.mxu0 }
 0x19f   :  { %12797 = vst [vmem:[#allocation19_spill] sm:$0xff] %v11802_v11  ;;  %v11805_v18 = vadd.f32 %v2392_v55, %v2052_v32  ;;  %v2055_v47 = vadd.f32 %v9510_v59, %v11693_v62  ;;  %v9562_v12 = vpop.f32.mrf.mxu1 }
 0x1a0   :  { %v11808_v40 = vpop.f32.mrf.mxu0 }
 0x1a1   :  { %v11810_v46 = vadd.f32 %v9562_v12, %v2055_v47  ;;  %v11812_v43 = vpop.f32.mrf.mxu1 }
 0x1a2   :  { %v9513_v27 = vpop.f32.mrf.mxu0 }
 0x1a3   :  { %12798 = vst [vmem:[#allocation20_spill] sm:$0xff] %v11810_v46  ;;  %v2058_v22 = vadd.f32 %v9513_v27, %v11698_v52  ;;  %v9565_v56 = vpop.f32.mrf.mxu1 }
 0x1a4   :  { %v1985_v0 = vpop.f32.mrf.mxu0 }
 0x1a5   :  { %v11815_v11 = vadd.f32 %v9565_v56, %v2058_v22  ;;  %v2056_v33 = vadd.f32 %v1985_v0, %v11701_v6  ;;  %v2408_v28 = vpop.f32.mrf.mxu1 }
 0x1a6   :  { %v9514_v32 = vpop.f32.mrf.mxu0 }
 0x1a7   :  { %12799 = vst [vmem:[#allocation21_spill] sm:$0xff] %v11815_v11  ;;  %v11818_v55 = vadd.f32 %v2408_v28, %v2056_v33  ;;  %v2059_v62 = vadd.f32 %v9514_v32, %v11706_v8  ;;  %v9566_v59 = vpop.f32.mrf.mxu1 }
 0x1a8   :  { %v11821_v47 = vpop.f32.mrf.mxu0 }
 0x1a9   :  { %v11823_v12 = vadd.f32 %v9566_v59, %v2059_v62  ;;  %v11825_v46 = vpop.f32.mrf.mxu1 }
 0x1aa   :  { %v9517_v52 = vpop.f32.mrf.mxu0 }
 0x1ab   :  { %12800 = vst [vmem:[#allocation22_spill] sm:$0xff] %v11823_v12  ;;  %v2062_v27 = vadd.f32 %v9517_v52, %v11711_v14  ;;  %v9569_v22 = vpop.f32.mrf.mxu1 }
 0x1ac   :  { %v2001_v56 = vpop.f32.mrf.mxu0 }
 0x1ad   :  { %v11828_v11 = vadd.f32 %v9569_v22, %v2062_v27  ;;  %v2060_v6 = vadd.f32 %v2001_v56, %v11714_v60  ;;  %v2424_v0 = vpop.f32.mrf.mxu1  ;;  %v1187_v60 = vadd.f32 %v11583_v13, %v11367_v53 }
 0x1ae   :  { %v9518_v33 = vpop.f32.mrf.mxu0 }
 0x1af   :  { %v11831_v28 = vadd.f32 %v2424_v0, %v2060_v6  ;;  %v2063_v8 = vadd.f32 %v9518_v33, %v11719_v7  ;;  %v9570_v32 = vpop.f32.mrf.mxu1 }
 0x1b0   :  { %v11834_v62 = vpop.f32.mrf.mxu0 }
 0x1b1   :  { %v11836_v59 = vadd.f32 %v9570_v32, %v2063_v8  ;;  %v11838_v12 = vpop.f32.mrf.mxu1 }
 0x1b2   :  { %12802 = vst [vmem:[#allocation24_spill] sm:$0xff] %v11838_v12  ;;  %v9521_v14 = vpop.f32.mrf.mxu0 }
 0x1b3   :  { %12801 = vst [vmem:[#allocation23_spill] sm:$0xff] %v11836_v59  ;;  %v2066_v52 = vadd.f32 %v9521_v14, %v11724_v38  ;;  %v9573_v27 = vpop.f32.mrf.mxu1  ;;  %v1610_v38 = vadd.f32 %v11588_v19, %v1187_v60  ;;  %v11864_v19 = vld [vmem:[%s12775_s2] ss:$0 sm:$0xff] }
 0x1b4   :  { %v2017_v22 = vpop.f32.mrf.mxu0 }
 0x1b5   :  { %v11843_v56 = vadd.f32 %v9573_v27, %v2066_v52  ;;  %v2064_v6 = vadd.f32 %v2017_v22, %v11727_v24  ;;  %v2440_v7 = vpop.f32.mrf.mxu1  ;;  %v2033_v13 = vadd.f32 %v11743_v4, %v1610_v38  ;;  %v1191_v27 = vadd.f32 %v11609_v51, %v11387_v5 }
 0x1b6   :  { %v9522_v0 = vpop.f32.mrf.mxu0 }
 0x1b7   :  { %v11846_v33 = vadd.f32 %v2440_v7, %v2064_v6  ;;  %v2067_v8 = vadd.f32 %v9522_v0, %v11732_v3  ;;  %v9574_v32 = vpop.f32.mrf.mxu1  ;;  %v2456_v0 = vadd.f32 %v11747_v39, %v2033_v13 }
 0x1b8   :  { %v11849_v59 = vpop.f32.mrf.mxu0 }
 0x1b9   :  { %v11852_v14 = vadd.f32 %v9574_v32, %v2067_v8  ;;  %v11854_v12 = vpop.f32.mrf.mxu1  ;;  %v1614_v32 = vadd.f32 %v11614_v57, %v1191_v27  ;;  %v1195_v57 = vadd.f32 %v11624_v25, %v11407_v21 }
 0x1ba   :  { %v9593_v53 = vpop.f32.mrf.mxu0 }
 0x1bb   :  { %12803 = vst [vmem:[#allocation25_spill] sm:$0xff] %v11852_v14  ;;  %v2880_v24 = vadd.f32 %v9593_v53, %v11737_v10  ;;  %v9645_v52 = vpop.f32.mrf.mxu1 }
 0x1bc   :  { %v2735_v22 = vpop.f32.mrf.mxu0 }
 0x1bd   :  { %v3303_v3 = vadd.f32 %v9645_v52, %v2880_v24  ;;  %v2878_v6 = vadd.f32 %v2735_v22, %v11740_v45  ;;  %v3158_v7 = vpop.f32.mrf.mxu1  ;;  %v2037_v24 = vadd.f32 %v11756_v35, %v1614_v32 }
 0x1be   :  { %v9594_v60 = vpop.f32.mrf.mxu0 }
 0x1bf   :  { %v3301_v4 = vadd.f32 %v3158_v7, %v2878_v6  ;;  %v2881_v10 = vadd.f32 %v9594_v60, %v11745_v2  ;;  %v9646_v8 = vpop.f32.mrf.mxu1  ;;  %v3346_v51 = vadd.f32 %v11864_v19, %v3303_v3 }
 0x1c0   :  { %v2738_v5 = vpop.f32.mrf.mxu0 }
 0x1c1   :  { %v3304_v38 = vadd.f32 %v9646_v8, %v2881_v10  ;;  %v2879_v45 = vadd.f32 %v2738_v5, %v2456_v0  ;;  %v3161_v53 = vpop.f32.mrf.mxu1  ;;  %v3344_v22 = vadd.f32 %v11864_v19, %v3301_v4  ;;  %v3382_v6 = vmax.f32 %v3346_v51, 0.0 }
 0x1c2   :  { %v9597_v52 = vpop.f32.mrf.mxu0  ;;  %v2460_v0 = vadd.f32 %v11760_v9, %v2037_v24 }
 0x1c3   :  { %v3347_v14 = vadd.f32 %v11864_v19, %v3304_v38  ;;  %v3302_v39 = vadd.f32 %v3161_v53, %v2879_v45  ;;  %v2884_v13 = vadd.f32 %v9597_v52, %v11750_v36  ;;  %v9649_v2 = vpop.f32.mrf.mxu1  ;;  %v3380_v8 = vmax.f32 %v3344_v22, 0.0 }
 0x1c4   :  { %v2751_v27 = vpop.f32.mrf.mxu0  ;;  %v1618_v45 = vadd.f32 %v11628_v49, %v1195_v57 }
 0x1c5   :  { %v3383_v3 = vmax.f32 %v3347_v14, 0.0  ;;  %v3345_v7 = vadd.f32 %v11864_v19, %v3302_v39  ;;  %v2882_v60 = vadd.f32 %v2751_v27, %v11753_v34  ;;  %v3174_v35 = vpop.f32.mrf.mxu1  ;;  %v3307_v4 = vadd.f32 %v9649_v2, %v2884_v13 }
 0x1c6   :  { %v9598_v10 = vpop.f32.mrf.mxu0  ;;  %v2041_v34 = vadd.f32 %v11769_v15, %v1618_v45 }
 0x1c7   :  { %v8643_v32 = vpack.c.bf16 %v3383_v3, %v3382_v6  ;;  %v3381_v5 = vmax.f32 %v3345_v7, 0.0  ;;  %v3305_v36 = vadd.f32 %v3174_v35, %v2882_v60  ;;  %v9650_v38 = vpop.f32.mrf.mxu1  ;;  %v2885_v21 = vadd.f32 %v9598_v10, %v11758_v31 }
 0x1c8   :  { %v2754_v25 = vpop.f32.mrf.mxu0  ;;  %v3350_v9 = vadd.f32 %v11864_v19, %v3307_v4  ;;  %v1199_v31 = vadd.f32 %v11645_v1, %v11427_v37  ;;  %v2464_v3 = vadd.f32 %v11773_v20, %v2041_v34  ;;  %v10579_v1 = vld [vmem:[%s12774_s3 + $0xb8] sm:$0xff]  }
 0x1c9   :  { %8780 = vst [vmem:[#allocation2 + $0x8] sm:$0xff] %v8643_v32   ;;  %v8638_v14 = vpack.c.bf16 %v3381_v5, %v3380_v8  ;;  %v2883_v51 = vadd.f32 %v2754_v25, %v2460_v0  ;;  %v3177_v53 = vpop.f32.mrf.mxu1  ;;  %v3308_v24 = vadd.f32 %v9650_v38, %v2885_v21  ;;  %v3348_v22 = vadd.f32 %v11864_v19, %v3305_v36  ;;  %v10580_v21 = vld [vmem:[%s12774_s3 + $0xf8] sm:$0xff]  }
 0x1ca   :  { %v9601_v52 = vpop.f32.mrf.mxu0  ;;  %v3386_v7 = vmax.f32 %v3350_v9, 0.0  ;;  %v1622_v32 = vadd.f32 %v11649_v63, %v1199_v31 }
 0x1cb   :  { %8639 = vst [vmem:[#allocation2] sm:$0xff] %v8638_v14   ;;  %v3306_v39 = vadd.f32 %v3177_v53, %v2883_v51  ;;  %v2888_v13 = vadd.f32 %v9601_v52, %v11763_v30  ;;  %v9653_v49 = vpop.f32.mrf.mxu1  ;;  %v3351_v2 = vadd.f32 %v11864_v19, %v3308_v24  ;;  %v3384_v4 = vmax.f32 %v3348_v22, 0.0 }
 0x1cc   :  { %v2767_v57 = vpop.f32.mrf.mxu0  ;;  %v12804_v52 = vmov 0.0   ;;  %v1203_v22 = vadd.f32 %v11669_v42, %v11447_v58 }
 0x1cd   :  { %v3349_v27 = vadd.f32 %v11864_v19, %v3306_v39  ;;  %v2886_v15 = vadd.f32 %v2767_v57, %v11766_v17  ;;  %v3190_v6 = vpop.f32.mrf.mxu1  ;;  %v3387_v60 = vmax.f32 %v3351_v2, 0.0  ;;  %v3311_v35 = vadd.f32 %v9653_v49, %v2888_v13  ;;  %v10584_v2 = vld [vmem:[%s12774_s3 + $0xf0] sm:$0xff]  }
 0x1ce   :  { %v9602_v0 = vpop.f32.mrf.mxu0 }
 0x1cf   :  { %v3385_v30 = vmax.f32 %v3349_v27, 0.0  ;;  %v2889_v10 = vadd.f32 %v9602_v0, %v11771_v61  ;;  %v3309_v8 = vadd.f32 %v3190_v6, %v2886_v15  ;;  %v9654_v37 = vpop.f32.mrf.mxu1  ;;  %v8653_v17 = vpack.c.bf16 %v3387_v60, %v3386_v7 }
 0x1d0   :  { %v2770_v5 = vpop.f32.mrf.mxu0  ;;  %v10577_v36 = vld [vmem:[#allocation2 + $0x8] sm:$0xff]   ;;  %v2045_v61 = vadd.f32 %v11782_v54, %v1622_v32  ;;  %v3354_v25 = vadd.f32 %v11864_v19, %v3311_v35  ;;  %v10583_v54 = vld [vmem:[%s12774_s3 + $0xb0] sm:$0xff]   ;;  %v1626_v0 = vadd.f32 %v11676_v48, %v1203_v22 }
 0x1d1   :  { %v8648_v20 = vpack.c.bf16 %v3385_v30, %v3384_v4  ;;  %v2887_v38 = vadd.f32 %v2770_v5, %v2464_v3  ;;  %v3193_v45 = vpop.f32.mrf.mxu1  ;;  %8782 = vst [vmem:[#allocation2 + $0x18] sm:$0xff] %v8653_v17   ;;  %v3312_v14 = vadd.f32 %v9654_v37, %v2889_v10  ;;  %9696 = vmatmul.mubr.bf16.vlgmr.msra.gmra.mxu0 %v10577_v36  ;;  %v10587_v35 = vld [vmem:[%s12774_s3 + $0xa8] sm:$0xff]  }
 0x1d2   :  { %v9605_v51 = vpop.f32.mrf.mxu0  ;;  %v10578_v53 = vld [vmem:[#allocation2] sm:$0xff]   ;;  %v3352_v63 = vadd.f32 %v11864_v19, %v3309_v8  ;;  %9800 = vmatpush3.bf16.msra.mxu0 %v10579_v1  ;;  %9699 = vmatprep.mubr.msk.bf16.mxu0 %vm10810_vm0, %v12804_v52  ;;  %v2468_v58 = vadd.f32 %v11786_v41, %v2045_v61  ;;  %v3390_v42 = vmax.f32 %v3354_v25, 0.0  ;;  %v10590_v30 = vld [vmem:[%s12774_s3 + $0xe8] sm:$0xff]   ;;  %v2049_v1 = vadd.f32 %v11795_v26, %v1626_v0  ;;  %v12807_v25 = vld [vmem:[#allocation9_spill] sm:$0xff] }
 0x1d3   :  { %8781 = vst [vmem:[#allocation2 + $0x10] sm:$0xff] %v8648_v20   ;;  %v2892_v34 = vadd.f32 %v9605_v51, %v11776_v44  ;;  %v3310_v9 = vadd.f32 %v3193_v45, %v2887_v38  ;;  %v9657_v24 = vpop.f32.mrf.mxu1  ;;  %v3355_v39 = vadd.f32 %v11864_v19, %v3312_v14  ;;  %9756 = vmatmul.mubr.bf16.vlgmr.msra.gmra.mxu1 %v10578_v53  ;;  %v10582_v37 = vld [vmem:[#allocation2 + $0x8] sm:$0xff]   ;;  %v12805_v20 = vld [vmem:[#allocation17_spill] sm:$0xff]  ;;  %v10593_v26 = vld [vmem:[%s12774_s3 + $0xa0] sm:$0xff]  }
 0x1d4   :  { %v2783_v13 = vpop.f32.mrf.mxu0  ;;  %9801 = vmatprep.subr.bf16.mxu0 %v12804_v52  ;;  %9860 = vmatpush3.bf16.msra.mxu1 %v10580_v21  ;;  %v3388_v6 = vmax.f32 %v3352_v63, 0.0  ;;  %v12806_v61 = vld [vmem:[#allocation4_spill] sm:$0xff]  ;;  %v10594_v63 = vld [vmem:[%s12774_s3 + $0xe0] sm:$0xff]   ;;  %v2472_v22 = vadd.f32 %v11799_v16, %v2049_v1 }
 0x1d5   :  { %v3353_v44 = vadd.f32 %v11864_v19, %v3310_v9  ;;  %v2890_v49 = vadd.f32 %v2783_v13, %v11779_v23  ;;  %v3206_v31 = vpop.f32.mrf.mxu1  ;;  %9759 = vmatprep.mubr.msk.bf16.mxu1 %vm10810_vm0, %v12804_v52  ;;  %v3391_v57 = vmax.f32 %v3355_v39, 0.0  ;;  %v3315_v27 = vadd.f32 %v9657_v24, %v2892_v34  ;;  %9861 = vmatprep.subr.bf16.mxu1 %v12804_v52 }
 0x1d6   :  { %v9606_v15 = vpop.f32.mrf.mxu0  ;;  %9802 = vmatpush3.bf16.msra.mxu0 %v10583_v54  ;;  %v1207_v14 = vadd.f32 %v12807_v25, %v12806_v61  ;;  %v10597_v54 = vld [vmem:[%s12774_s3 + $0x98] sm:$0xff]   ;;  %v10607_v61 = vld [vmem:[%s12774_s3 + $0x88] sm:$0xff]  }
 0x1d7   :  { %v3389_v3 = vmax.f32 %v3353_v44, 0.0  ;;  %v2893_v23 = vadd.f32 %v9606_v15, %v11784_v29  ;;  %v3313_v7 = vadd.f32 %v3206_v31, %v2890_v49  ;;  %v9658_v60 = vpop.f32.mrf.mxu1  ;;  %v8663_v41 = vpack.c.bf16 %v3391_v57, %v3390_v42  ;;  %9803 = vmatprep.subr.bf16.mxu0 %v12804_v52 }
 0x1d8   :  { %v2786_v4 = vpop.f32.mrf.mxu0  ;;  %9862 = vmatpush3.bf16.msra.mxu1 %v10584_v2  ;;  %v3358_v32 = vadd.f32 %v11864_v19, %v3315_v27  ;;  %v12808_v2 = vld [vmem:[#allocation18_spill] sm:$0xff] }
 0x1d9   :  { %v8658_v10 = vpack.c.bf16 %v3389_v3, %v3388_v6  ;;  %v2891_v8 = vadd.f32 %v2786_v4, %v2468_v58  ;;  %v3209_v29 = vpop.f32.mrf.mxu1  ;;  %8784 = vst [vmem:[#allocation2 + $0x28] sm:$0xff] %v8663_v41   ;;  %v3316_v17 = vadd.f32 %v9658_v60, %v2893_v23  ;;  %9863 = vmatprep.subr.bf16.mxu1 %v12804_v52  ;;  %v12809_v27 = vld [vmem:[#allocation10_spill] sm:$0xff] }
 0x1da   :  { %v9609_v48 = vpop.f32.mrf.mxu0  ;;  %v10581_v5 = vld [vmem:[#allocation2 + $0x10] sm:$0xff]   ;;  %v3356_v36 = vadd.f32 %v11864_v19, %v3313_v7  ;;  %9804 = vmatpush3.bf16.msra.mxu0 %v10587_v35  ;;  %v3394_v39 = vmax.f32 %v3358_v32, 0.0  ;;  %v1630_v15 = vadd.f32 %v12809_v27, %v1207_v14  ;;  %v10598_v3 = vld [vmem:[%s12774_s3 + $0xd8] sm:$0xff]  }
 0x1db   :  { %8783 = vst [vmem:[#allocation2 + $0x20] sm:$0xff] %v8658_v10   ;;  %v2896_v38 = vadd.f32 %v9609_v48, %v12805_v20  ;;  %v3314_v45 = vadd.f32 %v3209_v29, %v2891_v8  ;;  %v9661_v21 = vpop.f32.mrf.mxu1  ;;  %v3359_v51 = vadd.f32 %v11864_v19, %v3316_v17  ;;  %9700 = vmatmul.mubr.bf16.gmra.mxu0 %v10581_v5  ;;  %v10585_v35 = vld [vmem:[#allocation2 + $0x18] sm:$0xff]   ;;  %v10586_v10 = vld [vmem:[#allocation2 + $0x10] sm:$0xff]   ;;  %v12810_v29 = vld [vmem:[#allocation19_spill] sm:$0xff] }
 0x1dc   :  { %v2799_v53 = vpop.f32.mrf.mxu0  ;;  %9760 = vmatmul.mubr.bf16.gmra.mxu1 %v10582_v37  ;;  %9703 = vmatprep.mubr.msk.bf16.mxu0 %vm10810_vm0, %v12804_v52  ;;  %v2053_v0 = vadd.f32 %v11808_v40, %v1630_v15  ;;  %v10603_v40 = vld [vmem:[%s12774_s3 + $0x90] sm:$0xff]   ;;  %v12812_v48 = vld [vmem:[#allocation11_spill] sm:$0xff] }
 0x1dd   :  { %v3357_v34 = vadd.f32 %v11864_v19, %v3314_v45  ;;  %v2894_v9 = vadd.f32 %v2799_v53, %v11792_v50  ;;  %v3222_v24 = vpop.f32.mrf.mxu1  ;;  %9763 = vmatprep.mubr.msk.bf16.mxu1 %vm10810_vm0, %v12804_v52  ;;  %v3395_v13 = vmax.f32 %v3359_v51, 0.0  ;;  %v3319_v44 = vadd.f32 %v9661_v21, %v2896_v38  ;;  %9864 = vmatpush3.bf16.msra.mxu1 %v10590_v30  ;;  %v12811_v17 = vld [vmem:[#allocation5_spill] sm:$0xff] }
 0x1de   :  { %v9610_v49 = vpop.f32.mrf.mxu0  ;;  %9805 = vmatprep.subr.bf16.mxu0 %v12804_v52  ;;  %v3392_v50 = vmax.f32 %v3356_v36, 0.0  ;;  %9865 = vmatprep.subr.bf16.mxu1 %v12804_v52  ;;  %v1211_v5 = vadd.f32 %v12812_v48, %v12811_v17  ;;  %v10604_v38 = vld [vmem:[%s12774_s3 + $0xd0] sm:$0xff]   ;;  %v2476_v25 = vadd.f32 %v11812_v43, %v2053_v0 }
 0x1df   :  { %v3393_v31 = vmax.f32 %v3357_v34, 0.0  ;;  %v2897_v58 = vadd.f32 %v9610_v49, %v12808_v2  ;;  %v3317_v42 = vadd.f32 %v3222_v24, %v2894_v9  ;;  %v9662_v57 = vpop.f32.mrf.mxu1  ;;  %9806 = vmatpush3.bf16.msra.mxu0 %v10593_v26  ;;  %v8673_v6 = vpack.c.bf16 %v3395_v13, %v3394_v39  ;;  %v12813_v9 = vld [vmem:[#allocation20_spill] sm:$0xff]  ;;  %v12817_v0 = vld [vmem:[#allocation13_spill] sm:$0xff] }
 0x1e0   :  { %v2802_v16 = vpop.f32.mrf.mxu0  ;;  %9807 = vmatprep.subr.bf16.mxu0 %v12804_v52  ;;  %v3362_v41 = vadd.f32 %v11864_v19, %v3319_v44  ;;  %v12814_v39 = vld [vmem:[#allocation12_spill] sm:$0xff] }
 0x1e1   :  { %v8668_v23 = vpack.c.bf16 %v3393_v31, %v3392_v50  ;;  %v2895_v7 = vadd.f32 %v2802_v16, %v2472_v22  ;;  %v3225_v60 = vpop.f32.mrf.mxu1  ;;  %8786 = vst [vmem:[#allocation2 + $0x38] sm:$0xff] %v8673_v6   ;;  %v3320_v4 = vadd.f32 %v9662_v57, %v2897_v58  ;;  %9866 = vmatpush3.bf16.msra.mxu1 %v10594_v63  ;;  %v10608_v49 = vld [vmem:[%s12774_s3 + $0xc8] sm:$0xff]   ;;  %v10589_v58 = vld [vmem:[#allocation2 + $0x18] sm:$0xff]  }
 0x1e2   :  { %v9613_v30 = vpop.f32.mrf.mxu0  ;;  %v3360_v8 = vadd.f32 %v11864_v19, %v3317_v42  ;;  %9867 = vmatprep.subr.bf16.mxu1 %v12804_v52  ;;  %v3398_v14 = vmax.f32 %v3362_v41, 0.0  ;;  %v1634_v13 = vadd.f32 %v12814_v39, %v1211_v5  ;;  %v10588_v6 = vld [vmem:[#allocation2 + $0x20] sm:$0xff]  }
 0x1e3   :  { %8785 = vst [vmem:[#allocation2 + $0x30] sm:$0xff] %v8668_v23   ;;  %v2900_v37 = vadd.f32 %v9613_v30, %v12810_v29  ;;  %v3318_v1 = vadd.f32 %v3225_v60, %v2895_v7  ;;  %v9665_v32 = vpop.f32.mrf.mxu1  ;;  %9808 = vmatpush3.bf16.msra.mxu0 %v10597_v54  ;;  %v3363_v36 = vadd.f32 %v11864_v19, %v3320_v4  ;;  %v10592_v39 = vld [vmem:[#allocation2 + $0x20] sm:$0xff]  }
 0x1e4   :  { %v2815_v20 = vpop.f32.mrf.mxu0  ;;  %9704 = vmatmul.mubr.bf16.gmra.mxu0 %v10585_v35  ;;  %9764 = vmatmul.mubr.bf16.gmra.mxu1 %v10586_v10  ;;  %v2057_v42 = vadd.f32 %v11821_v47, %v1634_v13  ;;  %v10611_v47 = vld [vmem:[%s12774_s3 + $0x80] sm:$0xff]   ;;  %v12816_v35 = vld [vmem:[#allocation6_spill] sm:$0xff] }
 0x1e5   :  { %v3361_v45 = vadd.f32 %v11864_v19, %v3318_v1  ;;  %v2898_v21 = vadd.f32 %v2815_v20, %v11805_v18  ;;  %v3238_v26 = vpop.f32.mrf.mxu1  ;;  %9707 = vmatprep.mubr.msk.bf16.mxu0 %vm10810_vm0, %v12804_v52  ;;  %9767 = vmatprep.mubr.msk.bf16.mxu1 %vm10810_vm0, %v12804_v52  ;;  %v3399_v51 = vmax.f32 %v3363_v36, 0.0  ;;  %v3323_v53 = vadd.f32 %v9665_v32, %v2900_v37  ;;  %v10614_v37 = vld [vmem:[%s12774_s3 + $0xc0] sm:$0xff]   ;;  %v12818_v36 = vld [vmem:[#allocation22_spill] sm:$0xff] }
 0x1e6   :  { %v9614_v63 = vpop.f32.mrf.mxu0  ;;  %9868 = vmatpush3.bf16.msra.mxu1 %v10598_v3  ;;  %9809 = vmatprep.subr.bf16.mxu0 %v12804_v52  ;;  %v3396_v18 = vmax.f32 %v3360_v8, 0.0  ;;  %v12815_v3 = vld [vmem:[#allocation21_spill] sm:$0xff]  ;;  %v1215_v41 = vadd.f32 %v12817_v0, %v12816_v35  ;;  %v2480_v1 = vadd.f32 %v11825_v46, %v2057_v42 }
 0x1e7   :  { %v3397_v34 = vmax.f32 %v3361_v45, 0.0  ;;  %v2901_v24 = vadd.f32 %v9614_v63, %v12813_v9  ;;  %v3321_v54 = vadd.f32 %v3238_v26, %v2898_v21  ;;  %v9666_v22 = vpop.f32.mrf.mxu1  ;;  %9810 = vmatpush3.bf16.msra.mxu0 %v10603_v40  ;;  %9869 = vmatprep.subr.bf16.mxu1 %v12804_v52  ;;  %v8683_v44 = vpack.c.bf16 %v3399_v51, %v3398_v14  ;;  %v12819_v21 = vld [vmem:[#allocation14_spill] sm:$0xff]  ;;  %v12820_v63 = vld [vmem:[#allocation7_spill] sm:$0xff] }
 0x1e8   :  { %v2818_v43 = vpop.f32.mrf.mxu0  ;;  %9811 = vmatprep.subr.bf16.mxu0 %v12804_v52  ;;  %v3366_v57 = vadd.f32 %v11864_v19, %v3323_v53  ;;  %v1638_v26 = vadd.f32 %v12819_v21, %v1215_v41  ;;  %v10591_v53 = vld [vmem:[#allocation2 + $0x28] sm:$0xff]  }
 0x1e9   :  { %v8678_v50 = vpack.c.bf16 %v3397_v34, %v3396_v18  ;;  %v2899_v31 = vadd.f32 %v2818_v43, %v2476_v25  ;;  %v3241_v2 = vpop.f32.mrf.mxu1  ;;  %8788 = vst [vmem:[#allocation2 + $0x48] sm:$0xff] %v8683_v44   ;;  %v3324_v27 = vadd.f32 %v9666_v22, %v2901_v24  ;;  %v3364_v16 = vadd.f32 %v11864_v19, %v3321_v54  ;;  %v12821_v18 = vld [vmem:[#allocation8_spill] sm:$0xff] }
 0x1ea   :  { %v9617_v15 = vpop.f32.mrf.mxu0  ;;  %9870 = vmatpush3.bf16.msra.mxu1 %v10604_v38  ;;  %v3402_v32 = vmax.f32 %v3366_v57, 0.0  ;;  %v788_v34 = vadd.f32 %v12821_v18, %v12820_v63  ;;  %v2061_v9 = vadd.f32 %v11834_v62, %v1638_v26  ;;  %v12826_v63 = vld [vmem:[#allocation25_spill] sm:$0xff] }
 0x1eb   :  { %8787 = vst [vmem:[#allocation2 + $0x40] sm:$0xff] %v8678_v50   ;;  %v2904_v23 = vadd.f32 %v9617_v15, %v12815_v3  ;;  %v3322_v7 = vadd.f32 %v3241_v2, %v2899_v31  ;;  %v9669_v60 = vpop.f32.mrf.mxu1  ;;  %9812 = vmatpush3.bf16.msra.mxu0 %v10607_v61  ;;  %9871 = vmatprep.subr.bf16.mxu1 %v12804_v52  ;;  %v12822_v50 = vld [vmem:[#allocation15_spill] sm:$0xff] }
 0x1ec   :  { %v3367_v4 = vadd.f32 %v11864_v19, %v3324_v27  ;;  %v2831_v30 = vpop.f32.mrf.mxu0  ;;  %9708 = vmatmul.mubr.bf16.gmra.mxu0 %v10588_v6  ;;  %9768 = vmatmul.mubr.bf16.gmra.mxu1 %v10589_v58  ;;  %v1219_v31 = vadd.f32 %v12822_v50, %v788_v34 }
 0x1ed   :  { %v3365_v10 = vadd.f32 %v11864_v19, %v3322_v7  ;;  %v2902_v8 = vadd.f32 %v2831_v30, %v11818_v55  ;;  %v3254_v29 = vpop.f32.mrf.mxu1  ;;  %9711 = vmatprep.mubr.msk.bf16.mxu0 %vm10810_vm0, %v12804_v52  ;;  %9771 = vmatprep.mubr.msk.bf16.mxu1 %vm10810_vm0, %v12804_v52  ;;  %v3327_v17 = vadd.f32 %v9669_v60, %v2904_v23  ;;  %v3400_v55 = vmax.f32 %v3364_v16, 0.0  ;;  %v12824_v60 = vld [vmem:[#allocation23_spill] sm:$0xff] }
 0x1ee   :  { %v3403_v40 = vmax.f32 %v3367_v4, 0.0  ;;  %v9618_v48 = vpop.f32.mrf.mxu0  ;;  %9872 = vmatpush3.bf16.msra.mxu1 %v10608_v49  ;;  %9813 = vmatprep.subr.bf16.mxu0 %v12804_v52 }
 0x1ef   :  { %v3401_v5 = vmax.f32 %v3365_v10, 0.0  ;;  %v2905_v20 = vadd.f32 %v9618_v48, %v12818_v36  ;;  %v3325_v38 = vadd.f32 %v3254_v29, %v2902_v8  ;;  %v9670_v45 = vpop.f32.mrf.mxu1  ;;  %9814 = vmatpush3.bf16.msra.mxu0 %v10611_v47  ;;  %9873 = vmatprep.subr.bf16.mxu1 %v12804_v52  ;;  %v3370_v24 = vadd.f32 %v11864_v19, %v3327_v17  ;;  %v10595_v48 = vld [vmem:[#allocation2 + $0x30] sm:$0xff]  }
 0x1f0   :  { %v8693_v61 = vpack.c.bf16 %v3403_v40, %v3402_v32  ;;  %v2834_v46 = vpop.f32.mrf.mxu0  ;;  %9919 = vmatprep.subr.bf16.mxu0 %v12804_v52 }
 0x1f1   :  { %v8688_v25 = vpack.c.bf16 %v3401_v5, %v3400_v55  ;;  %v2903_v14 = vadd.f32 %v2834_v46, %v2480_v1  ;;  %v3257_v51 = vpop.f32.mrf.mxu1  ;;  %v3328_v54 = vadd.f32 %v9670_v45, %v2905_v20  ;;  %v3368_v13 = vadd.f32 %v11864_v19, %v3325_v38 }
 0x1f2   :  { %8790 = vst [vmem:[#allocation2 + $0x58] sm:$0xff] %v8693_v61   ;;  %v9621_v22 = vpop.f32.mrf.mxu0  ;;  %9874 = vmatpush3.bf16.msra.mxu1 %v10614_v37  ;;  %v3406_v15 = vmax.f32 %v3370_v24, 0.0  ;;  %v10596_v37 = vld [vmem:[#allocation2 + $0x28] sm:$0xff]  }
 0x1f3   :  { %8789 = vst [vmem:[#allocation2 + $0x50] sm:$0xff] %v8688_v25   ;;  %v2908_v44 = vadd.f32 %v9621_v22, %v11828_v11  ;;  %v3326_v43 = vadd.f32 %v3257_v51, %v2903_v14  ;;  %v9673_v49 = vpop.f32.mrf.mxu1  ;;  %9979 = vmatprep.subr.bf16.mxu1 %v12804_v52  ;;  %v3371_v62 = vadd.f32 %v11864_v19, %v3328_v54  ;;  %v12823_v11 = vld [vmem:[#allocation24_spill] sm:$0xff]  ;;  %v3404_v23 = vmax.f32 %v3368_v13, 0.0  ;;  %v10599_v13 = vld [vmem:[#allocation2 + $0x38] sm:$0xff]  }
 0x1f4   :  { %v2847_v2 = vpop.f32.mrf.mxu0  ;;  %9712 = vmatmul.mubr.bf16.gmra.mxu0 %v10591_v53  ;;  %9772 = vmatmul.mubr.bf16.gmra.mxu1 %v10592_v39  ;;  %v2484_v27 = vadd.f32 %v12823_v11, %v2061_v9 }
 0x1f5   :  { %v3369_v58 = vadd.f32 %v11864_v19, %v3326_v43  ;;  %v2906_v42 = vadd.f32 %v2847_v2, %v11831_v28  ;;  %v3270_v57 = vpop.f32.mrf.mxu1  ;;  %9715 = vmatprep.mubr.msk.bf16.mxu0 %vm10810_vm0, %v12804_v52  ;;  %9775 = vmatprep.mubr.msk.bf16.mxu1 %vm10810_vm0, %v12804_v52  ;;  %v3407_v6 = vmax.f32 %v3371_v62, 0.0  ;;  %v3331_v16 = vadd.f32 %v9673_v49, %v2908_v44  ;;  %v12825_v28 = vld [vmem:[#allocation16_spill] sm:$0xff]  ;;  %v10600_v43 = vld [vmem:[#allocation2 + $0x30] sm:$0xff]  }
 0x1f6   :  { %v9622_v3 = vpop.f32.mrf.mxu0  ;;  %v1642_v41 = vadd.f32 %v12825_v28, %v1219_v31  ;;  %v10616_v28 = vld [vmem:[#allocation2 + $0x18] sm:$0xff]  }
 0x1f7   :  { %v3405_v7 = vmax.f32 %v3369_v58, 0.0  ;;  %v2909_v47 = vadd.f32 %v9622_v3, %v12824_v60  ;;  %v3329_v35 = vadd.f32 %v3270_v57, %v2906_v42  ;;  %v9674_v0 = vpop.f32.mrf.mxu1  ;;  %v8703_v4 = vpack.c.bf16 %v3407_v6, %v3406_v15  ;;  %v10602_v15 = vld [vmem:[#allocation2 + $0x38] sm:$0xff]   ;;  %v10601_v6 = vld [vmem:[#allocation2 + $0x40] sm:$0xff]  }
 0x1f8   :  { %v2850_v30 = vpop.f32.mrf.mxu0  ;;  %v2065_v1 = vadd.f32 %v11849_v59, %v1642_v41  ;;  %v3374_v32 = vadd.f32 %v11864_v19, %v3331_v16  ;;  %v10606_v16 = vld [vmem:[#allocation2 + $0x40] sm:$0xff]   ;;  %v10621_v41 = vld [vmem:[%s12774_s3 + $0x130] sm:$0xff]  }
 0x1f9   :  { %v8698_v10 = vpack.c.bf16 %v3405_v7, %v3404_v23  ;;  %v2907_v8 = vadd.f32 %v2850_v30, %v2484_v27  ;;  %v3273_v29 = vpop.f32.mrf.mxu1  ;;  %8792 = vst [vmem:[#allocation2 + $0x68] sm:$0xff] %v8703_v4   ;;  %v3332_v40 = vadd.f32 %v9674_v0, %v2909_v47  ;;  %v3372_v55 = vadd.f32 %v11864_v19, %v3329_v35  ;;  %v10610_v23 = vld [vmem:[#allocation2 + $0x48] sm:$0xff]   ;;  %v10612_v7 = vld [vmem:[#allocation2 + $0x58] sm:$0xff]   ;;  %v10615_v35 = vld [vmem:[#allocation2 + $0x10] sm:$0xff]  }
 0x1fa   :  { %v9625_v17 = vpop.f32.mrf.mxu0  ;;  %v3410_v61 = vmax.f32 %v3374_v32, 0.0  ;;  %v10609_v3 = vld [vmem:[#allocation2 + $0x50] sm:$0xff]   ;;  %v10617_v47 = vld [vmem:[%s12774_s3 + $0x138] sm:$0xff]   ;;  %v10625_v30 = vld [vmem:[%s12774_s3 + $0x128] sm:$0xff]  }
 0x1fb   :  { %8791 = vst [vmem:[#allocation2 + $0x60] sm:$0xff] %v8698_v10   ;;  %v2912_v5 = vadd.f32 %v9625_v17, %v11843_v56  ;;  %v3330_v36 = vadd.f32 %v3273_v29, %v2907_v8  ;;  %v9677_v20 = vpop.f32.mrf.mxu1  ;;  %v3375_v38 = vadd.f32 %v11864_v19, %v3332_v40  ;;  %v2488_v56 = vadd.f32 %v11854_v12, %v2065_v1  ;;  %v10613_v60 = vld [vmem:[#allocation2 + $0x50] sm:$0xff]   ;;  %v10618_v0 = vld [vmem:[%s12774_s3 + $0x178] sm:$0xff]   ;;  %v10628_v8 = vld [vmem:[%s12774_s3 + $0x168] sm:$0xff]  }
 0x1fc   :  { %v2863_v45 = vpop.f32.mrf.mxu0  ;;  %9716 = vmatmul.mubr.bf16.gmra.mxu0 %v10595_v48  ;;  %9776 = vmatmul.mubr.bf16.gmra.mxu1 %v10596_v37  ;;  %v3408_v51 = vmax.f32 %v3372_v55, 0.0  ;;  %v10622_v4 = vld [vmem:[%s12774_s3 + $0x170] sm:$0xff]   ;;  %v10619_v10 = vld [vmem:[#allocation2 + $0x18] sm:$0xff]   ;;  %v10620_v29 = vld [vmem:[#allocation2 + $0x20] sm:$0xff]  }
 0x1fd   :  { %v3373_v59 = vadd.f32 %v11864_v19, %v3330_v36  ;;  %v2910_v21 = vadd.f32 %v2863_v45, %v11846_v33  ;;  %v3286_v26 = vpop.f32.mrf.mxu1  ;;  %9719 = vmatprep.mubr.msk.bf16.mxu0 %vm10810_vm0, %v12804_v52  ;;  %9779 = vmatprep.mubr.msk.bf16.mxu1 %vm10810_vm0, %v12804_v52  ;;  %v3411_v46 = vmax.f32 %v3375_v38, 0.0  ;;  %v3335_v25 = vadd.f32 %v9677_v20, %v2912_v5  ;;  %v10631_v37 = vld [vmem:[%s12774_s3 + $0x120] sm:$0xff]   ;;  %v10635_v32 = vld [vmem:[%s12774_s3 + $0x118] sm:$0xff]   ;;  %v10624_v17 = vld [vmem:[#allocation2 + $0x28] sm:$0xff]  }
 0x1fe   :  { %v9626_v14 = vpop.f32.mrf.mxu0  ;;  %v10632_v1 = vld [vmem:[%s12774_s3 + $0x160] sm:$0xff]   ;;  %v10636_v48 = vld [vmem:[%s12774_s3 + $0x158] sm:$0xff]   ;;  %v10641_v55 = vld [vmem:[%s12774_s3 + $0x110] sm:$0xff]  }
 0x1ff   :  { %v3409_v53 = vmax.f32 %v3373_v59, 0.0  ;;  %v2913_v18 = vadd.f32 %v9626_v14, %v12826_v63  ;;  %v3333_v34 = vadd.f32 %v3286_v26, %v2910_v21  ;;  %v9678_v9 = vpop.f32.mrf.mxu1  ;;  %v8713_v33 = vpack.c.bf16 %v3411_v46, %v3410_v61  ;;  %v10623_v40 = vld [vmem:[#allocation2 + $0x20] sm:$0xff]   ;;  %v10642_v5 = vld [vmem:[%s12774_s3 + $0x150] sm:$0xff]   ;;  %v10626_v36 = vld [vmem:[#allocation2 + $0x28] sm:$0xff]  }
 0x200   :  { %v2866_v24 = vpop.f32.mrf.mxu0  ;;  %v3378_v44 = vadd.f32 %v11864_v19, %v3335_v25  ;;  %v10627_v20 = vld [vmem:[#allocation2 + $0x30] sm:$0xff]   ;;  %v10645_v38 = vld [vmem:[%s12774_s3 + $0x108] sm:$0xff]   ;;  %v10649_v59 = vld [vmem:[%s12774_s3 + $0x100] sm:$0xff]  }
 0x201   :  { %v8708_v54 = vpack.c.bf16 %v3409_v53, %v3408_v51  ;;  %v2911_v22 = vadd.f32 %v2866_v24, %v2488_v56  ;;  %v3289_v39 = vpop.f32.mrf.mxu1  ;;  %8794 = vst [vmem:[#allocation2 + $0x78] sm:$0xff] %v8713_v33   ;;  %v3336_v12 = vadd.f32 %v9678_v9, %v2913_v18  ;;  %v3376_v49 = vadd.f32 %v11864_v19, %v3333_v34  ;;  %v10646_v45 = vld [vmem:[%s12774_s3 + $0x148] sm:$0xff]   ;;  %v10652_v21 = vld [vmem:[%s12774_s3 + $0x140] sm:$0xff]   ;;  %v10629_v26 = vld [vmem:[#allocation2 + $0x30] sm:$0xff]  }
 0x202   :  { %v3414_v2 = vmax.f32 %v3378_v44, 0.0  ;;  %v10630_v56 = vld [vmem:[#allocation2 + $0x38] sm:$0xff]   ;;  %v10634_v46 = vld [vmem:[#allocation2 + $0x40] sm:$0xff]   ;;  %v10638_v14 = vld [vmem:[#allocation2 + $0x48] sm:$0xff]  }
 0x203   :  { %8793 = vst [vmem:[#allocation2 + $0x70] sm:$0xff] %v8708_v54   ;;  %v3334_v50 = vadd.f32 %v3289_v39, %v2911_v22  ;;  %v3379_v31 = vadd.f32 %v11864_v19, %v3336_v12  ;;  %v3412_v42 = vmax.f32 %v3376_v49, 0.0  ;;  %v10633_v61 = vld [vmem:[#allocation2 + $0x38] sm:$0xff]   ;;  %v10637_v25 = vld [vmem:[#allocation2 + $0x40] sm:$0xff]   ;;  %v10639_v51 = vld [vmem:[#allocation2 + $0x48] sm:$0xff]  }
 0x204   :  { %9720 = vmatmul.mubr.bf16.gmra.mxu0 %v10599_v13  ;;  %9780 = vmatmul.mubr.bf16.gmra.mxu1 %v10600_v43  ;;  %v10640_v53 = vld [vmem:[#allocation2 + $0x50] sm:$0xff]   ;;  %v10644_v18 = vld [vmem:[#allocation2 + $0x58] sm:$0xff]   ;;  %v10648_v9 = vld [vmem:[#allocation2 + $0x60] sm:$0xff]  }
 0x205   :  { %v3377_v62 = vadd.f32 %v11864_v19, %v3334_v50  ;;  %9723 = vmatprep.mubr.msk.bf16.mxu0 %vm10810_vm0, %v12804_v52  ;;  %9783 = vmatprep.mubr.msk.bf16.mxu1 %vm10810_vm0, %v12804_v52  ;;  %v3415_v58 = vmax.f32 %v3379_v31, 0.0  ;;  %v10605_v19 = vld [vmem:[#allocation2 + $0x48] sm:$0xff]   ;;  %v10643_v63 = vld [vmem:[#allocation2 + $0x50] sm:$0xff]   ;;  %v10647_v34 = vld [vmem:[#allocation2 + $0x58] sm:$0xff]  }
 0x206   :  { %v10650_v33 = vld [vmem:[#allocation2 + $0x60] sm:$0xff]   ;;  %v10651_v24 = vld [vmem:[#allocation2 + $0x68] sm:$0xff]   ;;  %v10655_v54 = vld [vmem:[%s12774_s3 + $0x1b8] sm:$0xff]  }
 0x207   :  { %v3413_v57 = vmax.f32 %v3377_v62, 0.0  ;;  %v8723_v11 = vpack.c.bf16 %v3415_v58, %v3414_v2  ;;  %v10656_v22 = vld [vmem:[%s12774_s3 + $0x1f8] sm:$0xff]   ;;  %v10653_v39 = vld [vmem:[#allocation2 + $0x20] sm:$0xff]   ;;  %v10654_v13 = vld [vmem:[#allocation2 + $0x28] sm:$0xff]  }
 0x208   :  { %v10659_v44 = vld [vmem:[%s12774_s3 + $0x1b0] sm:$0xff]   ;;  %v10657_v43 = vld [vmem:[#allocation2 + $0x28] sm:$0xff]   ;;  %v10669_v62 = vld [vmem:[%s12774_s3 + $0x1a0] sm:$0xff]  }
 0x209   :  { %v8718_v27 = vpack.c.bf16 %v3413_v57, %v3412_v42  ;;  %8796 = vst [vmem:[#allocation2 + $0x88] sm:$0xff] %v8723_v11   ;;  %v10660_v12 = vld [vmem:[%s12774_s3 + $0x1f0] sm:$0xff]   ;;  %v10663_v50 = vld [vmem:[%s12774_s3 + $0x1a8] sm:$0xff]   ;;  %v10670_v2 = vld [vmem:[%s12774_s3 + $0x1e0] sm:$0xff]  }
 0x20a   :  { %v10658_v49 = vld [vmem:[#allocation2 + $0x30] sm:$0xff]   ;;  %v10666_v31 = vld [vmem:[%s12774_s3 + $0x1e8] sm:$0xff]   ;;  %v10662_v57 = vld [vmem:[#allocation2 + $0x38] sm:$0xff]  }
 0x20b   :  { %8795 = vst [vmem:[#allocation2 + $0x80] sm:$0xff] %v8718_v27   ;;  %v10661_v58 = vld [vmem:[#allocation2 + $0x30] sm:$0xff]   ;;  %v10673_v11 = vld [vmem:[%s12774_s3 + $0x198] sm:$0xff]  }
 0x20c   :  { %9724 = vmatmul.mubr.bf16.gmra.mxu0 %v10601_v6  ;;  %9784 = vmatmul.mubr.bf16.gmra.mxu1 %v10602_v15  ;;  %v10674_v27 = vld [vmem:[%s12774_s3 + $0x1d8] sm:$0xff]  }
 0x20d   :  { %9727 = vmatprep.mubr.msk.bf16.mxu0 %vm10810_vm0, %v12804_v52  ;;  %9787 = vmatprep.mubr.msk.bf16.mxu1 %vm10810_vm0, %v12804_v52 }
 0x214   :  { %9728 = vmatmul.mubr.bf16.gmra.mxu0 %v10605_v19  ;;  %9788 = vmatmul.mubr.bf16.gmra.mxu1 %v10606_v16 }
 0x215   :  { %9731 = vmatprep.mubr.msk.bf16.mxu0 %vm10810_vm0, %v12804_v52  ;;  %9791 = vmatprep.mubr.msk.bf16.mxu1 %vm10810_vm0, %v12804_v52 }
 0x21c   :  { %9732 = vmatmul.mubr.bf16.gmra.mxu0 %v10609_v3  ;;  %9792 = vmatmul.mubr.bf16.gmra.mxu1 %v10610_v23  ;;  %v10679_v23 = vld [vmem:[%s12774_s3 + $0x190] sm:$0xff]  }
 0x21d   :  { %9735 = vmatprep.mubr.msk.bf16.mxu0 %vm10810_vm0, %v12804_v52  ;;  %9795 = vmatprep.mubr.msk.bf16.mxu1 %vm10810_vm0, %v12804_v52 }
 0x224   :  { %9736 = vmatmul.mubr.bf16.gmra.mxu0 %v10612_v7  ;;  %9796 = vmatmul.mubr.bf16.gmra.mxu1 %v10613_v60  ;;  %v10680_v7 = vld [vmem:[%s12774_s3 + $0x1d0] sm:$0xff]  }
 0x225   :  { %9815 = vmatprep.mubr.msk.bf16.mxu0 %vm10810_vm0, %v12804_v52  ;;  %9875 = vmatprep.mubr.msk.bf16.mxu1 %vm10810_vm0, %v12804_v52 }
 0x22c   :  { %9816 = vmatmul.mubr.bf16.vlgmr.msra.gmra.mxu0 %v10615_v35  ;;  %9876 = vmatmul.mubr.bf16.vlgmr.msra.gmra.mxu1 %v10616_v28 }
 0x22d   :  { %9920 = vmatpush3.bf16.msra.mxu0 %v10617_v47  ;;  %9980 = vmatpush3.bf16.msra.mxu1 %v10618_v0  ;;  %v10664_v0 = vld [vmem:[#allocation2 + $0x38] sm:$0xff]  }
 0x22e   :  { %9819 = vmatprep.mubr.msk.bf16.mxu0 %vm10810_vm0, %v12804_v52  ;;  %9879 = vmatprep.mubr.msk.bf16.mxu1 %vm10810_vm0, %v12804_v52 }
 0x22f   :  { %9921 = vmatprep.subr.bf16.mxu0 %v12804_v52  ;;  %9981 = vmatprep.subr.bf16.mxu1 %v12804_v52 }
 0x231   :  { %9922 = vmatpush3.bf16.msra.mxu0 %v10621_v41  ;;  %9982 = vmatpush3.bf16.msra.mxu1 %v10622_v4  ;;  %v10665_v41 = vld [vmem:[#allocation2 + $0x40] sm:$0xff]   ;;  %v10683_v4 = vld [vmem:[%s12774_s3 + $0x188] sm:$0xff]  }
 0x232   :  { %9923 = vmatprep.subr.bf16.mxu0 %v12804_v52  ;;  %9983 = vmatprep.subr.bf16.mxu1 %v12804_v52 }
 0x234   :  { %9820 = vmatmul.mubr.bf16.gmra.mxu0 %v10619_v10  ;;  %9880 = vmatmul.mubr.bf16.gmra.mxu1 %v10620_v29 }
 0x235   :  { %9823 = vmatprep.mubr.msk.bf16.mxu0 %vm10810_vm0, %v12804_v52  ;;  %9883 = vmatprep.mubr.msk.bf16.mxu1 %vm10810_vm0, %v12804_v52 }
 0x236   :  { %9924 = vmatpush3.bf16.msra.mxu0 %v10625_v30  ;;  %9984 = vmatpush3.bf16.msra.mxu1 %v10628_v8  ;;  %v10684_v30 = vld [vmem:[%s12774_s3 + $0x1c8] sm:$0xff]  }
 0x237   :  { %9925 = vmatprep.subr.bf16.mxu0 %v12804_v52  ;;  %9985 = vmatprep.subr.bf16.mxu1 %v12804_v52 }
 0x23a   :  { %9926 = vmatpush3.bf16.msra.mxu0 %v10631_v37  ;;  %9986 = vmatpush3.bf16.msra.mxu1 %v10632_v1 }
 0x23b   :  { %9927 = vmatprep.subr.bf16.mxu0 %v12804_v52  ;;  %9987 = vmatprep.subr.bf16.mxu1 %v12804_v52 }
 0x23c   :  { %9824 = vmatmul.mubr.bf16.gmra.mxu0 %v10623_v40  ;;  %9884 = vmatmul.mubr.bf16.gmra.mxu1 %v10624_v17  ;;  %v10690_v40 = vld [vmem:[%s12774_s3 + $0x1c0] sm:$0xff]  }
 0x23d   :  { %9827 = vmatprep.mubr.msk.bf16.mxu0 %vm10810_vm0, %v12804_v52  ;;  %9887 = vmatprep.mubr.msk.bf16.mxu1 %vm10810_vm0, %v12804_v52 }
 0x23e   :  { %9928 = vmatpush3.bf16.msra.mxu0 %v10635_v32  ;;  %9988 = vmatpush3.bf16.msra.mxu1 %v10636_v48  ;;  %v10687_v32 = vld [vmem:[%s12774_s3 + $0x180] sm:$0xff]  }
 0x23f   :  { %9929 = vmatprep.subr.bf16.mxu0 %v12804_v52  ;;  %9989 = vmatprep.subr.bf16.mxu1 %v12804_v52 }
 0x242   :  { %9930 = vmatpush3.bf16.msra.mxu0 %v10641_v55  ;;  %9990 = vmatpush3.bf16.msra.mxu1 %v10642_v5 }
 0x243   :  { %9931 = vmatprep.subr.bf16.mxu0 %v12804_v52  ;;  %9991 = vmatprep.subr.bf16.mxu1 %v12804_v52 }
 0x244   :  { %9828 = vmatmul.mubr.bf16.gmra.mxu0 %v10626_v36  ;;  %9888 = vmatmul.mubr.bf16.gmra.mxu1 %v10627_v20  ;;  %v10667_v20 = vld [vmem:[#allocation2 + $0x40] sm:$0xff]  }
 0x245   :  { %9831 = vmatprep.mubr.msk.bf16.mxu0 %vm10810_vm0, %v12804_v52  ;;  %9891 = vmatprep.mubr.msk.bf16.mxu1 %vm10810_vm0, %v12804_v52 }
 0x246   :  { %9932 = vmatpush3.bf16.msra.mxu0 %v10645_v38  ;;  %9992 = vmatpush3.bf16.msra.mxu1 %v10646_v45  ;;  %v10668_v38 = vld [vmem:[#allocation2 + $0x48] sm:$0xff]  }
 0x247   :  { %9933 = vmatprep.subr.bf16.mxu0 %v12804_v52  ;;  %9993 = vmatprep.subr.bf16.mxu1 %v12804_v52 }
 0x24a   :  { %9934 = vmatpush3.bf16.msra.mxu0 %v10649_v59  ;;  %9994 = vmatpush3.bf16.msra.mxu1 %v10652_v21 }
 0x24b   :  { %10039 = vmatprep.subr.bf16.mxu0 %v12804_v52  ;;  %10099 = vmatprep.subr.bf16.mxu1 %v12804_v52 }
 0x24c   :  { %9832 = vmatmul.mubr.bf16.gmra.mxu0 %v10629_v26  ;;  %9892 = vmatmul.mubr.bf16.gmra.mxu1 %v10630_v56 }
 0x24d   :  { %9835 = vmatprep.mubr.msk.bf16.mxu0 %vm10810_vm0, %v12804_v52  ;;  %9895 = vmatprep.mubr.msk.bf16.mxu1 %vm10810_vm0, %v12804_v52 }
 0x254   :  { %9836 = vmatmul.mubr.bf16.gmra.mxu0 %v10633_v61  ;;  %9896 = vmatmul.mubr.bf16.gmra.mxu1 %v10634_v46 }
 0x255   :  { %9839 = vmatprep.mubr.msk.bf16.mxu0 %vm10810_vm0, %v12804_v52  ;;  %9899 = vmatprep.mubr.msk.bf16.mxu1 %vm10810_vm0, %v12804_v52 }
 0x25c   :  { %9840 = vmatmul.mubr.bf16.gmra.mxu0 %v10637_v25  ;;  %9900 = vmatmul.mubr.bf16.gmra.mxu1 %v10638_v14 }
 0x25d   :  { %9843 = vmatprep.mubr.msk.bf16.mxu0 %vm10810_vm0, %v12804_v52  ;;  %9903 = vmatprep.mubr.msk.bf16.mxu1 %vm10810_vm0, %v12804_v52 }
 0x264   :  { %9844 = vmatmul.mubr.bf16.gmra.mxu0 %v10639_v51  ;;  %9904 = vmatmul.mubr.bf16.gmra.mxu1 %v10640_v53  ;;  %v10671_v53 = vld [vmem:[#allocation2 + $0x48] sm:$0xff]  }
 0x265   :  { %9847 = vmatprep.mubr.msk.bf16.mxu0 %vm10810_vm0, %v12804_v52  ;;  %9907 = vmatprep.mubr.msk.bf16.mxu1 %vm10810_vm0, %v12804_v52 }
 0x26c   :  { %9848 = vmatmul.mubr.bf16.gmra.mxu0 %v10643_v63  ;;  %9908 = vmatmul.mubr.bf16.gmra.mxu1 %v10644_v18  ;;  %v10672_v63 = vld [vmem:[#allocation2 + $0x50] sm:$0xff]  }
 0x26d   :  { %9851 = vmatprep.mubr.msk.bf16.mxu0 %vm10810_vm0, %v12804_v52  ;;  %9911 = vmatprep.mubr.msk.bf16.mxu1 %vm10810_vm0, %v12804_v52 }
 0x274   :  { %9852 = vmatmul.mubr.bf16.gmra.mxu0 %v10647_v34  ;;  %9912 = vmatmul.mubr.bf16.gmra.mxu1 %v10648_v9 }
 0x275   :  { %9855 = vmatprep.mubr.msk.bf16.mxu0 %vm10810_vm0, %v12804_v52  ;;  %9915 = vmatprep.mubr.msk.bf16.mxu1 %vm10810_vm0, %v12804_v52 }
 0x27c   :  { %9856 = vmatmul.mubr.bf16.gmra.mxu0 %v10650_v33  ;;  %9916 = vmatmul.mubr.bf16.gmra.mxu1 %v10651_v24 }
 0x27d   :  { %9935 = vmatprep.mubr.msk.bf16.mxu0 %vm10810_vm0, %v12804_v52  ;;  %9995 = vmatprep.mubr.msk.bf16.mxu1 %vm10810_vm0, %v12804_v52 }
 0x284   :  { %9936 = vmatmul.mubr.bf16.vlgmr.msra.gmra.mxu0 %v10653_v39  ;;  %9996 = vmatmul.mubr.bf16.vlgmr.msra.gmra.mxu1 %v10654_v13 }
 0x285   :  { %10040 = vmatpush3.bf16.msra.mxu0 %v10655_v54  ;;  %10100 = vmatpush3.bf16.msra.mxu1 %v10656_v22 }
 0x286   :  { %9939 = vmatprep.mubr.msk.bf16.mxu0 %vm10810_vm0, %v12804_v52  ;;  %9999 = vmatprep.mubr.msk.bf16.mxu1 %vm10810_vm0, %v12804_v52 }
 0x287   :  { %10041 = vmatprep.subr.bf16.mxu0 %v12804_v52  ;;  %10101 = vmatprep.subr.bf16.mxu1 %v12804_v52 }
 0x289   :  { %10042 = vmatpush3.bf16.msra.mxu0 %v10659_v44  ;;  %10102 = vmatpush3.bf16.msra.mxu1 %v10660_v12  ;;  %v10675_v12 = vld [vmem:[#allocation2 + $0x50] sm:$0xff]  }
 0x28a   :  { %10043 = vmatprep.subr.bf16.mxu0 %v12804_v52  ;;  %10103 = vmatprep.subr.bf16.mxu1 %v12804_v52 }
 0x28c   :  { %9940 = vmatmul.mubr.bf16.gmra.mxu0 %v10657_v43  ;;  %10000 = vmatmul.mubr.bf16.gmra.mxu1 %v10658_v49  ;;  %v10676_v43 = vld [vmem:[#allocation2 + $0x58] sm:$0xff]  }
 0x28d   :  { %9943 = vmatprep.mubr.msk.bf16.mxu0 %vm10810_vm0, %v12804_v52  ;;  %10003 = vmatprep.mubr.msk.bf16.mxu1 %vm10810_vm0, %v12804_v52 }
 0x28e   :  { %10044 = vmatpush3.bf16.msra.mxu0 %v10663_v50  ;;  %10104 = vmatpush3.bf16.msra.mxu1 %v10666_v31 }
 0x28f   :  { %10045 = vmatprep.subr.bf16.mxu0 %v12804_v52  ;;  %10105 = vmatprep.subr.bf16.mxu1 %v12804_v52 }
 0x291   :  { %v3822_v42 = vpop.f32.mrf.mxu0 }
 0x292   :  { %10046 = vmatpush3.bf16.msra.mxu0 %v10669_v62  ;;  %10106 = vmatpush3.bf16.msra.mxu1 %v10670_v2 }
 0x293   :  { %10047 = vmatprep.subr.bf16.mxu0 %v12804_v52  ;;  %10107 = vmatprep.subr.bf16.mxu1 %v12804_v52  ;;  %v9697_v15 = vpop.f32.mrf.mxu0  ;;  %v4057_v6 = vpop.f32.mrf.mxu1 }
 0x294   :  { %9944 = vmatmul.mubr.bf16.gmra.mxu0 %v10661_v58  ;;  %10004 = vmatmul.mubr.bf16.gmra.mxu1 %v10662_v57  ;;  %v12229_v19 = vadd.f32 %v4057_v6, %v3822_v42  ;;  %v10677_v15 = vld [vmem:[#allocation2 + $0x58] sm:$0xff]   ;;  %v10678_v6 = vld [vmem:[#allocation2 + $0x60] sm:$0xff]  }
 0x295   :  { %9947 = vmatprep.mubr.msk.bf16.mxu0 %vm10810_vm0, %v12804_v52  ;;  %10007 = vmatprep.mubr.msk.bf16.mxu1 %vm10810_vm0, %v12804_v52  ;;  %v3825_v16 = vpop.f32.mrf.mxu0  ;;  %v9757_v3 = vpop.f32.mrf.mxu1 }
 0x296   :  { %10048 = vmatpush3.bf16.msra.mxu0 %v10673_v11  ;;  %10108 = vmatpush3.bf16.msra.mxu1 %v10674_v27 }
 0x297   :  { %10049 = vmatprep.subr.bf16.mxu0 %v12804_v52  ;;  %10109 = vmatprep.subr.bf16.mxu1 %v12804_v52  ;;  %v9698_v60 = vpop.f32.mrf.mxu0  ;;  %v4060_v47 = vpop.f32.mrf.mxu1 }
 0x298   :  { %v12243_v35 = vadd.f32 %v4060_v47, %v3825_v16 }
 0x299   :  { %v9758_v28 = vpop.f32.mrf.mxu1 }
 0x29a   :  { %10050 = vmatpush3.bf16.msra.mxu0 %v10679_v23  ;;  %10110 = vmatpush3.bf16.msra.mxu1 %v10680_v7 }
 0x29b   :  { %10051 = vmatprep.subr.bf16.mxu0 %v12804_v52  ;;  %10111 = vmatprep.subr.bf16.mxu1 %v12804_v52  ;;  %v3830_v10 = vpop.f32.mrf.mxu0 }
 0x29c   :  { %v4065_v8 = vpop.f32.mrf.mxu1  ;;  %9948 = vmatmul.mubr.bf16.gmra.mxu0 %v10664_v0  ;;  %10008 = vmatmul.mubr.bf16.gmra.mxu1 %v10665_v41 }
 0x29d   :  { %v12253_v29 = vadd.f32 %v4065_v8, %v3830_v10  ;;  %9951 = vmatprep.mubr.msk.bf16.mxu0 %vm10810_vm0, %v12804_v52  ;;  %10011 = vmatprep.mubr.msk.bf16.mxu1 %vm10810_vm0, %v12804_v52  ;;  %v9701_v37 = vpop.f32.mrf.mxu0  ;;  %v10682_v10 = vld [vmem:[#allocation2 + $0x68] sm:$0xff]  }
 0x29e   :  { %v9761_v1 = vpop.f32.mrf.mxu1  ;;  %10052 = vmatpush3.bf16.msra.mxu0 %v10683_v4  ;;  %10112 = vmatpush3.bf16.msra.mxu1 %v10684_v30  ;;  %v10681_v30 = vld [vmem:[#allocation2 + $0x60] sm:$0xff]  }
 0x29f   :  { %10053 = vmatprep.subr.bf16.mxu0 %v12804_v52  ;;  %10113 = vmatprep.subr.bf16.mxu1 %v12804_v52  ;;  %v3833_v17 = vpop.f32.mrf.mxu0 }
 0x2a0   :  { %v4068_v48 = vpop.f32.mrf.mxu1 }
 0x2a1   :  { %v12267_v55 = vadd.f32 %v4068_v48, %v3833_v17  ;;  %v9702_v5 = vpop.f32.mrf.mxu0 }
 0x2a2   :  { %v9762_v36 = vpop.f32.mrf.mxu1  ;;  %10054 = vmatpush3.bf16.msra.mxu0 %v10687_v32  ;;  %10114 = vmatpush3.bf16.msra.mxu1 %v10690_v40 }
 0x2a4   :  { %v3838_v45 = vpop.f32.mrf.mxu0  ;;  %v4073_v59 = vpop.f32.mrf.mxu1  ;;  %9952 = vmatmul.mubr.bf16.gmra.mxu0 %v10667_v20  ;;  %10012 = vmatmul.mubr.bf16.gmra.mxu1 %v10668_v38  ;;  %v10685_v38 = vld [vmem:[#allocation2 + $0x68] sm:$0xff]  }
 0x2a5   :  { %v12269_v21 = vadd.f32 %v4073_v59, %v3838_v45  ;;  %9955 = vmatprep.mubr.msk.bf16.mxu0 %vm10810_vm0, %v12804_v52  ;;  %10015 = vmatprep.mubr.msk.bf16.mxu1 %vm10810_vm0, %v12804_v52  ;;  %v10686_v45 = vld [vmem:[#allocation2 + $0x70] sm:$0xff]  }
 0x2a6   :  { %v9705_v26 = vpop.f32.mrf.mxu0  ;;  %v9765_v56 = vpop.f32.mrf.mxu1 }
 0x2a8   :  { %v3841_v61 = vpop.f32.mrf.mxu0  ;;  %v4076_v46 = vpop.f32.mrf.mxu1 }
 0x2a9   :  { %v12275_v25 = vadd.f32 %v4076_v46, %v3841_v61 }
 0x2aa   :  { %v9706_v14 = vpop.f32.mrf.mxu0  ;;  %v9766_v51 = vpop.f32.mrf.mxu1 }
 0x2ac   :  { %v3846_v18 = vpop.f32.mrf.mxu0  ;;  %v4081_v34 = vpop.f32.mrf.mxu1  ;;  %9956 = vmatmul.mubr.bf16.gmra.mxu0 %v10671_v53  ;;  %10016 = vmatmul.mubr.bf16.gmra.mxu1 %v10672_v63 }
 0x2ad   :  { %v12277_v9 = vadd.f32 %v4081_v34, %v3846_v18  ;;  %9959 = vmatprep.mubr.msk.bf16.mxu0 %vm10810_vm0, %v12804_v52  ;;  %10019 = vmatprep.mubr.msk.bf16.mxu1 %vm10810_vm0, %v12804_v52  ;;  %v10688_v34 = vld [vmem:[#allocation2 + $0x70] sm:$0xff]  }
 0x2ae   :  { %v9709_v33 = vpop.f32.mrf.mxu0  ;;  %v9769_v24 = vpop.f32.mrf.mxu1 }
 0x2af   :  { %v10689_v33 = vld [vmem:[#allocation2 + $0x78] sm:$0xff]  }
 0x2b0   :  { %v3849_v54 = vpop.f32.mrf.mxu0  ;;  %v4084_v22 = vpop.f32.mrf.mxu1 }
 0x2b1   :  { %v12283_v39 = vadd.f32 %v4084_v22, %v3849_v54 }
 0x2b2   :  { %v9710_v13 = vpop.f32.mrf.mxu0  ;;  %v9770_v44 = vpop.f32.mrf.mxu1 }
 0x2b4   :  { %v3854_v49 = vpop.f32.mrf.mxu0  ;;  %v4089_v50 = vpop.f32.mrf.mxu1  ;;  %9960 = vmatmul.mubr.bf16.gmra.mxu0 %v10675_v12  ;;  %10020 = vmatmul.mubr.bf16.gmra.mxu1 %v10676_v43 }
 0x2b5   :  { %v12285_v31 = vadd.f32 %v4089_v50, %v3854_v49  ;;  %9963 = vmatprep.mubr.msk.bf16.mxu0 %vm10810_vm0, %v12804_v52  ;;  %10023 = vmatprep.mubr.msk.bf16.mxu1 %vm10810_vm0, %v12804_v52 }
 0x2b6   :  { %v9713_v62 = vpop.f32.mrf.mxu0  ;;  %v9773_v2 = vpop.f32.mrf.mxu1 }
 0x2b7   :  { %v10691_v2 = vld [vmem:[#allocation2 + $0x30] sm:$0xff]  }
 0x2b8   :  { %v3857_v58 = vpop.f32.mrf.mxu0  ;;  %v4092_v42 = vpop.f32.mrf.mxu1 }
 0x2b9   :  { %v12291_v57 = vadd.f32 %v4092_v42, %v3857_v58  ;;  %v10692_v58 = vld [vmem:[#allocation2 + $0x38] sm:$0xff]  }
 0x2ba   :  { %v9714_v11 = vpop.f32.mrf.mxu0  ;;  %v9774_v27 = vpop.f32.mrf.mxu1 }
 0x2bc   :  { %v3862_v16 = vpop.f32.mrf.mxu0  ;;  %v4097_v3 = vpop.f32.mrf.mxu1  ;;  %9964 = vmatmul.mubr.bf16.gmra.mxu0 %v10677_v15  ;;  %10024 = vmatmul.mubr.bf16.gmra.mxu1 %v10678_v6 }
 0x2bd   :  { %v12293_v23 = vadd.f32 %v4097_v3, %v3862_v16  ;;  %9967 = vmatprep.mubr.msk.bf16.mxu0 %vm10810_vm0, %v12804_v52  ;;  %10027 = vmatprep.mubr.msk.bf16.mxu1 %vm10810_vm0, %v12804_v52 }
 0x2be   :  { %v9717_v7 = vpop.f32.mrf.mxu0  ;;  %v9777_v60 = vpop.f32.mrf.mxu1 }
 0x2c0   :  { %v3865_v47 = vpop.f32.mrf.mxu0  ;;  %v4100_v0 = vpop.f32.mrf.mxu1 }
 0x2c1   :  { %v12299_v28 = vadd.f32 %v4100_v0, %v3865_v47  ;;  %v10693_v0 = vld [vmem:[#allocation2 + $0x38] sm:$0xff]  }
 0x2c2   :  { %v9718_v41 = vpop.f32.mrf.mxu0  ;;  %v9778_v4 = vpop.f32.mrf.mxu1 }
 0x2c3   :  { %v10694_v41 = vld [vmem:[#allocation2 + $0x40] sm:$0xff]  }
 0x2c4   :  { %v3870_v8 = vpop.f32.mrf.mxu0  ;;  %v4105_v37 = vpop.f32.mrf.mxu1  ;;  %9968 = vmatmul.mubr.bf16.gmra.mxu0 %v10681_v30  ;;  %10028 = vmatmul.mubr.bf16.gmra.mxu1 %v10682_v10 }
 0x2c5   :  { %v12301_v1 = vadd.f32 %v4105_v37, %v3870_v8  ;;  %9971 = vmatprep.mubr.msk.bf16.mxu0 %vm10810_vm0, %v12804_v52  ;;  %10031 = vmatprep.mubr.msk.bf16.mxu1 %vm10810_vm0, %v12804_v52 }
 0x2c6   :  { %v9721_v32 = vpop.f32.mrf.mxu0  ;;  %v9781_v40 = vpop.f32.mrf.mxu1 }
 0x2c8   :  { %v3873_v17 = vpop.f32.mrf.mxu0  ;;  %v4108_v48 = vpop.f32.mrf.mxu1 }
 0x2c9   :  { %v12307_v5 = vadd.f32 %v4108_v48, %v3873_v17 }
 0x2ca   :  { %v9722_v36 = vpop.f32.mrf.mxu0  ;;  %v9782_v20 = vpop.f32.mrf.mxu1 }
 0x2cb   :  { %v10695_v20 = vld [vmem:[#allocation2 + $0x40] sm:$0xff]  }
 0x2cc   :  { %v3878_v59 = vpop.f32.mrf.mxu0  ;;  %v4113_v26 = vpop.f32.mrf.mxu1  ;;  %9972 = vmatmul.mubr.bf16.gmra.mxu0 %v10685_v38  ;;  %10032 = vmatmul.mubr.bf16.gmra.mxu1 %v10686_v45  ;;  %v10696_v38 = vld [vmem:[#allocation2 + $0x48] sm:$0xff]  }
 0x2cd   :  { %v12309_v56 = vadd.f32 %v4113_v26, %v3878_v59  ;;  %9975 = vmatprep.mubr.msk.bf16.mxu0 %vm10810_vm0, %v12804_v52  ;;  %10035 = vmatprep.mubr.msk.bf16.mxu1 %vm10810_vm0, %v12804_v52 }
 0x2ce   :  { %v9725_v61 = vpop.f32.mrf.mxu0  ;;  %v9785_v46 = vpop.f32.mrf.mxu1 }
 0x2d0   :  { %v3881_v14 = vpop.f32.mrf.mxu0  ;;  %v4116_v51 = vpop.f32.mrf.mxu1 }
 0x2d1   :  { %v12315_v53 = vadd.f32 %v4116_v51, %v3881_v14 }
 0x2d2   :  { %v9726_v63 = vpop.f32.mrf.mxu0  ;;  %v9786_v18 = vpop.f32.mrf.mxu1 }
 0x2d3   :  { %v10697_v18 = vld [vmem:[#allocation2 + $0x48] sm:$0xff]  }
 0x2d4   :  { %v3886_v24 = vpop.f32.mrf.mxu0  ;;  %v4121_v54 = vpop.f32.mrf.mxu1  ;;  %9976 = vmatmul.mubr.bf16.gmra.mxu0 %v10688_v34  ;;  %10036 = vmatmul.mubr.bf16.gmra.mxu1 %v10689_v33  ;;  %v10698_v34 = vld [vmem:[#allocation2 + $0x50] sm:$0xff]   ;;  %v10713_v33 = vld [vmem:[%s12776_s5 + $0x78] sm:$0xff]  }
 0x2d5   :  { %v12317_v22 = vadd.f32 %v4121_v54, %v3886_v24  ;;  %10055 = vmatprep.mubr.msk.bf16.mxu0 %vm10810_vm0, %v12804_v52  ;;  %10115 = vmatprep.mubr.msk.bf16.mxu1 %vm10810_vm0, %v12804_v52  ;;  %v10714_v24 = vld [vmem:[%s12776_s5 + $0x38] sm:$0xff]  }
 0x2d6   :  { %v9729_v13 = vpop.f32.mrf.mxu0  ;;  %v9789_v44 = vpop.f32.mrf.mxu1  ;;  %10159 = vmatprep.subr.bf16.mxu0 %v10713_v33  ;;  %10183 = vmatprep.subr.bf16.mxu1 %v10714_v24 }
 0x2d8   :  { %v3889_v12 = vpop.f32.mrf.mxu0  ;;  %v4124_v43 = vpop.f32.mrf.mxu1 }
 0x2d9   :  { %v12323_v49 = vadd.f32 %v4124_v43, %v3889_v12 }
 0x2da   :  { %v9730_v50 = vpop.f32.mrf.mxu0  ;;  %v9790_v62 = vpop.f32.mrf.mxu1 }
 0x2dc   :  { %v3894_v42 = vpop.f32.mrf.mxu0  ;;  %v4129_v11 = vpop.f32.mrf.mxu1  ;;  %10056 = vmatmul.mubr.bf16.vlgmr.msra.gmra.mxu0 %v10691_v2  ;;  %10116 = vmatmul.mubr.bf16.vlgmr.msra.gmra.mxu1 %v10692_v58 }
 0x2dd   :  { %v12325_v27 = vadd.f32 %v4129_v11, %v3894_v42  ;;  %10059 = vmatprep.mubr.msk.bf16.mxu0 %vm10810_vm0, %v12804_v52  ;;  %10119 = vmatprep.mubr.msk.bf16.mxu1 %vm10810_vm0, %v12804_v52  ;;  %v10699_v11 = vld [vmem:[#allocation2 + $0x50] sm:$0xff]  }
 0x2de   :  { %v9733_v15 = vpop.f32.mrf.mxu0  ;;  %v9793_v6 = vpop.f32.mrf.mxu1  ;;  %10160 = vmatpush3.bf16.msra.mxu0 %v10713_v33  ;;  %10184 = vmatpush3.bf16.msra.mxu1 %v10714_v24  ;;  %v10703_v33 = vld [vmem:[#allocation2 + $0x60] sm:$0xff]  }
 0x2df   :  { %v10700_v15 = vld [vmem:[#allocation2 + $0x58] sm:$0xff]  }
 0x2e0   :  { %v3897_v16 = vpop.f32.mrf.mxu0  ;;  %v4132_v3 = vpop.f32.mrf.mxu1 }
 0x2e1   :  { %v12331_v7 = vadd.f32 %v4132_v3, %v3897_v16 }
 0x2e2   :  { %v9734_v60 = vpop.f32.mrf.mxu0  ;;  %v9794_v47 = vpop.f32.mrf.mxu1 }
 0x2e3   :  { %v10715_v60 = vld [vmem:[%s12776_s5 + $0x70] sm:$0xff]  }
 0x2e4   :  { %v3902_v4 = vpop.f32.mrf.mxu0  ;;  %v4137_v30 = vpop.f32.mrf.mxu1  ;;  %10060 = vmatmul.mubr.bf16.gmra.mxu0 %v10693_v0  ;;  %10120 = vmatmul.mubr.bf16.gmra.mxu1 %v10694_v41  ;;  %v10716_v47 = vld [vmem:[%s12776_s5 + $0x30] sm:$0xff]  }
 0x2e5   :  { %v12333_v10 = vadd.f32 %v4137_v30, %v3902_v4  ;;  %10063 = vmatprep.mubr.msk.bf16.mxu0 %vm10810_vm0, %v12804_v52  ;;  %10123 = vmatprep.mubr.msk.bf16.mxu1 %vm10810_vm0, %v12804_v52 }
 0x2e6   :  { %v9737_v8 = vpop.f32.mrf.mxu0  ;;  %v9797_v37 = vpop.f32.mrf.mxu1  ;;  %10161 = vmatprep.subr.bf16.mxu0 %v10715_v60  ;;  %10185 = vmatprep.subr.bf16.mxu1 %v10716_v47 }
 0x2e7   :  { %10162 = vmatpush3.bf16.msra.mxu0 %v10715_v60  ;;  %10186 = vmatpush3.bf16.msra.mxu1 %v10716_v47  ;;  %v10720_v47 = vld [vmem:[%s12776_s5 + $0x20] sm:$0xff]  }
 0x2e8   :  { %v3905_v32 = vpop.f32.mrf.mxu0  ;;  %v4140_v40 = vpop.f32.mrf.mxu1 }
 0x2e9   :  { %v12339_v17 = vadd.f32 %v4140_v40, %v3905_v32  ;;  %v10701_v40 = vld [vmem:[#allocation2 + $0x58] sm:$0xff]  }
 0x2ea   :  { %v9738_v48 = vpop.f32.mrf.mxu0  ;;  %v9798_v36 = vpop.f32.mrf.mxu1 }
 0x2eb   :  { %v10702_v48 = vld [vmem:[#allocation2 + $0x60] sm:$0xff]  }
 0x2ec   :  { %v4332_v45 = vpop.f32.mrf.mxu0  ;;  %v4629_v59 = vpop.f32.mrf.mxu1  ;;  %10064 = vmatmul.mubr.bf16.gmra.mxu0 %v10695_v20  ;;  %10124 = vmatmul.mubr.bf16.gmra.mxu1 %v10696_v38 }
 0x2ed   :  { %v4419_v26 = vadd.f32 %v4332_v45, %v12229_v19  ;;  %10067 = vmatprep.mubr.msk.bf16.mxu0 %vm10810_vm0, %v12804_v52  ;;  %10127 = vmatprep.mubr.msk.bf16.mxu1 %vm10810_vm0, %v12804_v52  ;;  %v10717_v45 = vld [vmem:[%s12776_s5 + $0x68] sm:$0xff]  }
 0x2ee   :  { %v9817_v61 = vpop.f32.mrf.mxu0  ;;  %v9877_v46 = vpop.f32.mrf.mxu1  ;;  %10163 = vmatprep.subr.bf16.mxu0 %v10717_v45 }
 0x2ef   :  { %v12346_v14 = vadd.f32 %v4629_v59, %v4419_v26  ;;  %10164 = vmatpush3.bf16.msra.mxu0 %v10717_v45  ;;  %v10721_v45 = vld [vmem:[%s12776_s5 + $0x58] sm:$0xff]  }
 0x2f0   :  { %v4335_v51 = vpop.f32.mrf.mxu0  ;;  %v4632_v63 = vpop.f32.mrf.mxu1 }
 0x2f1   :  { %v4420_v19 = vadd.f32 %v4335_v51, %v12243_v35 }
 0x2f2   :  { %v9818_v54 = vpop.f32.mrf.mxu0  ;;  %v9878_v13 = vpop.f32.mrf.mxu1 }
 0x2f3   :  { %v12355_v44 = vadd.f32 %v4632_v63, %v4420_v19  ;;  %v10718_v63 = vld [vmem:[%s12776_s5 + $0x28] sm:$0xff]  }
 0x2f4   :  { %v4340_v12 = vpop.f32.mrf.mxu0  ;;  %v4637_v43 = vpop.f32.mrf.mxu1  ;;  %10068 = vmatmul.mubr.bf16.gmra.mxu0 %v10697_v18  ;;  %10128 = vmatmul.mubr.bf16.gmra.mxu1 %v10698_v34 }
 0x2f5   :  { %v4421_v50 = vadd.f32 %v4340_v12, %v12253_v29  ;;  %10071 = vmatprep.mubr.msk.bf16.mxu0 %vm10810_vm0, %v12804_v52  ;;  %10131 = vmatprep.mubr.msk.bf16.mxu1 %vm10810_vm0, %v12804_v52 }
 0x2f6   :  { %v9821_v35 = vpop.f32.mrf.mxu0  ;;  %v9881_v62 = vpop.f32.mrf.mxu1  ;;  %10187 = vmatprep.subr.bf16.mxu1 %v10718_v63 }
 0x2f7   :  { %v12362_v2 = vadd.f32 %v4637_v43, %v4421_v50  ;;  %10188 = vmatpush3.bf16.msra.mxu1 %v10718_v63 }
 0x2f8   :  { %v4343_v58 = vpop.f32.mrf.mxu0  ;;  %v4640_v42 = vpop.f32.mrf.mxu1  ;;  %10189 = vmatprep.subr.bf16.mxu1 %v10720_v47 }
 0x2f9   :  { %v4422_v6 = vadd.f32 %v4343_v58, %v12267_v55  ;;  %v10719_v58 = vld [vmem:[%s12776_s5 + $0x60] sm:$0xff]  }
 0x2fa   :  { %v9822_v16 = vpop.f32.mrf.mxu0  ;;  %v9882_v3 = vpop.f32.mrf.mxu1  ;;  %10165 = vmatprep.subr.bf16.mxu0 %v10719_v58 }
 0x2fb   :  { %v12365_v29 = vadd.f32 %v4640_v42, %v4422_v6  ;;  %v10706_v6 = vld [vmem:[#allocation2 + $0x70] sm:$0xff]   ;;  %10166 = vmatpush3.bf16.msra.mxu0 %v10719_v58  ;;  %10190 = vmatpush3.bf16.msra.mxu1 %v10720_v47 }
 0x2fc   :  { %v4348_v0 = vpop.f32.mrf.mxu0  ;;  %v4645_v41 = vpop.f32.mrf.mxu1  ;;  %10072 = vmatmul.mubr.bf16.gmra.mxu0 %v10699_v11  ;;  %10132 = vmatmul.mubr.bf16.gmra.mxu1 %v10700_v15  ;;  %v10705_v15 = vld [vmem:[#allocation2 + $0x68] sm:$0xff]  }
 0x2fd   :  { %v4423_v4 = vadd.f32 %v4348_v0, %v12269_v21  ;;  %10075 = vmatprep.mubr.msk.bf16.mxu0 %vm10810_vm0, %v12804_v52  ;;  %10135 = vmatprep.mubr.msk.bf16.mxu1 %vm10810_vm0, %v12804_v52 }
 0x2fe   :  { %v9825_v55 = vpop.f32.mrf.mxu0  ;;  %v9885_v30 = vpop.f32.mrf.mxu1  ;;  %10167 = vmatprep.subr.bf16.mxu0 %v10721_v45 }
 0x2ff   :  { %v12378_v8 = vadd.f32 %v4645_v41, %v4423_v4  ;;  %10168 = vmatpush3.bf16.msra.mxu0 %v10721_v45 }
 0x300   :  { %v4351_v37 = vpop.f32.mrf.mxu0  ;;  %v4648_v32 = vpop.f32.mrf.mxu1 }
 0x301   :  { %v4424_v21 = vadd.f32 %v4351_v37, %v12275_v25 }
 0x302   :  { %v9826_v36 = vpop.f32.mrf.mxu0  ;;  %v9886_v20 = vpop.f32.mrf.mxu1 }
 0x303   :  { %v12381_v38 = vadd.f32 %v4648_v32, %v4424_v21 }
 0x304   :  { %v4356_v59 = vpop.f32.mrf.mxu0  ;;  %v4653_v26 = vpop.f32.mrf.mxu1  ;;  %10076 = vmatmul.mubr.bf16.gmra.mxu0 %v10701_v40  ;;  %10136 = vmatmul.mubr.bf16.gmra.mxu1 %v10702_v48  ;;  %v10707_v40 = vld [vmem:[#allocation2 + $0x70] sm:$0xff]   ;;  %v10708_v48 = vld [vmem:[#allocation2 + $0x78] sm:$0xff]  }
 0x305   :  { %v4425_v61 = vadd.f32 %v4356_v59, %v12277_v9  ;;  %10079 = vmatprep.mubr.msk.bf16.mxu0 %vm10810_vm0, %v12804_v52  ;;  %10139 = vmatprep.mubr.msk.bf16.mxu1 %vm10810_vm0, %v12804_v52  ;;  %v10704_v9 = vld [vmem:[#allocation2 + $0x68] sm:$0xff]   ;;  %v10722_v59 = vld [vmem:[%s12776_s5 + $0x18] sm:$0xff]  }
 0x306   :  { %v9829_v25 = vpop.f32.mrf.mxu0  ;;  %v9889_v46 = vpop.f32.mrf.mxu1  ;;  %10191 = vmatprep.subr.bf16.mxu1 %v10722_v59 }
 0x307   :  { %v12391_v51 = vadd.f32 %v4653_v26, %v4425_v61  ;;  %10192 = vmatpush3.bf16.msra.mxu1 %v10722_v59 }
 0x308   :  { %v4359_v18 = vpop.f32.mrf.mxu0  ;;  %v4656_v34 = vpop.f32.mrf.mxu1 }
 0x309   :  { %v4426_v19 = vadd.f32 %v4359_v18, %v12283_v39 }
 0x30a   :  { %v9830_v24 = vpop.f32.mrf.mxu0  ;;  %v9890_v54 = vpop.f32.mrf.mxu1 }
 0x30b   :  { %v12397_v13 = vadd.f32 %v4656_v34, %v4426_v19  ;;  %v10709_v19 = vld [vmem:[#allocation2 + $0x78] sm:$0xff]   ;;  %v10710_v24 = vld [vmem:[#allocation2 + $0x80] sm:$0xff]  }
 0x30c   :  { %v4364_v12 = vpop.f32.mrf.mxu0  ;;  %v4661_v43 = vpop.f32.mrf.mxu1  ;;  %10080 = vmatmul.mubr.bf16.gmra.mxu0 %v10703_v33  ;;  %10140 = vmatmul.mubr.bf16.gmra.mxu1 %v10704_v9 }
 0x30d   :  { %v4427_v50 = vadd.f32 %v4364_v12, %v12285_v31  ;;  %10083 = vmatprep.mubr.msk.bf16.mxu0 %vm10810_vm0, %v12804_v52  ;;  %10143 = vmatprep.mubr.msk.bf16.mxu1 %vm10810_vm0, %v12804_v52 }
 0x30e   :  { %v9833_v35 = vpop.f32.mrf.mxu0  ;;  %v9893_v39 = vpop.f32.mrf.mxu1 }
 0x30f   :  { %v12404_v62 = vadd.f32 %v4661_v43, %v4427_v50 }
 0x310   :  { %v4367_v42 = vpop.f32.mrf.mxu0  ;;  %v4664_v11 = vpop.f32.mrf.mxu1 }
 0x311   :  { %v4428_v31 = vadd.f32 %v4367_v42, %v12291_v57 }
 0x312   :  { %v9834_v16 = vpop.f32.mrf.mxu0  ;;  %v9894_v3 = vpop.f32.mrf.mxu1 }
 0x313   :  { %v12410_v60 = vadd.f32 %v4664_v11, %v4428_v31  ;;  %v10711_v31 = vld [vmem:[#allocation2 + $0x80] sm:$0xff]   ;;  %v10712_v16 = vld [vmem:[#allocation2 + $0x88] sm:$0xff]  }
 0x314   :  { %v4372_v0 = vpop.f32.mrf.mxu0  ;;  %v4669_v41 = vpop.f32.mrf.mxu1  ;;  %10084 = vmatmul.mubr.bf16.gmra.mxu0 %v10705_v15  ;;  %10144 = vmatmul.mubr.bf16.gmra.mxu1 %v10706_v6 }
 0x315   :  { %v4429_v4 = vadd.f32 %v4372_v0, %v12293_v23  ;;  %10087 = vmatprep.mubr.msk.bf16.mxu0 %vm10810_vm0, %v12804_v52  ;;  %10147 = vmatprep.mubr.msk.bf16.mxu1 %vm10810_vm0, %v12804_v52 }
 0x316   :  { %v9837_v57 = vpop.f32.mrf.mxu0  ;;  %v9897_v55 = vpop.f32.mrf.mxu1 }
 0x317   :  { %v12420_v30 = vadd.f32 %v4669_v41, %v4429_v4 }
 0x318   :  { %v4375_v37 = vpop.f32.mrf.mxu0  ;;  %v4672_v32 = vpop.f32.mrf.mxu1 }
 0x319   :  { %v4430_v21 = vadd.f32 %v4375_v37, %v12299_v28 }
 0x31a   :  { %v9838_v36 = vpop.f32.mrf.mxu0  ;;  %v9898_v23 = vpop.f32.mrf.mxu1 }
 0x31b   :  { %v12423_v20 = vadd.f32 %v4672_v32, %v4430_v21 }
 0x31c   :  { %v4380_v26 = vpop.f32.mrf.mxu0  ;;  %v4677_v61 = vpop.f32.mrf.mxu1  ;;  %10088 = vmatmul.mubr.bf16.gmra.mxu0 %v10707_v40  ;;  %10148 = vmatmul.mubr.bf16.gmra.mxu1 %v10708_v48 }
 0x31d   :  { %v4431_v25 = vadd.f32 %v4380_v26, %v12301_v1  ;;  %10091 = vmatprep.mubr.msk.bf16.mxu0 %vm10810_vm0, %v12804_v52  ;;  %10151 = vmatprep.mubr.msk.bf16.mxu1 %vm10810_vm0, %v12804_v52 }
 0x31e   :  { %v9841_v28 = vpop.f32.mrf.mxu0  ;;  %v9901_v46 = vpop.f32.mrf.mxu1 }
 0x31f   :  { %v12436_v63 = vadd.f32 %v4677_v61, %v4431_v25 }
 0x320   :  { %v4383_v18 = vpop.f32.mrf.mxu0  ;;  %v4680_v34 = vpop.f32.mrf.mxu1 }
 0x321   :  { %v4432_v33 = vadd.f32 %v4383_v18, %v12307_v5 }
 0x322   :  { %v9842_v9 = vpop.f32.mrf.mxu0  ;;  %v9902_v1 = vpop.f32.mrf.mxu1 }
 0x323   :  { %v12439_v54 = vadd.f32 %v4680_v34, %v4432_v33  ;;  %v10726_v33 = vld [vmem:[%s12776_s5 + $0x8] sm:$0xff]  }
 0x324   :  { %v4388_v12 = vpop.f32.mrf.mxu0  ;;  %v4685_v43 = vpop.f32.mrf.mxu1  ;;  %10092 = vmatmul.mubr.bf16.gmra.mxu0 %v10709_v19  ;;  %10152 = vmatmul.mubr.bf16.gmra.mxu1 %v10710_v24 }
 0x325   :  { %v4433_v50 = vadd.f32 %v4388_v12, %v12309_v56  ;;  %10095 = vmatprep.mubr.msk.bf16.mxu0 %vm10810_vm0, %v12804_v52  ;;  %10155 = vmatprep.mubr.msk.bf16.mxu1 %vm10810_vm0, %v12804_v52  ;;  %v10723_v56 = vld [vmem:[%s12776_s5 + $0x50] sm:$0xff]  }
 0x326   :  { %v9845_v35 = vpop.f32.mrf.mxu0  ;;  %v9905_v5 = vpop.f32.mrf.mxu1  ;;  %v10724_v52 = vld [vmem:[%s12776_s5 + $0x10] sm:$0xff]   ;;  %10169 = vmatprep.subr.bf16.mxu0 %v10723_v56 }
 0x327   :  { %v12446_v39 = vadd.f32 %v4685_v43, %v4433_v50  ;;  %10193 = vmatprep.subr.bf16.mxu1 %v10724_v52  ;;  %10170 = vmatpush3.bf16.msra.mxu0 %v10723_v56 }
 0x328   :  { %v4391_v58 = vpop.f32.mrf.mxu0  ;;  %v4688_v42 = vpop.f32.mrf.mxu1  ;;  %10194 = vmatpush3.bf16.msra.mxu1 %v10724_v52 }
 0x329   :  { %v4434_v11 = vadd.f32 %v4391_v58, %v12315_v53  ;;  %10195 = vmatprep.subr.bf16.mxu1 %v10726_v33 }
 0x32a   :  { %v9846_v15 = vpop.f32.mrf.mxu0  ;;  %v9906_v6 = vpop.f32.mrf.mxu1 }
 0x32b   :  { %v12449_v3 = vadd.f32 %v4688_v42, %v4434_v11  ;;  %v10728_v42 = vld [vmem:[%s12776_s5] sm:$0xff]   ;;  %v12490_v11 = vld [vmem:[%s12776_s5 + $0xf8] sm:$0xff]  }
 0x32c   :  { %v4396_v47 = vpop.f32.mrf.mxu0  ;;  %v4693_v0 = vpop.f32.mrf.mxu1  ;;  %10096 = vmatmul.mubr.bf16.gmra.mxu0 %v10711_v31  ;;  %10156 = vmatmul.mubr.bf16.gmra.mxu1 %v10712_v16 }
 0x32d   :  { %v4435_v53 = vadd.f32 %v4396_v47, %v12317_v22  ;;  %v10725_v22 = vld [vmem:[%s12776_s5 + $0x48] sm:$0xff]   ;;  %10196 = vmatpush3.bf16.msra.mxu1 %v10726_v33 }
 0x32e   :  { %v9849_v41 = vpop.f32.mrf.mxu0  ;;  %v9909_v4 = vpop.f32.mrf.mxu1  ;;  %10171 = vmatprep.subr.bf16.mxu0 %v10725_v22  ;;  %10197 = vmatprep.subr.bf16.mxu1 %v10728_v42 }
 0x32f   :  { %v12458_v57 = vadd.f32 %v4693_v0, %v4435_v53  ;;  %10172 = vmatpush3.bf16.msra.mxu0 %v10725_v22 }
 0x330   :  { %v4399_v55 = vpop.f32.mrf.mxu0  ;;  %v4696_v37 = vpop.f32.mrf.mxu1 }
 0x331   :  { %v4436_v32 = vadd.f32 %v4399_v55, %v12323_v49  ;;  %10198 = vmatpush3.bf16.msra.mxu1 %v10728_v42 }
 0x332   :  { %v9850_v40 = vpop.f32.mrf.mxu0  ;;  %v9910_v48 = vpop.f32.mrf.mxu1  ;;  %10231 = vmatprep.subr.bf16.mxu1 %v12490_v11 }
 0x333   :  { %v12461_v21 = vadd.f32 %v4696_v37, %v4436_v32 }
 0x334   :  { %v4404_v36 = vpop.f32.mrf.mxu0  ;;  %v4701_v23 = vpop.f32.mrf.mxu1 }
 0x335   :  { %v4437_v45 = vadd.f32 %v4404_v36, %v12325_v27 }
 0x336   :  { %v9853_v59 = vpop.f32.mrf.mxu0  ;;  %v9913_v26 = vpop.f32.mrf.mxu1 }
 0x337   :  { %v12467_v61 = vadd.f32 %v4701_v23, %v4437_v45 }
 0x338   :  { %v4407_v25 = vpop.f32.mrf.mxu0  ;;  %v4704_v49 = vpop.f32.mrf.mxu1 }
 0x339   :  { %v4438_v28 = vadd.f32 %v4407_v25, %v12331_v7 }
 0x33a   :  { %v9854_v46 = vpop.f32.mrf.mxu0  ;;  %v9914_v18 = vpop.f32.mrf.mxu1 }
 0x33b   :  { %v12470_v34 = vadd.f32 %v4704_v49, %v4438_v28 }
 0x33c   :  { %v4412_v9 = vpop.f32.mrf.mxu0  ;;  %v4709_v27 = vpop.f32.mrf.mxu1 }
 0x33d   :  { %v4439_v1 = vadd.f32 %v4412_v9, %v12333_v10  ;;  %v10729_v10 = vld [vmem:[%s12776_s5 + $0x40] sm:$0xff]  }
 0x33e   :  { %v9857_v19 = vpop.f32.mrf.mxu0  ;;  %v9917_v24 = vpop.f32.mrf.mxu1  ;;  %10173 = vmatprep.subr.bf16.mxu0 %v10729_v10 }
 0x33f   :  { %v12476_v12 = vadd.f32 %v4709_v27, %v4439_v1  ;;  %10174 = vmatpush3.bf16.msra.mxu0 %v10729_v10 }
 0x340   :  { %v4415_v43 = vpop.f32.mrf.mxu0  ;;  %v4712_v7 = vpop.f32.mrf.mxu1 }
 0x341   :  { %v4440_v50 = vadd.f32 %v4415_v43, %v12339_v17 }
 0x342   :  { %v9858_v35 = vpop.f32.mrf.mxu0  ;;  %v9918_v5 = vpop.f32.mrf.mxu1 }
 0x343   :  { %v12479_v58 = vadd.f32 %v4712_v7, %v4440_v50 }
 0x344   :  { %v4926_v15 = vpop.f32.mrf.mxu0  ;;  %v5223_v6 = vpop.f32.mrf.mxu1 }
 0x345   :  { %v5013_v17 = vadd.f32 %v4926_v15, %v12346_v14  ;;  %v12502_v14 = vld [vmem:[%s12776_s5 + $0xb8] sm:$0xff]  }
 0x346   :  { %v9937_v31 = vpop.f32.mrf.mxu0  ;;  %v9997_v16 = vpop.f32.mrf.mxu1  ;;  %10207 = vmatprep.subr.bf16.mxu0 %v12502_v14 }
 0x347   :  { %v12493_v56 = vadd.f32 %v5223_v6, %v5013_v17 }
 0x348   :  { %v4929_v52 = vpop.f32.mrf.mxu0  ;;  %v5226_v47 = vpop.f32.mrf.mxu1 }
 0x349   :  { %v5014_v0 = vadd.f32 %v4929_v52, %v12355_v44 }
 0x34a   :  { %v9938_v53 = vpop.f32.mrf.mxu0  ;;  %v9998_v41 = vpop.f32.mrf.mxu1 }
 0x34b   :  { %v12497_v4 = vadd.f32 %v5226_v47, %v5014_v0 }
 0x34c   :  { %v4934_v55 = vpop.f32.mrf.mxu0  ;;  %v5231_v37 = vpop.f32.mrf.mxu1 }
 0x34d   :  { %v5015_v32 = vadd.f32 %v4934_v55, %v12362_v2 }
 0x34e   :  { %v9941_v40 = vpop.f32.mrf.mxu0  ;;  %v10001_v48 = vpop.f32.mrf.mxu1 }
 0x34f   :  { %v12506_v22 = vadd.f32 %v5231_v37, %v5015_v32 }
 0x350   :  { %v4937_v44 = vpop.f32.mrf.mxu0  ;;  %v5234_v36 = vpop.f32.mrf.mxu1 }
 0x351   :  { %v5016_v23 = vadd.f32 %v4937_v44, %v12365_v29 }
 0x352   :  { %v9942_v45 = vpop.f32.mrf.mxu0  ;;  %v10002_v59 = vpop.f32.mrf.mxu1 }
 0x353   :  { %v12509_v26 = vadd.f32 %v5234_v36, %v5016_v23 }
 0x354   :  { %v4942_v25 = vpop.f32.mrf.mxu0  ;;  %v5239_v49 = vpop.f32.mrf.mxu1 }
 0x355   :  { %v5017_v28 = vadd.f32 %v4942_v25, %v12378_v8 }
 0x356   :  { %v9945_v46 = vpop.f32.mrf.mxu0  ;;  %v10005_v2 = vpop.f32.mrf.mxu1 }
 0x357   :  { %v12512_v18 = vadd.f32 %v5239_v49, %v5017_v28 }
 0x358   :  { %v4945_v33 = vpop.f32.mrf.mxu0  ;;  %v5242_v9 = vpop.f32.mrf.mxu1 }
 0x359   :  { %v5018_v27 = vadd.f32 %v4945_v33, %v12381_v38 }
 0x35a   :  { %v9946_v1 = vpop.f32.mrf.mxu0  ;;  %v10006_v19 = vpop.f32.mrf.mxu1 }
 0x35b   :  { %v12515_v24 = vadd.f32 %v5242_v9, %v5018_v27 }
 0x35c   :  { %v4950_v29 = vpop.f32.mrf.mxu0  ;;  %v5247_v43 = vpop.f32.mrf.mxu1 }
 0x35d   :  { %v5019_v7 = vadd.f32 %v4950_v29, %v12391_v51 }
 0x35e   :  { %v9949_v50 = vpop.f32.mrf.mxu0  ;;  %v10009_v35 = vpop.f32.mrf.mxu1 }
 0x35f   :  { %v12518_v5 = vadd.f32 %v5247_v43, %v5019_v7 }
 0x360   :  { %v4953_v8 = vpop.f32.mrf.mxu0  ;;  %v5250_v42 = vpop.f32.mrf.mxu1 }
 0x361   :  { %v5020_v10 = vadd.f32 %v4953_v8, %v12397_v13 }
 0x362   :  { %v9950_v15 = vpop.f32.mrf.mxu0  ;;  %v10010_v6 = vpop.f32.mrf.mxu1 }
 0x363   :  { %v12521_v17 = vadd.f32 %v5250_v42, %v5020_v10 }
 0x364   :  { %v4958_v38 = vpop.f32.mrf.mxu0  ;;  %v5255_v31 = vpop.f32.mrf.mxu1 }
 0x365   :  { %v5021_v16 = vadd.f32 %v4958_v38, %v12404_v62 }
 0x366   :  { %v9953_v52 = vpop.f32.mrf.mxu0  ;;  %v10013_v47 = vpop.f32.mrf.mxu1 }
 0x367   :  { %v12524_v0 = vadd.f32 %v5255_v31, %v5021_v16 }
 0x368   :  { %v4961_v51 = vpop.f32.mrf.mxu0  ;;  %v5258_v53 = vpop.f32.mrf.mxu1 }
 0x369   :  { %v5022_v41 = vadd.f32 %v4961_v51, %v12410_v60 }
 0x36a   :  { %v9954_v55 = vpop.f32.mrf.mxu0  ;;  %v10014_v37 = vpop.f32.mrf.mxu1 }
 0x36b   :  { %v12527_v32 = vadd.f32 %v5258_v53, %v5022_v41 }
 0x36c   :  { %v4966_v13 = vpop.f32.mrf.mxu0  ;;  %v5263_v40 = vpop.f32.mrf.mxu1 }
 0x36d   :  { %v5023_v48 = vadd.f32 %v4966_v13, %v12420_v30 }
 0x36e   :  { %v9957_v44 = vpop.f32.mrf.mxu0  ;;  %v10017_v36 = vpop.f32.mrf.mxu1 }
 0x36f   :  { %v12530_v23 = vadd.f32 %v5263_v40, %v5023_v48 }
 0x370   :  { %v4969_v62 = vpop.f32.mrf.mxu0  ;;  %v5266_v45 = vpop.f32.mrf.mxu1 }
 0x371   :  { %v5024_v59 = vadd.f32 %v4969_v62, %v12423_v20 }
 0x372   :  { %v9958_v25 = vpop.f32.mrf.mxu0  ;;  %v10018_v49 = vpop.f32.mrf.mxu1 }
 0x373   :  { %v12533_v28 = vadd.f32 %v5266_v45, %v5024_v59 }
 0x374   :  { %v4974_v60 = vpop.f32.mrf.mxu0  ;;  %v5271_v46 = vpop.f32.mrf.mxu1 }
 0x375   :  { %v5025_v2 = vadd.f32 %v4974_v60, %v12436_v63 }
 0x376   :  { %v9961_v33 = vpop.f32.mrf.mxu0  ;;  %v10021_v9 = vpop.f32.mrf.mxu1 }
 0x377   :  { %v12536_v27 = vadd.f32 %v5271_v46, %v5025_v2 }
 0x378   :  { %v4977_v30 = vpop.f32.mrf.mxu0  ;;  %v5274_v1 = vpop.f32.mrf.mxu1 }
 0x379   :  { %v5026_v19 = vadd.f32 %v4977_v30, %v12439_v54 }
 0x37a   :  { %v9962_v29 = vpop.f32.mrf.mxu0  ;;  %v10022_v43 = vpop.f32.mrf.mxu1 }
 0x37b   :  { %v12539_v7 = vadd.f32 %v5274_v1, %v5026_v19 }
 0x37c   :  { %v4982_v20 = vpop.f32.mrf.mxu0  ;;  %v5279_v50 = vpop.f32.mrf.mxu1 }
 0x37d   :  { %v5027_v35 = vadd.f32 %v4982_v20, %v12446_v39 }
 0x37e   :  { %v9965_v8 = vpop.f32.mrf.mxu0  ;;  %v10025_v42 = vpop.f32.mrf.mxu1 }
 0x37f   :  { %v12542_v10 = vadd.f32 %v5279_v50, %v5027_v35 }
 0x380   :  { %v4985_v63 = vpop.f32.mrf.mxu0  ;;  %v5282_v15 = vpop.f32.mrf.mxu1 }
 0x381   :  { %v5028_v6 = vadd.f32 %v4985_v63, %v12449_v3 }
 0x382   :  { %v9966_v38 = vpop.f32.mrf.mxu0  ;;  %v10026_v31 = vpop.f32.mrf.mxu1 }
 0x383   :  { %v12545_v16 = vadd.f32 %v5282_v15, %v5028_v6 }
 0x384   :  { %v4990_v54 = vpop.f32.mrf.mxu0  ;;  %v5287_v52 = vpop.f32.mrf.mxu1 }
 0x385   :  { %v5029_v47 = vadd.f32 %v4990_v54, %v12458_v57 }
 0x386   :  { %v9969_v51 = vpop.f32.mrf.mxu0  ;;  %v10029_v53 = vpop.f32.mrf.mxu1 }
 0x387   :  { %v12548_v41 = vadd.f32 %v5287_v52, %v5029_v47 }
 0x388   :  { %v4993_v39 = vpop.f32.mrf.mxu0  ;;  %v5290_v55 = vpop.f32.mrf.mxu1 }
 0x389   :  { %v5030_v37 = vadd.f32 %v4993_v39, %v12461_v21 }
 0x38a   :  { %v9970_v13 = vpop.f32.mrf.mxu0  ;;  %v10030_v40 = vpop.f32.mrf.mxu1 }
 0x38b   :  { %v12551_v48 = vadd.f32 %v5290_v55, %v5030_v37 }
 0x38c   :  { %v4998_v3 = vpop.f32.mrf.mxu0  ;;  %v5295_v44 = vpop.f32.mrf.mxu1 }
 0x38d   :  { %v5031_v36 = vadd.f32 %v4998_v3, %v12467_v61 }
 0x38e   :  { %v9973_v62 = vpop.f32.mrf.mxu0  ;;  %v10033_v45 = vpop.f32.mrf.mxu1 }
 0x38f   :  { %v12554_v59 = vadd.f32 %v5295_v44, %v5031_v36 }
 0x390   :  { %v5001_v57 = vpop.f32.mrf.mxu0  ;;  %v5298_v25 = vpop.f32.mrf.mxu1 }
 0x391   :  { %v5032_v49 = vadd.f32 %v5001_v57, %v12470_v34 }
 0x392   :  { %v9974_v60 = vpop.f32.mrf.mxu0  ;;  %v10034_v46 = vpop.f32.mrf.mxu1 }
 0x393   :  { %v12557_v2 = vadd.f32 %v5298_v25, %v5032_v49 }
 0x394   :  { %v5006_v21 = vpop.f32.mrf.mxu0  ;;  %v5303_v33 = vpop.f32.mrf.mxu1 }
 0x395   :  { %v5033_v9 = vadd.f32 %v5006_v21, %v12476_v12  ;;  %v12569_v12 = vld [vmem:[%s12777_s4] ss:$0 sm:$0xff] }
 0x396   :  { %v9977_v30 = vpop.f32.mrf.mxu0  ;;  %v10037_v1 = vpop.f32.mrf.mxu1 }
 0x397   :  { %v12560_v19 = vadd.f32 %v5303_v33, %v5033_v9 }
 0x398   :  { %v5009_v61 = vpop.f32.mrf.mxu0  ;;  %v5306_v29 = vpop.f32.mrf.mxu1 }
 0x399   :  { %v5034_v43 = vadd.f32 %v5009_v61, %v12479_v58 }
 0x39a   :  { %v9978_v20 = vpop.f32.mrf.mxu0  ;;  %v10038_v50 = vpop.f32.mrf.mxu1 }
 0x39b   :  { %v12563_v35 = vadd.f32 %v5306_v29, %v5034_v43 }
 0x39c   :  { %v5520_v34 = vpop.f32.mrf.mxu0  ;;  %v5817_v8 = vpop.f32.mrf.mxu1 }
 0x39d   :  { %v5607_v42 = vadd.f32 %v5520_v34, %v12493_v56 }
 0x39e   :  { %v10057_v63 = vpop.f32.mrf.mxu0  ;;  %v10117_v15 = vpop.f32.mrf.mxu1 }
 0x39f   :  { %v5904_v6 = vadd.f32 %v5817_v8, %v5607_v42 }
 0x3a0   :  { %v5523_v38 = vpop.f32.mrf.mxu0  ;;  %v5820_v31 = vpop.f32.mrf.mxu1 }
 0x3a1   :  { %v5608_v58 = vadd.f32 %v5523_v38, %v12497_v4  ;;  %v5933_v47 = vadd.f32 %v12569_v12, %v5904_v6 }
 0x3a2   :  { %v10058_v54 = vpop.f32.mrf.mxu0  ;;  %v10118_v52 = vpop.f32.mrf.mxu1 }
 0x3a3   :  { %v5905_v51 = vadd.f32 %v5820_v31, %v5608_v58  ;;  %v5955_v40 = vmax.f32 %v5933_v47, 0.0 }
 0x3a4   :  { %v5528_v53 = vpop.f32.mrf.mxu0  ;;  %v5825_v39 = vpop.f32.mrf.mxu1 }
 0x3a5   :  { %v5934_v56 = vadd.f32 %v12569_v12, %v5905_v51  ;;  %v5609_v55 = vadd.f32 %v5528_v53, %v12506_v22 }
 0x3a6   :  { %v10061_v37 = vpop.f32.mrf.mxu0  ;;  %v10121_v13 = vpop.f32.mrf.mxu1 }
 0x3a7   :  { %v5956_v3 = vmax.f32 %v5934_v56, 0.0  ;;  %v5906_v44 = vadd.f32 %v5825_v39, %v5609_v55  ;;  %v10733_v55 = vld [vmem:[%s12776_s5 + $0xf0] sm:$0xff]  }
 0x3a8   :  { %v5531_v36 = vpop.f32.mrf.mxu0  ;;  %v5828_v62 = vpop.f32.mrf.mxu1 }
 0x3a9   :  { %v8728_v45 = vpack.c.bf16 %v5956_v3, %v5955_v40  ;;  %v5610_v4 = vadd.f32 %v5531_v36, %v12509_v26  ;;  %v5935_v49 = vadd.f32 %v12569_v12, %v5906_v44 }
 0x3aa   :  { %v10062_v57 = vpop.f32.mrf.mxu0  ;;  %v10122_v25 = vpop.f32.mrf.mxu1 }
 0x3ab   :  { %8729 = vst [vmem:[#allocation3] sm:$0xff] %v8728_v45   ;;  %v5907_v60 = vadd.f32 %v5828_v62, %v5610_v4  ;;  %v5957_v1 = vmax.f32 %v5935_v49, 0.0 }
 0x3ac   :  { %v5536_v46 = vpop.f32.mrf.mxu0  ;;  %v5833_v21 = vpop.f32.mrf.mxu1 }
 0x3ad   :  { %v5936_v22 = vadd.f32 %v12569_v12, %v5907_v60  ;;  %v5611_v33 = vadd.f32 %v5536_v46, %v12512_v18  ;;  %v10735_v46 = vld [vmem:[%s12776_s5 + $0xe8] sm:$0xff]  }
 0x3ae   :  { %v10065_v9 = vpop.f32.mrf.mxu0  ;;  %v10125_v30 = vpop.f32.mrf.mxu1 }
 0x3af   :  { %v5958_v61 = vmax.f32 %v5936_v22, 0.0  ;;  %v5908_v29 = vadd.f32 %v5833_v21, %v5611_v33 }
 0x3b0   :  { %v5539_v43 = vpop.f32.mrf.mxu0  ;;  %v5836_v20 = vpop.f32.mrf.mxu1 }
 0x3b1   :  { %v8733_v26 = vpack.c.bf16 %v5958_v61, %v5957_v1  ;;  %v5612_v50 = vadd.f32 %v5539_v43, %v12515_v24  ;;  %v5937_v63 = vadd.f32 %v12569_v12, %v5908_v29 }
 0x3b2   :  { %v10066_v34 = vpop.f32.mrf.mxu0  ;;  %v10126_v8 = vpop.f32.mrf.mxu1  ;;  %v10727_v42 = vld [vmem:[#allocation3] sm:$0xff]  }
 0x3b3   :  { %8797 = vst [vmem:[#allocation3 + $0x8] sm:$0xff] %v8733_v26   ;;  %v5909_v15 = vadd.f32 %v5836_v20, %v5612_v50  ;;  %10199 = vmatprep.mubr.bf16.mxu1 %v10727_v42  ;;  %v5959_v52 = vmax.f32 %v5937_v63, 0.0  ;;  %v10740_v63 = vld [vmem:[%s12776_s5 + $0xa8] sm:$0xff]  }
 0x3b4   :  { %v5544_v6 = vpop.f32.mrf.mxu0  ;;  %v5841_v38 = vpop.f32.mrf.mxu1 }
 0x3b5   :  { %v5938_v18 = vadd.f32 %v12569_v12, %v5909_v15  ;;  %v5613_v31 = vadd.f32 %v5544_v6, %v12518_v5 }
 0x3b6   :  { %v10069_v58 = vpop.f32.mrf.mxu0  ;;  %v10129_v54 = vpop.f32.mrf.mxu1 }
 0x3b7   :  { %v5960_v47 = vmax.f32 %v5938_v18, 0.0  ;;  %v5910_v51 = vadd.f32 %v5841_v38, %v5613_v31  ;;  %v10741_v18 = vld [vmem:[%s12776_s5 + $0xd8] sm:$0xff]   ;;  %v10745_v54 = vld [vmem:[%s12776_s5 + $0xa0] sm:$0xff]  }
 0x3b8   :  { %v5547_v24 = vpop.f32.mrf.mxu0  ;;  %v5844_v53 = vpop.f32.mrf.mxu1 }
 0x3b9   :  { %v8738_v39 = vpack.c.bf16 %v5960_v47, %v5959_v52  ;;  %v5614_v56 = vadd.f32 %v5547_v24, %v12521_v17  ;;  %v5939_v5 = vadd.f32 %v12569_v12, %v5910_v51  ;;  %v10746_v52 = vld [vmem:[%s12776_s5 + $0xd0] sm:$0xff]  }
 0x3ba   :  { %v10070_v37 = vpop.f32.mrf.mxu0  ;;  %v10130_v13 = vpop.f32.mrf.mxu1  ;;  %v10731_v40 = vld [vmem:[#allocation3 + $0x8] sm:$0xff]  }
 0x3bb   :  { %8798 = vst [vmem:[#allocation3 + $0x10] sm:$0xff] %v8738_v39   ;;  %v5911_v3 = vadd.f32 %v5844_v53, %v5614_v56  ;;  %v10732_v44 = vld [vmem:[#allocation3 + $0x8] sm:$0xff]   ;;  %10175 = vmatprep.mubr.bf16.mxu0 %v10731_v40  ;;  %v5961_v25 = vmax.f32 %v5939_v5, 0.0 }
 0x3bc   :  { %v5552_v36 = vpop.f32.mrf.mxu0  ;;  %v5849_v62 = vpop.f32.mrf.mxu1  ;;  %10200 = vmatmul.mubr.bf16.vlgmr.msra.gmra.mxu1 %v10732_v44  ;;  %v10747_v44 = vld [vmem:[%s12776_s5 + $0x98] sm:$0xff]  }
 0x3bd   :  { %v5940_v45 = vadd.f32 %v12569_v12, %v5911_v3  ;;  %v5615_v4 = vadd.f32 %v5552_v36, %v12524_v0  ;;  %10232 = vmatpush3.bf16.msra.mxu1 %v12490_v11  ;;  %v10738_v0 = vld [vmem:[%s12776_s5 + $0xb0] sm:$0xff]   ;;  %v10739_v11 = vld [vmem:[%s12776_s5 + $0xe0] sm:$0xff]  }
 0x3be   :  { %v10073_v17 = vpop.f32.mrf.mxu0  ;;  %v10133_v57 = vpop.f32.mrf.mxu1  ;;  %10233 = vmatprep.subr.bf16.mxu1 %v10733_v55 }
 0x3bf   :  { %v5962_v49 = vmax.f32 %v5940_v45, 0.0  ;;  %v5912_v60 = vadd.f32 %v5849_v62, %v5615_v4  ;;  %v10748_v4 = vld [vmem:[%s12776_s5 + $0xc8] sm:$0xff]  }
 0x3c0   :  { %v5555_v21 = vpop.f32.mrf.mxu0  ;;  %v5852_v22 = vpop.f32.mrf.mxu1 }
 0x3c1   :  { %v8743_v33 = vpack.c.bf16 %v5962_v49, %v5961_v25  ;;  %v5616_v9 = vadd.f32 %v5555_v21, %v12527_v32  ;;  %10234 = vmatpush3.bf16.msra.mxu1 %v10733_v55  ;;  %v5941_v29 = vadd.f32 %v12569_v12, %v5912_v60  ;;  %v10751_v49 = vld [vmem:[%s12776_s5 + $0x90] sm:$0xff]   ;;  %v10752_v60 = vld [vmem:[%s12776_s5 + $0xc0] sm:$0xff]  }
 0x3c2   :  { %v10074_v30 = vpop.f32.mrf.mxu0  ;;  %v10134_v1 = vpop.f32.mrf.mxu1  ;;  %v10736_v61 = vld [vmem:[#allocation3 + $0x10] sm:$0xff]   ;;  %10235 = vmatprep.subr.bf16.mxu1 %v10735_v46 }
 0x3c3   :  { %8799 = vst [vmem:[#allocation3 + $0x18] sm:$0xff] %v8743_v33   ;;  %v5913_v43 = vadd.f32 %v5852_v22, %v5616_v9  ;;  %v10737_v20 = vld [vmem:[#allocation3 + $0x10] sm:$0xff]   ;;  %10176 = vmatmul.mubr.bf16.vlgmr.msra.gmra.mxu0 %v10736_v61  ;;  %v5963_v15 = vmax.f32 %v5941_v29, 0.0 }
 0x3c4   :  { %v5560_v26 = vpop.f32.mrf.mxu0  ;;  %v5857_v32 = vpop.f32.mrf.mxu1  ;;  %10203 = vmatprep.mubr.bf16.mxu1 %v10737_v20  ;;  %10208 = vmatpush3.bf16.msra.mxu0 %v12502_v14 }
 0x3c5   :  { %v5942_v50 = vadd.f32 %v12569_v12, %v5913_v43  ;;  %v5617_v34 = vadd.f32 %v5560_v26, %v12530_v23  ;;  %10236 = vmatpush3.bf16.msra.mxu1 %v10735_v46  ;;  %10209 = vmatprep.subr.bf16.mxu0 %v10738_v0  ;;  %v10753_v43 = vld [vmem:[%s12776_s5 + $0x88] sm:$0xff]  }
 0x3c6   :  { %v10077_v8 = vpop.f32.mrf.mxu0  ;;  %v10137_v42 = vpop.f32.mrf.mxu1  ;;  %10237 = vmatprep.subr.bf16.mxu1 %v10739_v11 }
 0x3c7   :  { %v5964_v6 = vmax.f32 %v5942_v50, 0.0  ;;  %v5914_v38 = vadd.f32 %v5857_v32, %v5617_v34  ;;  %v10755_v50 = vld [vmem:[%s12776_s5 + $0x178] sm:$0xff]  }
 0x3c8   :  { %v5563_v23 = vpop.f32.mrf.mxu0  ;;  %v5860_v31 = vpop.f32.mrf.mxu1  ;;  %10210 = vmatpush3.bf16.msra.mxu0 %v10738_v0 }
 0x3c9   :  { %v8748_v58 = vpack.c.bf16 %v5964_v6, %v5963_v15  ;;  %v5618_v14 = vadd.f32 %v5563_v23, %v12533_v28  ;;  %10238 = vmatpush3.bf16.msra.mxu1 %v10739_v11  ;;  %10211 = vmatprep.subr.bf16.mxu0 %v10740_v63  ;;  %v5943_v53 = vadd.f32 %v12569_v12, %v5914_v38  ;;  %v10758_v15 = vld [vmem:[%s12776_s5 + $0x170] sm:$0xff]  }
 0x3ca   :  { %v10078_v47 = vpop.f32.mrf.mxu0  ;;  %v10138_v51 = vpop.f32.mrf.mxu1  ;;  %v10742_v24 = vld [vmem:[#allocation3 + $0x18] sm:$0xff]   ;;  %10239 = vmatprep.subr.bf16.mxu1 %v10741_v18 }
 0x3cb   :  { %8800 = vst [vmem:[#allocation3 + $0x20] sm:$0xff] %v8748_v58   ;;  %v5915_v39 = vadd.f32 %v5860_v31, %v5618_v14  ;;  %v10743_v28 = vld [vmem:[#allocation3 + $0x18] sm:$0xff]   ;;  %10179 = vmatprep.mubr.bf16.mxu0 %v10742_v24  ;;  %v5965_v36 = vmax.f32 %v5943_v53, 0.0  ;;  %v10760_v24 = vld [vmem:[%s12776_s5 + $0x138] sm:$0xff]  }
 0x3cc   :  { %v5568_v56 = vpop.f32.mrf.mxu0  ;;  %v5865_v55 = vpop.f32.mrf.mxu1  ;;  %v10744_v37 = vld [vmem:[#allocation3 + $0x18] sm:$0xff]   ;;  %10204 = vmatmul.mubr.bf16.gmra.mxu1 %v10743_v28  ;;  %10212 = vmatpush3.bf16.msra.mxu0 %v10740_v63  ;;  %v10757_v63 = vld [vmem:[%s12776_s5 + $0x80] sm:$0xff]  }
 0x3cd   :  { %v5944_v13 = vadd.f32 %v12569_v12, %v5915_v39  ;;  %v5619_v40 = vadd.f32 %v5568_v56, %v12536_v27  ;;  %10240 = vmatpush3.bf16.msra.mxu1 %v10741_v18  ;;  %10247 = vmatprep.mubr.bf16.mxu1 %v10744_v37  ;;  %v10761_v56 = vld [vmem:[%s12776_s5 + $0x168] sm:$0xff]  }
 0x3ce   :  { %v10081_v5 = vpop.f32.mrf.mxu0  ;;  %v10141_v3 = vpop.f32.mrf.mxu1  ;;  %10213 = vmatprep.subr.bf16.mxu0 %v10745_v54  ;;  %10241 = vmatprep.subr.bf16.mxu1 %v10746_v52 }
 0x3cf   :  { %v5966_v62 = vmax.f32 %v5944_v13, 0.0  ;;  %v5916_v45 = vadd.f32 %v5865_v55, %v5619_v40  ;;  %v10759_v40 = vld [vmem:[#allocation3 + $0x18] sm:$0xff]   ;;  %v10765_v5 = vld [vmem:[%s12776_s5 + $0x130] sm:$0xff]  }
 0x3d0   :  { %v5571_v27 = vpop.f32.mrf.mxu0  ;;  %v5868_v17 = vpop.f32.mrf.mxu1  ;;  %10214 = vmatpush3.bf16.msra.mxu0 %v10745_v54 }
 0x3d1   :  { %v8753_v57 = vpack.c.bf16 %v5966_v62, %v5965_v36  ;;  %v5620_v25 = vadd.f32 %v5571_v27, %v12539_v7  ;;  %10242 = vmatpush3.bf16.msra.mxu1 %v10746_v52  ;;  %10215 = vmatprep.subr.bf16.mxu0 %v10747_v44  ;;  %v5945_v33 = vadd.f32 %v12569_v12, %v5916_v45  ;;  %v10750_v7 = vld [vmem:[#allocation3 + $0x10] sm:$0xff]  }
 0x3d2   :  { %v10082_v46 = vpop.f32.mrf.mxu0  ;;  %v10142_v21 = vpop.f32.mrf.mxu1  ;;  %v10749_v22 = vld [vmem:[#allocation3 + $0x20] sm:$0xff]   ;;  %10243 = vmatprep.subr.bf16.mxu1 %v10748_v4 }
 0x3d3   :  { %8801 = vst [vmem:[#allocation3 + $0x28] sm:$0xff] %v8753_v57   ;;  %v5917_v9 = vadd.f32 %v5868_v17, %v5620_v25  ;;  %10180 = vmatmul.mubr.bf16.gmra.mxu0 %v10749_v22  ;;  %v5967_v20 = vmax.f32 %v5945_v33, 0.0  ;;  %v10754_v58 = vld [vmem:[#allocation3 + $0x20] sm:$0xff]  }
 0x3d4   :  { %v5576_v0 = vpop.f32.mrf.mxu0  ;;  %v5873_v11 = vpop.f32.mrf.mxu1  ;;  %10216 = vmatpush3.bf16.msra.mxu0 %v10747_v44  ;;  %10223 = vmatprep.mubr.bf16.mxu0 %v10750_v7 }
 0x3d5   :  { %v5946_v30 = vadd.f32 %v12569_v12, %v5917_v9  ;;  %v5621_v1 = vadd.f32 %v5576_v0, %v12542_v10  ;;  %10244 = vmatpush3.bf16.msra.mxu1 %v10748_v4  ;;  %10217 = vmatprep.subr.bf16.mxu0 %v10751_v49  ;;  %v10762_v4 = vld [vmem:[#allocation3 + $0x20] sm:$0xff]   ;;  %v10768_v9 = vld [vmem:[%s12776_s5 + $0x128] sm:$0xff]  }
 0x3d6   :  { %v10085_v61 = vpop.f32.mrf.mxu0  ;;  %v10145_v29 = vpop.f32.mrf.mxu1  ;;  %10245 = vmatprep.subr.bf16.mxu1 %v10752_v60 }
 0x3d7   :  { %v5968_v26 = vmax.f32 %v5946_v30, 0.0  ;;  %v5918_v32 = vadd.f32 %v5873_v11, %v5621_v1  ;;  %v10771_v1 = vld [vmem:[%s12776_s5 + $0x120] sm:$0xff]   ;;  %v10772_v61 = vld [vmem:[%s12776_s5 + $0x150] sm:$0xff]  }
 0x3d8   :  { %v5579_v34 = vpop.f32.mrf.mxu0  ;;  %v5876_v10 = vpop.f32.mrf.mxu1  ;;  %10218 = vmatpush3.bf16.msra.mxu0 %v10751_v49 }
 0x3d9   :  { %v8758_v8 = vpack.c.bf16 %v5968_v26, %v5967_v20  ;;  %v5622_v42 = vadd.f32 %v5579_v34, %v12545_v16  ;;  %10246 = vmatpush3.bf16.msra.mxu1 %v10752_v60  ;;  %10219 = vmatprep.subr.bf16.mxu0 %v10753_v43  ;;  %v5947_v23 = vadd.f32 %v12569_v12, %v5918_v32 }
 0x3da   :  { %v10086_v6 = vpop.f32.mrf.mxu0  ;;  %v10146_v38 = vpop.f32.mrf.mxu1  ;;  %v10756_v18 = vld [vmem:[#allocation3 + $0x28] sm:$0xff]   ;;  %10279 = vmatprep.subr.bf16.mxu1 %v10755_v50 }
 0x3db   :  { %8802 = vst [vmem:[#allocation3 + $0x30] sm:$0xff] %v8758_v8   ;;  %v5919_v31 = vadd.f32 %v5876_v10, %v5622_v42  ;;  %v5969_v53 = vmax.f32 %v5947_v23, 0.0  ;;  %v10764_v49 = vld [vmem:[#allocation3 + $0x28] sm:$0xff]   ;;  %v10774_v23 = vld [vmem:[%s12776_s5 + $0x148] sm:$0xff]  }
 0x3dc   :  { %v5584_v16 = vpop.f32.mrf.mxu0  ;;  %v5881_v14 = vpop.f32.mrf.mxu1  ;;  %10248 = vmatmul.mubr.bf16.vlgmr.msra.gmra.mxu1 %v10754_v58  ;;  %10220 = vmatpush3.bf16.msra.mxu0 %v10753_v43  ;;  %v10767_v20 = vld [vmem:[#allocation3 + $0x28] sm:$0xff]  }
 0x3dd   :  { %v5948_v54 = vadd.f32 %v12569_v12, %v5919_v31  ;;  %v5623_v52 = vadd.f32 %v5584_v16, %v12548_v41  ;;  %10251 = vmatprep.mubr.bf16.mxu1 %v10756_v18  ;;  %10280 = vmatpush3.bf16.msra.mxu1 %v10755_v50  ;;  %v10773_v18 = vld [vmem:[%s12776_s5 + $0x118] sm:$0xff]  }
 0x3de   :  { %v10089_v47 = vpop.f32.mrf.mxu0  ;;  %v10149_v51 = vpop.f32.mrf.mxu1  ;;  %10221 = vmatprep.subr.bf16.mxu0 %v10757_v63  ;;  %10281 = vmatprep.subr.bf16.mxu1 %v10758_v15 }
 0x3df   :  { %v5970_v39 = vmax.f32 %v5948_v54, 0.0  ;;  %v5920_v28 = vadd.f32 %v5881_v14, %v5623_v52  ;;  %v10775_v52 = vld [vmem:[%s12776_s5 + $0x110] sm:$0xff]  }
 0x3e0   :  { %v5587_v41 = vpop.f32.mrf.mxu0  ;;  %v5884_v55 = vpop.f32.mrf.mxu1  ;;  %10222 = vmatpush3.bf16.msra.mxu0 %v10757_v63 }
 0x3e1   :  { %v8763_v37 = vpack.c.bf16 %v5970_v39, %v5969_v53  ;;  %v5624_v13 = vadd.f32 %v5587_v41, %v12551_v48  ;;  %10282 = vmatpush3.bf16.msra.mxu1 %v10758_v15  ;;  %10255 = vmatprep.subr.bf16.mxu0 %v10760_v24  ;;  %v5949_v62 = vadd.f32 %v12569_v12, %v5920_v28  ;;  %v10766_v48 = vld [vmem:[%s12776_s5 + $0x160] sm:$0xff]   ;;  %v10777_v28 = vld [vmem:[%s12776_s5 + $0x108] sm:$0xff]  }
 0x3e2   :  { %v10090_v3 = vpop.f32.mrf.mxu0  ;;  %v10150_v44 = vpop.f32.mrf.mxu1  ;;  %v10763_v36 = vld [vmem:[#allocation3 + $0x30] sm:$0xff]   ;;  %10283 = vmatprep.subr.bf16.mxu1 %v10761_v56 }
 0x3e3   :  { %8803 = vst [vmem:[#allocation3 + $0x38] sm:$0xff] %v8763_v37   ;;  %v5921_v45 = vadd.f32 %v5884_v55, %v5624_v13  ;;  %10224 = vmatmul.mubr.bf16.vlgmr.msra.gmra.mxu0 %v10759_v40  ;;  %v5971_v21 = vmax.f32 %v5949_v62, 0.0  ;;  %v10778_v55 = vld [vmem:[#allocation3 + $0x30] sm:$0xff]   ;;  %v10782_v13 = vld [vmem:[%s12776_s5 + $0x1f0] sm:$0xff]   ;;  %v10785_v40 = vld [vmem:[%s12776_s5 + $0x1b8] sm:$0xff]  }
 0x3e4   :  { %v5592_v27 = vpop.f32.mrf.mxu0  ;;  %v5889_v17 = vpop.f32.mrf.mxu1  ;;  %10227 = vmatprep.mubr.bf16.mxu0 %v10762_v4  ;;  %10252 = vmatmul.mubr.bf16.gmra.mxu1 %v10763_v36  ;;  %v10783_v3 = vld [vmem:[#allocation3 + $0x28] sm:$0xff]   ;;  %v10787_v36 = vld [vmem:[#allocation3 + $0x30] sm:$0xff]   ;;  %v10789_v62 = vld [vmem:[%s12776_s5 + $0x1b0] sm:$0xff]  }
 0x3e5   :  { %v5950_v57 = vadd.f32 %v12569_v12, %v5921_v45  ;;  %v5625_v25 = vadd.f32 %v5592_v27, %v12554_v59  ;;  %10256 = vmatpush3.bf16.msra.mxu0 %v10760_v24  ;;  %10284 = vmatpush3.bf16.msra.mxu1 %v10761_v56  ;;  %v10769_v59 = vld [vmem:[%s12776_s5 + $0x158] sm:$0xff]   ;;  %v10776_v24 = vld [vmem:[%s12776_s5 + $0x140] sm:$0xff]   ;;  %v10792_v27 = vld [vmem:[%s12776_s5 + $0x1a8] sm:$0xff]  }
 0x3e6   :  { %v10093_v60 = vpop.f32.mrf.mxu0  ;;  %v10153_v46 = vpop.f32.mrf.mxu1  ;;  %10295 = vmatprep.mubr.bf16.mxu1 %v10764_v49  ;;  %10257 = vmatprep.subr.bf16.mxu0 %v10765_v5  ;;  %v10779_v56 = vld [vmem:[%s12776_s5 + $0x1f8] sm:$0xff]   ;;  %v10790_v45 = vld [vmem:[%s12776_s5 + $0x1e0] sm:$0xff]   ;;  %v10796_v49 = vld [vmem:[%s12776_s5 + $0x1d0] sm:$0xff]  }
 0x3e7   :  { %v5972_v22 = vmax.f32 %v5950_v57, 0.0  ;;  %v5922_v33 = vadd.f32 %v5889_v17, %v5625_v25  ;;  %10285 = vmatprep.subr.bf16.mxu1 %v10766_v48  ;;  %v10793_v17 = vld [vmem:[%s12776_s5 + $0x1d8] sm:$0xff]   ;;  %v10795_v57 = vld [vmem:[%s12776_s5 + $0x1a0] sm:$0xff]   ;;  %v10798_v46 = vld [vmem:[%s12776_s5 + $0x1c8] sm:$0xff]  }
 0x3e8   :  { %v5595_v7 = vpop.f32.mrf.mxu0  ;;  %v5892_v0 = vpop.f32.mrf.mxu1  ;;  %v10794_v25 = vld [vmem:[#allocation3 + $0x30] sm:$0xff]   ;;  %v10797_v60 = vld [vmem:[%s12776_s5 + $0x198] sm:$0xff]  }
 0x3e9   :  { %v8768_v11 = vpack.c.bf16 %v5972_v22, %v5971_v21  ;;  %v5626_v30 = vadd.f32 %v5595_v7, %v12557_v2  ;;  %10258 = vmatpush3.bf16.msra.mxu0 %v10765_v5  ;;  %10286 = vmatpush3.bf16.msra.mxu1 %v10766_v48  ;;  %v5951_v26 = vadd.f32 %v12569_v12, %v5922_v33  ;;  %v10770_v2 = vld [vmem:[#allocation3 + $0x20] sm:$0xff]   ;;  %v10786_v5 = vld [vmem:[%s12776_s5 + $0x1e8] sm:$0xff]   ;;  %v10800_v22 = vld [vmem:[%s12776_s5 + $0x1c0] sm:$0xff]  }
 0x3ea   :  { %v10094_v29 = vpop.f32.mrf.mxu0  ;;  %v10154_v43 = vpop.f32.mrf.mxu1  ;;  %10259 = vmatprep.subr.bf16.mxu0 %v10768_v9  ;;  %10287 = vmatprep.subr.bf16.mxu1 %v10769_v59  ;;  %v10780_v37 = vld [vmem:[#allocation3 + $0x38] sm:$0xff]   ;;  %v10799_v21 = vld [vmem:[%s12776_s5 + $0x190] sm:$0xff]  }
 0x3eb   :  { %8804 = vst [vmem:[#allocation3 + $0x40] sm:$0xff] %v8768_v11   ;;  %v5923_v32 = vadd.f32 %v5892_v0, %v5626_v30  ;;  %10228 = vmatmul.mubr.bf16.gmra.mxu0 %v10767_v20  ;;  %v5973_v15 = vmax.f32 %v5951_v26, 0.0  ;;  %v10788_v4 = vld [vmem:[#allocation3 + $0x38] sm:$0xff]  }
 0x3ec   :  { %v5600_v50 = vpop.f32.mrf.mxu0  ;;  %v5897_v34 = vpop.f32.mrf.mxu1  ;;  %10271 = vmatprep.mubr.bf16.mxu0 %v10770_v2  ;;  %v10791_v48 = vld [vmem:[#allocation3 + $0x38] sm:$0xff]  }
 0x3ed   :  { %v5952_v10 = vadd.f32 %v12569_v12, %v5923_v32  ;;  %v5627_v8 = vadd.f32 %v5600_v50, %v12560_v19  ;;  %10260 = vmatpush3.bf16.msra.mxu0 %v10768_v9  ;;  %10288 = vmatpush3.bf16.msra.mxu1 %v10769_v59  ;;  %v10801_v33 = vld [vmem:[%s12776_s5 + $0x188] sm:$0xff]   ;;  %v10804_v9 = vld [vmem:[%s12776_s5 + $0x180] sm:$0xff]  }
 0x3ee   :  { %v10097_v42 = vpop.f32.mrf.mxu0  ;;  %v10157_v63 = vpop.f32.mrf.mxu1  ;;  %10261 = vmatprep.subr.bf16.mxu0 %v10771_v1  ;;  %10289 = vmatprep.subr.bf16.mxu1 %v10772_v61  ;;  %v10805_v0 = vld [vmem:[#allocation3 + $0x38] sm:$0xff]  }
 0x3ef   :  { %v5974_v6 = vmax.f32 %v5952_v10, 0.0  ;;  %v5924_v38 = vadd.f32 %v5897_v34, %v5627_v8 }
 0x3f0   :  { %v5603_v31 = vpop.f32.mrf.mxu0  ;;  %v5900_v19 = vpop.f32.mrf.mxu1 }
 0x3f1   :  { %v8773_v58 = vpack.c.bf16 %v5974_v6, %v5973_v15  ;;  %v5628_v16 = vadd.f32 %v5603_v31, %v12563_v35  ;;  %10262 = vmatpush3.bf16.msra.mxu0 %v10771_v1  ;;  %10290 = vmatpush3.bf16.msra.mxu1 %v10772_v61  ;;  %v5953_v47 = vadd.f32 %v12569_v12, %v5924_v38 }
 0x3f2   :  { %v10098_v14 = vpop.f32.mrf.mxu0  ;;  %v10158_v54 = vpop.f32.mrf.mxu1  ;;  %10263 = vmatprep.subr.bf16.mxu0 %v10773_v18  ;;  %10291 = vmatprep.subr.bf16.mxu1 %v10774_v23  ;;  %v10784_v44 = vld [vmem:[#allocation3 + $0x40] sm:$0xff]  }
 0x3f3   :  { %8805 = vst [vmem:[#allocation3 + $0x48] sm:$0xff] %v8773_v58   ;;  %v5925_v51 = vadd.f32 %v5900_v19, %v5628_v16  ;;  %v5975_v53 = vmax.f32 %v5953_v47, 0.0  ;;  %v10802_v59 = vld [vmem:[#allocation3 + $0x40] sm:$0xff]  }
 0x3f4   :  { %v10807_v30 = vld [vmem:[#allocation3 + $0x40] sm:$0xff]  }
 0x3f5   :  { %v5954_v35 = vadd.f32 %v12569_v12, %v5925_v51  ;;  %10264 = vmatpush3.bf16.msra.mxu0 %v10773_v18  ;;  %10292 = vmatpush3.bf16.msra.mxu1 %v10774_v23  ;;  %v10781_v12 = vld [vmem:[%s12776_s5 + $0x100] sm:$0xff]  }
 0x3f6   :  { %10265 = vmatprep.subr.bf16.mxu0 %v10775_v52  ;;  %10293 = vmatprep.subr.bf16.mxu1 %v10776_v24 }
 0x3f7   :  { %v5976_v39 = vmax.f32 %v5954_v35, 0.0 }
 0x3f9   :  { %v8778_v41 = vpack.c.bf16 %v5976_v39, %v5975_v53  ;;  %10266 = vmatpush3.bf16.msra.mxu0 %v10775_v52  ;;  %10294 = vmatpush3.bf16.msra.mxu1 %v10776_v24 }
 0x3fa   :  { %10267 = vmatprep.subr.bf16.mxu0 %v10777_v28  ;;  %10327 = vmatprep.subr.bf16.mxu1 %v10779_v56  ;;  %v10803_v7 = vld [vmem:[#allocation3 + $0x48] sm:$0xff]  }
 0x3fb   :  { %8806 = vst [vmem:[#allocation3 + $0x50] sm:$0xff] %v8778_v41   ;;  %v10808_v1 = vld [vmem:[#allocation3 + $0x48] sm:$0xff]  }
 0x3fc   :  { %10296 = vmatmul.mubr.bf16.vlgmr.msra.gmra.mxu1 %v10778_v55 }
 0x3fd   :  { %10268 = vmatpush3.bf16.msra.mxu0 %v10777_v28  ;;  %10299 = vmatprep.mubr.bf16.mxu1 %v10780_v37 }
 0x3fe   :  { %10328 = vmatpush3.bf16.msra.mxu1 %v10779_v56  ;;  %10269 = vmatprep.subr.bf16.mxu0 %v10781_v12 }
 0x3ff   :  { %10329 = vmatprep.subr.bf16.mxu1 %v10782_v13 }
 0x401   :  { %10270 = vmatpush3.bf16.msra.mxu0 %v10781_v12 }
 0x402   :  { %10330 = vmatpush3.bf16.msra.mxu1 %v10782_v13  ;;  %10303 = vmatprep.subr.bf16.mxu0 %v10785_v40  ;;  %v10806_v11 = vld [vmem:[#allocation3 + $0x50] sm:$0xff]  }
 0x403   :  { %10331 = vmatprep.subr.bf16.mxu1 %v10786_v5 }
 0x404   :  { %10272 = vmatmul.mubr.bf16.vlgmr.msra.gmra.mxu0 %v10783_v3  ;;  %10300 = vmatmul.mubr.bf16.gmra.mxu1 %v10784_v44 }
 0x405   :  { %10275 = vmatprep.mubr.bf16.mxu0 %v10787_v36  ;;  %10304 = vmatpush3.bf16.msra.mxu0 %v10785_v40 }
 0x406   :  { %10332 = vmatpush3.bf16.msra.mxu1 %v10786_v5  ;;  %10343 = vmatprep.mubr.bf16.mxu1 %v10788_v4 }
 0x407   :  { %10305 = vmatprep.subr.bf16.mxu0 %v10789_v62  ;;  %10333 = vmatprep.subr.bf16.mxu1 %v10790_v45 }
 0x409   :  { %10306 = vmatpush3.bf16.msra.mxu0 %v10789_v62 }
 0x40a   :  { %10334 = vmatpush3.bf16.msra.mxu1 %v10790_v45  ;;  %10307 = vmatprep.subr.bf16.mxu0 %v10792_v27 }
 0x40b   :  { %10335 = vmatprep.subr.bf16.mxu1 %v10793_v17 }
 0x40c   :  { %10276 = vmatmul.mubr.bf16.gmra.mxu0 %v10791_v48 }
 0x40d   :  { %10308 = vmatpush3.bf16.msra.mxu0 %v10792_v27  ;;  %10319 = vmatprep.mubr.bf16.mxu0 %v10794_v25 }
 0x40e   :  { %10336 = vmatpush3.bf16.msra.mxu1 %v10793_v17  ;;  %10309 = vmatprep.subr.bf16.mxu0 %v10795_v57 }
 0x40f   :  { %10337 = vmatprep.subr.bf16.mxu1 %v10796_v49 }
 0x411   :  { %10310 = vmatpush3.bf16.msra.mxu0 %v10795_v57 }
 0x412   :  { %10338 = vmatpush3.bf16.msra.mxu1 %v10796_v49  ;;  %10311 = vmatprep.subr.bf16.mxu0 %v10797_v60 }
 0x413   :  { %10339 = vmatprep.subr.bf16.mxu1 %v10798_v46 }
 0x415   :  { %10312 = vmatpush3.bf16.msra.mxu0 %v10797_v60 }
 0x416   :  { %10340 = vmatpush3.bf16.msra.mxu1 %v10798_v46  ;;  %10313 = vmatprep.subr.bf16.mxu0 %v10799_v21 }
 0x417   :  { %10341 = vmatprep.subr.bf16.mxu1 %v10800_v22 }
 0x419   :  { %10314 = vmatpush3.bf16.msra.mxu0 %v10799_v21 }
 0x41a   :  { %10342 = vmatpush3.bf16.msra.mxu1 %v10800_v22  ;;  %10315 = vmatprep.subr.bf16.mxu0 %v10801_v33 }
 0x41d   :  { %10344 = vmatmul.mubr.bf16.vlgmr.msra.gmra.mxu1 %v10802_v59  ;;  %10316 = vmatpush3.bf16.msra.mxu0 %v10801_v33 }
 0x41e   :  { %10347 = vmatprep.mubr.bf16.mxu1 %v10803_v7  ;;  %10317 = vmatprep.subr.bf16.mxu0 %v10804_v9 }
 0x421   :  { %10318 = vmatpush3.bf16.msra.mxu0 %v10804_v9 }
 0x424   :  { %10320 = vmatmul.mubr.bf16.vlgmr.msra.gmra.mxu0 %v10805_v0 }
 0x425   :  { %10348 = vmatmul.mubr.bf16.gmra.mxu1 %v10806_v11  ;;  %10323 = vmatprep.mubr.bf16.mxu0 %v10807_v30 }
 0x42c   :  { %10324 = vmatmul.mubr.bf16.gmra.mxu0 %v10808_v1 }
 0x47c   :  { %v10201_v61 = vpop.f32.mrf.mxu1 }
 0x47e   :  { %v6380_v29 = vpop.f32.mrf.mxu1 }
 0x480   :  { %v10202_v20 = vpop.f32.mrf.mxu1 }
 0x482   :  { %v6383_v32 = vpop.f32.mrf.mxu1 }
 0x483   :  { %v10177_v43 = vpop.f32.mrf.mxu0 }
 0x484   :  { %v6389_v17 = vadd.f32 %v10201_v61, %v10177_v43 }
 0x485   :  { %v6243_v26 = vpop.f32.mrf.mxu0 }
 0x486   :  { %v6381_v45 = vadd.f32 %v6380_v29, %v6243_v26 }
 0x487   :  { %v10178_v50 = vpop.f32.mrf.mxu0 }
 0x488   :  { %v6392_v46 = vadd.f32 %v10202_v20, %v10178_v50 }
 0x489   :  { %v6246_v10 = vpop.f32.mrf.mxu0 }
 0x48a   :  { %v6384_v57 = vadd.f32 %v6383_v32, %v6246_v10 }
 0x48c   :  { %v10205_v2 = vpop.f32.mrf.mxu1 }
 0x48e   :  { %v6396_v34 = vpop.f32.mrf.mxu1 }
 0x490   :  { %v10206_v42 = vpop.f32.mrf.mxu1 }
 0x492   :  { %v6399_v15 = vpop.f32.mrf.mxu1 }
 0x493   :  { %v10181_v8 = vpop.f32.mrf.mxu0 }
 0x494   :  { %v6405_v21 = vadd.f32 %v10205_v2, %v10181_v8 }
 0x495   :  { %v6259_v63 = vpop.f32.mrf.mxu0 }
 0x496   :  { %v6397_v11 = vadd.f32 %v6396_v34, %v6259_v63 }
 0x497   :  { %v10182_v38 = vpop.f32.mrf.mxu0 }
 0x498   :  { %v6408_v26 = vadd.f32 %v10206_v42, %v10182_v38 }
 0x499   :  { %v6262_v23 = vpop.f32.mrf.mxu0 }
 0x49a   :  { %v6400_v61 = vadd.f32 %v6399_v15, %v6262_v23 }
 0x49c   :  { %v10249_v6 = vpop.f32.mrf.mxu1 }
 0x49e   :  { %v6714_v18 = vpop.f32.mrf.mxu1 }
 0x4a0   :  { %v10250_v19 = vpop.f32.mrf.mxu1 }
 0x4a2   :  { %v6717_v16 = vpop.f32.mrf.mxu1 }
 0x4a3   :  { %v10225_v31 = vpop.f32.mrf.mxu0 }
 0x4a4   :  { %v10253_v54 = vpop.f32.mrf.mxu1  ;;  %v6576_v49 = vadd.f32 %v10225_v31, %v6389_v17 }
 0x4a5   :  { %v6543_v58 = vpop.f32.mrf.mxu0 }
 0x4a6   :  { %v6730_v47 = vpop.f32.mrf.mxu1  ;;  %v6574_v48 = vadd.f32 %v6543_v58, %v6381_v45  ;;  %v6747_v30 = vadd.f32 %v10249_v6, %v6576_v49 }
 0x4a7   :  { %v10226_v14 = vpop.f32.mrf.mxu0 }
 0x4a8   :  { %v10254_v24 = vpop.f32.mrf.mxu1  ;;  %v6745_v9 = vadd.f32 %v6714_v18, %v6574_v48  ;;  %v6577_v59 = vadd.f32 %v10226_v14, %v6392_v46 }
 0x4a9   :  { %v6546_v52 = vpop.f32.mrf.mxu0 }
 0x4aa   :  { %v6733_v53 = vpop.f32.mrf.mxu1  ;;  %v6575_v22 = vadd.f32 %v6546_v52, %v6384_v57  ;;  %v6748_v20 = vadd.f32 %v10250_v19, %v6577_v59 }
 0x4ab   :  { %v10229_v51 = vpop.f32.mrf.mxu0 }
 0x4ac   :  { %v6580_v7 = vadd.f32 %v10229_v51, %v6405_v21 }
 0x4ad   :  { %v6559_v35 = vpop.f32.mrf.mxu0 }
 0x4ae   :  { %v6578_v43 = vadd.f32 %v6559_v35, %v6397_v11  ;;  %v6751_v50 = vadd.f32 %v10253_v54, %v6580_v7 }
 0x4af   :  { %v10230_v28 = vpop.f32.mrf.mxu0 }
 0x4b0   :  { %v6581_v58 = vadd.f32 %v10230_v28, %v6408_v26  ;;  %v6749_v34 = vadd.f32 %v6730_v47, %v6578_v43 }
 0x4b1   :  { %v6562_v41 = vpop.f32.mrf.mxu0 }
 0x4b2   :  { %v6579_v8 = vadd.f32 %v6562_v41, %v6400_v61  ;;  %v6752_v38 = vadd.f32 %v10254_v24, %v6581_v58  ;;  %v8576_v24 = vld [vmem:[%s12778_s6] ss:$0 sm:$0xff] }
 0x4bc   :  { %v10297_v39 = vpop.f32.mrf.mxu1 }
 0x4be   :  { %v7056_v56 = vpop.f32.mrf.mxu1 }
 0x4c0   :  { %v10298_v55 = vpop.f32.mrf.mxu1 }
 0x4c2   :  { %v7059_v13 = vpop.f32.mrf.mxu1 }
 0x4c4   :  { %v10273_v12 = vpop.f32.mrf.mxu0  ;;  %v10301_v5 = vpop.f32.mrf.mxu1 }
 0x4c5   :  { %v6918_v32 = vadd.f32 %v10273_v12, %v6747_v30 }
 0x4c6   :  { %v6885_v37 = vpop.f32.mrf.mxu0  ;;  %v12754_v44 = vpop.f32.mrf.mxu1 }
 0x4c7   :  { %v6916_v1 = vadd.f32 %v6885_v37, %v6745_v9  ;;  %v7089_v63 = vadd.f32 %v10297_v39, %v6918_v32 }
 0x4c8   :  { %v10274_v40 = vpop.f32.mrf.mxu0  ;;  %v12756_v62 = vpop.f32.mrf.mxu1 }
 0x4c9   :  { %v7087_v18 = vadd.f32 %v7056_v56, %v6916_v1  ;;  %v6919_v52 = vadd.f32 %v10274_v40, %v6748_v20 }
 0x4ca   :  { %v6888_v3 = vpop.f32.mrf.mxu0  ;;  %v12758_v27 = vpop.f32.mrf.mxu1 }
 0x4cb   :  { %12827 = vst [vmem:[#allocation17_spill] sm:$0xff] %v12758_v27  ;;  %v6746_v27 = vadd.f32 %v6717_v16, %v6575_v22  ;;  %v6750_v16 = vadd.f32 %v6733_v53, %v6579_v8  ;;  %v7090_v19 = vadd.f32 %v10298_v55, %v6919_v52 }
 0x4cc   :  { %v10277_v36 = vpop.f32.mrf.mxu0 }
 0x4cd   :  { %v6917_v2 = vadd.f32 %v6888_v3, %v6746_v27  ;;  %v6922_v51 = vadd.f32 %v10277_v36, %v6751_v50 }
 0x4ce   :  { %v6901_v4 = vpop.f32.mrf.mxu0 }
 0x4cf   :  { %v7088_v15 = vadd.f32 %v7059_v13, %v6917_v2  ;;  %v6920_v23 = vadd.f32 %v6901_v4, %v6749_v34  ;;  %v7093_v54 = vadd.f32 %v10301_v5, %v6922_v51 }
 0x4d0   :  { %v10278_v60 = vpop.f32.mrf.mxu0 }
 0x4d1   :  { %v6923_v28 = vadd.f32 %v10278_v60, %v6752_v38  ;;  %v7091_v27 = vadd.f32 %v12754_v44, %v6920_v23 }
 0x4d2   :  { %v6904_v29 = vpop.f32.mrf.mxu0  ;;  %v12828_v46 = vld [vmem:[#allocation17_spill] sm:$0xff] }
 0x4d3   :  { %v6921_v40 = vadd.f32 %v6904_v29, %v6750_v16  ;;  %v7094_v55 = vadd.f32 %v12756_v62, %v6923_v28 }
 0x4d5   :  { %v7092_v21 = vadd.f32 %v12828_v46, %v6921_v40 }
 0x4dd   :  { %v10345_v25 = vpop.f32.mrf.mxu1 }
 0x4df   :  { %v7398_v33 = vpop.f32.mrf.mxu1 }
 0x4e1   :  { %v10346_v0 = vpop.f32.mrf.mxu1 }
 0x4e3   :  { %v7401_v10 = vpop.f32.mrf.mxu1 }
 0x4e4   :  { %v10321_v31 = vpop.f32.mrf.mxu0 }
 0x4e5   :  { %v10349_v6 = vpop.f32.mrf.mxu1  ;;  %v7260_v35 = vadd.f32 %v10321_v31, %v7089_v63 }
 0x4e6   :  { %v7227_v14 = vpop.f32.mrf.mxu0 }
 0x4e7   :  { %v7258_v37 = vadd.f32 %v7227_v14, %v7087_v18  ;;  %v7414_v56 = vpop.f32.mrf.mxu1  ;;  %v7431_v39 = vadd.f32 %v10345_v25, %v7260_v35 }
 0x4e8   :  { %v10322_v42 = vpop.f32.mrf.mxu0 }
 0x4e9   :  { %v7429_v41 = vadd.f32 %v7398_v33, %v7258_v37  ;;  %v7261_v36 = vadd.f32 %v10322_v42, %v7090_v19  ;;  %v10350_v5 = vpop.f32.mrf.mxu1  ;;  %v7446_v25 = vadd.f32 %v8576_v24, %v7431_v39 }
 0x4ea   :  { %v7230_v12 = vpop.f32.mrf.mxu0 }
 0x4eb   :  { %v7259_v3 = vadd.f32 %v7230_v12, %v7088_v15  ;;  %v7444_v4 = vadd.f32 %v8576_v24, %v7429_v41  ;;  %v7432_v49 = vadd.f32 %v10346_v0, %v7261_v36  ;;  %v7417_v30 = vpop.f32.mrf.mxu1  ;;  %v7454_v61 = vmax.f32 %v7446_v25, 0.0 }
 0x4ec   :  { %v10325_v45 = vpop.f32.mrf.mxu0 }
 0x4ed   :  { %v7264_v47 = vadd.f32 %v10325_v45, %v7093_v54  ;;  %v7430_v53 = vadd.f32 %v7401_v10, %v7259_v3  ;;  %v7452_v11 = vmax.f32 %v7444_v4, 0.0  ;;  %v7447_v29 = vadd.f32 %v8576_v24, %v7432_v49 }
 0x4ee   :  { %v7243_v17 = vpop.f32.mrf.mxu0 }
 0x4ef   :  { %v7435_v13 = vadd.f32 %v10349_v6, %v7264_v47  ;;  %v7262_v48 = vadd.f32 %v7243_v17, %v7091_v27  ;;  %v7445_v9 = vadd.f32 %v8576_v24, %v7430_v53  ;;  %v7460_v31 = vmax.f32 %v7452_v11, %v7454_v61 }
 0x4f0   :  { %v10326_v57 = vpop.f32.mrf.mxu0  ;;  %v7455_v20 = vmax.f32 %v7447_v29, 0.0 }
 0x4f1   :  { %v7265_v60 = vadd.f32 %v10326_v57, %v7094_v55  ;;  %v7450_v22 = vadd.f32 %v8576_v24, %v7435_v13  ;;  %v7433_v44 = vadd.f32 %v7414_v56, %v7262_v48  ;;  %v7453_v0 = vmax.f32 %v7445_v9, 0.0 }
 0x4f2   :  { %v7246_v33 = vpop.f32.mrf.mxu0 }
 0x4f3   :  { %v7436_v59 = vadd.f32 %v10350_v5, %v7265_v60  ;;  %v7263_v7 = vadd.f32 %v7246_v33, %v7092_v21  ;;  %v7448_v1 = vadd.f32 %v8576_v24, %v7433_v44  ;;  %v7458_v43 = vmax.f32 %v7450_v22, 0.0 }
 0x4f4   :  { %v7461_v18 = vmax.f32 %v7453_v0, %v7455_v20 }
 0x4f5   :  { %v7451_v62 = vadd.f32 %v8576_v24, %v7436_v59  ;;  %v7434_v26 = vadd.f32 %v7417_v30, %v7263_v7  ;;  %v7456_v32 = vmax.f32 %v7448_v1, 0.0 }
 0x4f7   :  { %v7449_v10 = vadd.f32 %v8576_v24, %v7434_v26  ;;  %v7462_v58 = vmax.f32 %v7456_v32, %v7458_v43  ;;  %v7459_v2 = vmax.f32 %v7451_v62, 0.0 }
 0x4f9   :  { %v7457_v50 = vmax.f32 %v7449_v10, 0.0  ;;  %v7464_v8 = vmax.f32 %v7460_v31, %v7462_v58 }
 0x4fb   :  { %v7463_v14 = vmax.f32 %v7457_v50, %v7459_v2  ;;  %7466 = vst [vmem:[%s12779_s7] sm:$0xff] %v7464_v8 }
 0x4fd   :  { %v7465_v52 = vmax.f32 %v7461_v18, %v7463_v14 }
 0x4ff   :  { %7467 = vst [vmem:[%s12779_s7 + $0x8] sm:$0xff] %v7465_v52 }

</bundles_post_ra>
